<compile_context>
chip_gen: v7x
topology: tpu7x:2x2x1
jax: 0.10.0
libtpu: 0.0.40
codegen_flags: <defaults>
</compile_context>

<pallas_src>
import jax
import jax.numpy as jnp
import numpy as np
from jax.experimental import pallas as pl
from jax.experimental.pallas import tpu as pltpu

_EPS = 1e-5
_P2 = 89      # layer-2 working width: 9x9 grid at pitch 10 (offsets 0..88)
_P3 = 67      # layer-3 working width: 7x7 grid at pitch 10 (offsets 0..66)
_OUTW = 128   # lane-dense padded output width


# ----------------------------- Pallas kernel --------------------------------
def _ln_relu(y, gamma, beta, mask, n_valid):
    """Whole-map LayerNorm (single-pass stats in f32) + affine + ReLU.
    `mask` (0/1, broadcast over sublanes) removes junk lanes from the stats;
    zero-padded gamma/beta force junk lanes to 0 after the affine."""
    ym = y if mask is None else y * mask
    s = jnp.sum(ym)
    q = jnp.sum(ym * y)
    mean = s / n_valid
    var = jnp.maximum(q / n_valid - mean * mean, 0.0)
    inv = jax.lax.rsqrt(var + _EPS)
    return jnp.maximum((y - mean) * inv * gamma + beta, 0.0)


def _make_fused_kernel(tb):
    d2 = (0, 1, 10, 11)   # layer-2 group lane offsets: (i//2)*10 + (j//2)

    def kernel(p_ref, w1_ref, b1_ref, g1_ref, be1_ref,
               w2_ref, b2_ref, g2_ref, be2_ref, m2_ref,
               w3_ref, b3_ref, g3_ref, be3_ref, m3_ref,
               out_ref):
        f32, bf16 = jnp.float32, jnp.bfloat16

        for s in range(tb):   # TB independent per-sample chains (interleavable)
            # ---- layer 1: 8x8/s4 conv, one K=256 dot per stride-2 phase,
            # results stacked along sublanes -> phase-stacked [128, 100].
            y1 = jnp.concatenate(
                [jnp.dot(w1_ref[...], p_ref[s, p], preferred_element_type=f32)
                 for p in range(4)], axis=0) + b1_ref[...]              # [128,100]
            z1 = _ln_relu(y1, g1_ref[...], be1_ref[...], None, 32 * 400).astype(bf16)

            # ---- layer 2: 4x4/s2 conv as 4 dots of K=128; each group's input
            # is a contiguous lane slice of the phase-stacked z1.
            acc2 = jnp.dot(w2_ref[0], z1[:, d2[0]:d2[0] + _P2],
                           preferred_element_type=f32)
            for g in range(1, 4):
                acc2 = acc2 + jnp.dot(w2_ref[g], z1[:, d2[g]:d2[g] + _P2],
                                      preferred_element_type=f32)
            y2 = acc2 + b2_ref[...]                                      # [64, 89]
            z2 = _ln_relu(y2, g2_ref[...], be2_ref[...], m2_ref[...],
                          64 * 81).astype(bf16)

            # ---- layer 3: 3x3/s1 conv as 3 dots of K=192 on a sublane-stacked
            # slab of three row-shifted views of z2.
            slab = jnp.concatenate(
                [z2[:, 0:69], z2[:, 10:79], z2[:, 20:89]], axis=0)       # [192, 69]
            acc3 = jnp.dot(w3_ref[0], slab[:, 0:_P3], preferred_element_type=f32)
            for j in range(1, 3):
                acc3 = acc3 + jnp.dot(w3_ref[j], slab[:, j:j + _P3],
                                      preferred_element_type=f32)
            y3 = acc3 + b3_ref[...]                                      # [64, 67]
            z3 = _ln_relu(y3, g3_ref[...], be3_ref[...], m3_ref[...], 64 * 49)

            # ---- lane-dense padded store (full-width unmasked vst); the 7x7
            # gather happens in the wrapper.
            out_ref[s] = jnp.concatenate(
                [z3, jnp.zeros((64, _OUTW - _P3), f32)], axis=1)         # [64, 128]

    return kernel


def _fused_forward(patches, params, tb):
    """patches: [B, 4, Cin*64, 100] (bf16) -> [B, 64, 128] padded pitch-10 maps."""
    B = patches.shape[0]

    def const_spec(a):
        nd = a.ndim
        return pl.BlockSpec(a.shape, lambda i, nd=nd: (0,) * nd)

    return pl.pallas_call(
        _make_fused_kernel(tb),
        out_shape=jax.ShapeDtypeStruct((B, 64, _OUTW), jnp.float32),
        grid_spec=pltpu.PrefetchScalarGridSpec(
            num_scalar_prefetch=0,
            grid=(B // tb,),
            in_specs=[pl.BlockSpec((tb,) + patches.shape[1:],
                                   lambda i: (i, 0, 0, 0))]
                     + [const_spec(a) for a in params],
            out_specs=pl.BlockSpec((tb, 64, _OUTW), lambda i: (i, 0, 0)),
        ),
        compiler_params=pltpu.CompilerParams(
            dimension_semantics=("parallel",),      # megacore: samples split per TC
            vmem_limit_bytes=32 * 1024 * 1024,
        ),
    )(patches, *params)


# ------------------------------ JAX glue -------------------------------------
def _im2col_l1_phases(x):
    """x: [B, C, 84, 84] -> [B, 4, C*64, 100] patches for the 8x8/stride-4 conv.
    Leading phase axis p = (oh%2)*2 + (ow%2); lane = (oh//2)*10 + (ow//2);
    row = c*64 + ki*8 + kj (matches PyTorch OIHW weight flattening)."""
    B, C, H, W = x.shape
    OH = (H - 8) // 4 + 1
    OW = (W - 8) // 4 + 1                                  # 20, 20
    slabs = []
    for ki in range(8):
        for kj in range(8):
            slabs.append(x[:, :, ki:ki + 4 * OH:4, kj:kj + 4 * OW:4])  # [B,C,20,20]
    p = jnp.stack(slabs, axis=2)                           # [B, C, 64, 20, 20]
    p = p.reshape(B, C, 64, OH // 2, 2, OW // 2, 2)        # [B,C,kk,h2,pi,w2,pj]
    p = p.transpose(0, 4, 6, 1, 2, 3, 5)                   # [B,pi,pj,C,kk,h2,w2]
    return p.reshape(B, 4, C * 64, (OH // 2) * (OW // 2))


def _stack_phases(a):
    """[C, 20, 20] LayerNorm param -> phase-stacked [4*C, 100]."""
    C = a.shape[0]
    parts = []
    for p in range(4):
        pi, pj = p // 2, p % 2
        parts.append(a[:, pi::2, pj::2].reshape(C, 100))
    return jnp.concatenate(parts, axis=0)


def _pitched(a, s, pitch, n):
    """[C, s, s] affine param -> [C, n] in the pitch layout (junk lanes = 0)."""
    a = jnp.pad(a, ((0, 0), (0, 0), (0, pitch - s)))
    return a.reshape(a.shape[0], s * pitch)[:, :n]


class CNNFeatureExtractorPallas:
    """Matches nn.Module CNNFeatureExtractor with input_shape=(C, 84, 84)."""

    def __init__(self, input_shape, key):
        assert input_shape[1] == 84 and input_shape[2] == 84, \
            "LayerNorm shapes in the reference module imply 84x84 input"
        self.input_shape = input_shape
        c_in = input_shape[0]
        ks = jax.random.split(key, 12)

        def conv_init(kw_, kb_, cout, cin, kh, kw):
            fan_in = cin * kh * kw
            w = jax.random.normal(kw_, (cout, cin, kh, kw), jnp.float32) / np.sqrt(fan_in)
            b = 0.1 * jax.random.normal(kb_, (cout,), jnp.float32)
            return w, b

        self.w1, self.b1 = conv_init(ks[0], ks[1], 32, c_in, 8, 8)
        self.w2, self.b2 = conv_init(ks[2], ks[3], 64, 32, 4, 4)
        self.w3, self.b3 = conv_init(ks[4], ks[5], 64, 64, 3, 3)
        # LayerNorm affine params (default 1/0, perturbed so the path is exercised).
        self.g1 = jnp.ones((32, 20, 20), jnp.float32) + 0.01 * jax.random.normal(ks[6], (32, 20, 20))
        self.be1 = 0.01 * jax.random.normal(ks[7], (32, 20, 20), jnp.float32)
        self.g2 = jnp.ones((64, 9, 9), jnp.float32) + 0.01 * jax.random.normal(ks[8], (64, 9, 9))
        self.be2 = 0.01 * jax.random.normal(ks[9], (64, 9, 9), jnp.float32)
        self.g3 = jnp.ones((64, 7, 7), jnp.float32) + 0.01 * jax.random.normal(ks[10], (64, 7, 7))
        self.be3 = 0.01 * jax.random.normal(ks[11], (64, 7, 7), jnp.float32)
        self.feature_size = 7 * 7 * 64

        bf16 = jnp.bfloat16

        # ---- layer 1: single [32, Cin*64] weight; bias/affine in the
        # phase-stacked [128, 100] layout.
        w1m = self.w1.reshape(32, c_in * 64).astype(bf16)
        b1s = jnp.tile(self.b1, 4).reshape(128, 1)
        g1s = _stack_phases(self.g1)
        be1s = _stack_phases(self.be1)

        # ---- layer 2: 4 groups (di, dj) of K=128 each; column = phase*32 + cin,
        # tap (i, j) = (2*di + phase//2, 2*dj + phase%2).
        groups = ((0, 0), (0, 1), (1, 0), (1, 1))
        w2g = jnp.stack([
            jnp.concatenate(
                [self.w2[:, :, 2 * di + p // 2, 2 * dj + p % 2] for p in range(4)],
                axis=1)
            for (di, dj) in groups], axis=0).astype(bf16)            # [4, 64, 128]
        b2c = self.b2.reshape(64, 1)
        g2t, be2t = _pitched(self.g2, 9, 10, _P2), _pitched(self.be2, 9, 10, _P2)
        m2 = jnp.asarray((np.arange(_P2) % 10 != 9).astype(np.float32))[None, :]

        # ---- layer 3: 3 groups by kernel column j, K=192 each; column = i*64 + cin.
        w3g = jnp.stack([
            jnp.concatenate([self.w3[:, :, i, j] for i in range(3)], axis=1)
            for j in range(3)], axis=0).astype(bf16)                  # [3, 64, 192]
        b3c = self.b3.reshape(64, 1)
        g3t, be3t = _pitched(self.g3, 7, 10, _P3), _pitched(self.be3, 7, 10, _P3)
        m3 = jnp.asarray((np.arange(_P3) % 10 <= 6).astype(np.float32))[None, :]

        self._kparams = (w1m, b1s, g1s, be1s,
                         w2g, b2c, g2t, be2t, m2,
                         w3g, b3c, g3t, be3t, m3)

    def __call__(self, x):
        B = x.shape[0]
        patches = _im2col_l1_phases(x).astype(jnp.bfloat16)   # [B, 4, Cin*64, 100]
        tb = next(t for t in (8, 4, 2, 1) if B % t == 0)       # samples per grid step
        out = _fused_forward(patches, self._kparams, tb)       # [B, 64, 128]
        # gather the 7x7 valid pixels from the pitch-10 layout (cheap XLA slice).
        feat = out[:, :, :70].reshape(B, 64, 7, 10)[:, :, :, :7]
        return feat.reshape(B, self.feature_size)              # NCHW-flatten order


# --------------------------- pure-JAX reference ------------------------------
def _ref_layer(x, w, b, gamma, beta, stride):
    y = jax.lax.conv_general_dilated(
        x, w, window_strides=(stride, stride), padding="VALID",
        dimension_numbers=("NCHW", "OIHW", "NCHW"),
        precision=jax.lax.Precision.HIGHEST)
    y = y + b[None, :, None, None]
    mean = jnp.mean(y, axis=(1, 2, 3), keepdims=True)
    var = jnp.mean((y - mean) ** 2, axis=(1, 2, 3), keepdims=True)
    y = (y - mean) / jnp.sqrt(var + _EPS)
    y = y * gamma[None] + beta[None]
    return jnp.maximum(y, 0.0)


def reference_forward(model, x):
    x = _ref_layer(x, model.w1, model.b1, model.g1, model.be1, 4)
    x = _ref_layer(x, model.w2, model.b2, model.g2, model.be2, 2)
    x = _ref_layer(x, model.w3, model.b3, model.g3, model.be3, 1)
    return x.reshape(-1, model.feature_size)


# --------------------------------- main ---------------------------------------
if __name__ == "__main__":
    key = jax.random.PRNGKey(0)
    k_param, k_x = jax.random.split(key)

    B, C, H, W = 2, 4, 84, 84          # LayerNorm dims in the module force 84x84
    x = jax.random.normal(k_x, (B, C, H, W), jnp.float32)

    model = CNNFeatureExtractorPallas((C, H, W), k_param)

    out = jax.jit(model.__call__)(x)
    out = jax.block_until_ready(out)

    assert out.shape == (B, model.feature_size), out.shape
    ref = jax.block_until_ready(reference_forward(model, x))

    out_np, ref_np = np.asarray(out), np.asarray(ref)
    # bf16 MXU operands (f32 accumulation + f32 LayerNorm stats): loosened
    # elementwise tolerance, plus a mean-error sanity check.
    np.testing.assert_allclose(out_np, ref_np, rtol=5e-2, atol=5e-2)
    assert float(np.mean(np.abs(out_np - ref_np))) < 2e-2

    print("KERNEL_OK")
</pallas_src>

<mosaic_0001>
module attributes {stable_mosaic.version = 11 : i64} {
  func.func @kernel(%arg0: i32, %arg1: memref<2x4x256x100xbf16, #tpu.memory_space<vmem>>, %arg2: memref<32x256xbf16, #tpu.memory_space<vmem>>, %arg3: memref<128x1xf32, #tpu.memory_space<vmem>>, %arg4: memref<128x100xf32, #tpu.memory_space<vmem>>, %arg5: memref<128x100xf32, #tpu.memory_space<vmem>>, %arg6: memref<4x64x128xbf16, #tpu.memory_space<vmem>>, %arg7: memref<64x1xf32, #tpu.memory_space<vmem>>, %arg8: memref<64x89xf32, #tpu.memory_space<vmem>>, %arg9: memref<64x89xf32, #tpu.memory_space<vmem>>, %arg10: memref<1x89xf32, #tpu.memory_space<vmem>>, %arg11: memref<3x64x192xbf16, #tpu.memory_space<vmem>>, %arg12: memref<64x1xf32, #tpu.memory_space<vmem>>, %arg13: memref<64x67xf32, #tpu.memory_space<vmem>>, %arg14: memref<64x67xf32, #tpu.memory_space<vmem>>, %arg15: memref<1x67xf32, #tpu.memory_space<vmem>>, %arg16: memref<2x64x128xf32, #tpu.memory_space<vmem>>) attributes {dimension_semantics = [#tpu.dimension_semantics<parallel>], iteration_bounds = array<i64: 1>, scalar_prefetch = 0 : i64, scratch_operands = 0 : i64, tpu.core_type = #tpu.core_type<tc>, window_params = [{transform_indices = @transform_0, window_bounds = array<i64: 2, 4, 256, 100>}, {pipeline_mode = #tpu.pipeline_mode<synchronous>, transform_indices = @transform_1, window_bounds = array<i64: 32, 256>}, {pipeline_mode = #tpu.pipeline_mode<synchronous>, transform_indices = @transform_2, window_bounds = array<i64: 128, 1>}, {pipeline_mode = #tpu.pipeline_mode<synchronous>, transform_indices = @transform_3, window_bounds = array<i64: 128, 100>}, {pipeline_mode = #tpu.pipeline_mode<synchronous>, transform_indices = @transform_4, window_bounds = array<i64: 128, 100>}, {pipeline_mode = #tpu.pipeline_mode<synchronous>, transform_indices = @transform_5, window_bounds = array<i64: 4, 64, 128>}, {pipeline_mode = #tpu.pipeline_mode<synchronous>, transform_indices = @transform_6, window_bounds = array<i64: 64, 1>}, {pipeline_mode = #tpu.pipeline_mode<synchronous>, transform_indices = @transform_7, window_bounds = array<i64: 64, 89>}, {pipeline_mode = #tpu.pipeline_mode<synchronous>, transform_indices = @transform_8, window_bounds = array<i64: 64, 89>}, {pipeline_mode = #tpu.pipeline_mode<synchronous>, transform_indices = @transform_9, window_bounds = array<i64: 1, 89>}, {pipeline_mode = #tpu.pipeline_mode<synchronous>, transform_indices = @transform_10, window_bounds = array<i64: 3, 64, 192>}, {pipeline_mode = #tpu.pipeline_mode<synchronous>, transform_indices = @transform_11, window_bounds = array<i64: 64, 1>}, {pipeline_mode = #tpu.pipeline_mode<synchronous>, transform_indices = @transform_12, window_bounds = array<i64: 64, 67>}, {pipeline_mode = #tpu.pipeline_mode<synchronous>, transform_indices = @transform_13, window_bounds = array<i64: 64, 67>}, {pipeline_mode = #tpu.pipeline_mode<synchronous>, transform_indices = @transform_14, window_bounds = array<i64: 1, 67>}, {transform_indices = @transform_15, window_bounds = array<i64: 2, 64, 128>}]} {
    %c0 = arith.constant 0 : index
    %c0_0 = arith.constant 0 : index
    %0 = vector.load %arg2[%c0, %c0_0] : memref<32x256xbf16, #tpu.memory_space<vmem>>, vector<32x256xbf16>
    %c0_1 = arith.constant 0 : index
    %c0_2 = arith.constant 0 : index
    %c0_3 = arith.constant 0 : index
    %c0_4 = arith.constant 0 : index
    %1 = vector.load %arg1[%c0_1, %c0_2, %c0_3, %c0_4] : memref<2x4x256x100xbf16, #tpu.memory_space<vmem>>, vector<1x1x256x100xbf16>
    %2 = vector.shape_cast %1 : vector<1x1x256x100xbf16> to vector<256x100xbf16>
    %cst = arith.constant dense<0.000000e+00> : vector<32x100xf32>
    %3 = tpu.matmul %0, %2, %cst {dimension_numbers = #tpu.dot_dimension_numbers<[1], [0], [0], [1], [0, 0, 1, 1], [], []>} : vector<32x256xbf16>, vector<256x100xbf16>, vector<32x100xf32> -> vector<32x100xf32>
    %c0_5 = arith.constant 0 : index
    %c0_6 = arith.constant 0 : index
    %4 = vector.load %arg2[%c0_5, %c0_6] : memref<32x256xbf16, #tpu.memory_space<vmem>>, vector<32x256xbf16>
    %c0_7 = arith.constant 0 : index
    %c1 = arith.constant 1 : index
    %c0_8 = arith.constant 0 : index
    %c0_9 = arith.constant 0 : index
    %5 = vector.load %arg1[%c0_7, %c1, %c0_8, %c0_9] : memref<2x4x256x100xbf16, #tpu.memory_space<vmem>>, vector<1x1x256x100xbf16>
    %6 = vector.shape_cast %5 : vector<1x1x256x100xbf16> to vector<256x100xbf16>
    %cst_10 = arith.constant dense<0.000000e+00> : vector<32x100xf32>
    %7 = tpu.matmul %4, %6, %cst_10 {dimension_numbers = #tpu.dot_dimension_numbers<[1], [0], [0], [1], [0, 0, 1, 1], [], []>} : vector<32x256xbf16>, vector<256x100xbf16>, vector<32x100xf32> -> vector<32x100xf32>
    %c0_11 = arith.constant 0 : index
    %c0_12 = arith.constant 0 : index
    %8 = vector.load %arg2[%c0_11, %c0_12] : memref<32x256xbf16, #tpu.memory_space<vmem>>, vector<32x256xbf16>
    %c0_13 = arith.constant 0 : index
    %c2 = arith.constant 2 : index
    %c0_14 = arith.constant 0 : index
    %c0_15 = arith.constant 0 : index
    %9 = vector.load %arg1[%c0_13, %c2, %c0_14, %c0_15] : memref<2x4x256x100xbf16, #tpu.memory_space<vmem>>, vector<1x1x256x100xbf16>
    %10 = vector.shape_cast %9 : vector<1x1x256x100xbf16> to vector<256x100xbf16>
    %cst_16 = arith.constant dense<0.000000e+00> : vector<32x100xf32>
    %11 = tpu.matmul %8, %10, %cst_16 {dimension_numbers = #tpu.dot_dimension_numbers<[1], [0], [0], [1], [0, 0, 1, 1], [], []>} : vector<32x256xbf16>, vector<256x100xbf16>, vector<32x100xf32> -> vector<32x100xf32>
    %c0_17 = arith.constant 0 : index
    %c0_18 = arith.constant 0 : index
    %12 = vector.load %arg2[%c0_17, %c0_18] : memref<32x256xbf16, #tpu.memory_space<vmem>>, vector<32x256xbf16>
    %c0_19 = arith.constant 0 : index
    %c3 = arith.constant 3 : index
    %c0_20 = arith.constant 0 : index
    %c0_21 = arith.constant 0 : index
    %13 = vector.load %arg1[%c0_19, %c3, %c0_20, %c0_21] : memref<2x4x256x100xbf16, #tpu.memory_space<vmem>>, vector<1x1x256x100xbf16>
    %14 = vector.shape_cast %13 : vector<1x1x256x100xbf16> to vector<256x100xbf16>
    %cst_22 = arith.constant dense<0.000000e+00> : vector<32x100xf32>
    %15 = tpu.matmul %12, %14, %cst_22 {dimension_numbers = #tpu.dot_dimension_numbers<[1], [0], [0], [1], [0, 0, 1, 1], [], []>} : vector<32x256xbf16>, vector<256x100xbf16>, vector<32x100xf32> -> vector<32x100xf32>
    %16 = tpu.concatenate %3, %7, %11, %15 in 0 : vector<32x100xf32>, vector<32x100xf32>, vector<32x100xf32>, vector<32x100xf32> -> vector<128x100xf32>
    %c0_23 = arith.constant 0 : index
    %c0_24 = arith.constant 0 : index
    %17 = vector.load %arg3[%c0_23, %c0_24] : memref<128x1xf32, #tpu.memory_space<vmem>>, vector<128x1xf32>
    %18 = vector.broadcast %17 : vector<128x1xf32> to vector<128x100xf32>
    %19 = arith.addf %16, %18 : vector<128x100xf32>
    %c0_25 = arith.constant 0 : index
    %c0_26 = arith.constant 0 : index
    %20 = vector.load %arg4[%c0_25, %c0_26] : memref<128x100xf32, #tpu.memory_space<vmem>>, vector<128x100xf32>
    %c0_27 = arith.constant 0 : index
    %c0_28 = arith.constant 0 : index
    %21 = vector.load %arg5[%c0_27, %c0_28] : memref<128x100xf32, #tpu.memory_space<vmem>>, vector<128x100xf32>
    %22 = vector.shape_cast %19 : vector<128x100xf32> to vector<1x128x100xf32>
    %cst_29 = arith.constant dense<0.000000e+00> : vector<1xf32>
    %23 = vector.multi_reduction <add>, %22, %cst_29 [1, 2] : vector<1x128x100xf32> to vector<1xf32>
    %24 = vector.shape_cast %23 : vector<1xf32> to vector<1x1x1xf32>
    %25 = vector.extract %24[0, 0, 0] : f32 from vector<1x1x1xf32>
    %26 = arith.mulf %19, %19 : vector<128x100xf32>
    %27 = vector.shape_cast %26 : vector<128x100xf32> to vector<1x128x100xf32>
    %cst_30 = arith.constant dense<0.000000e+00> : vector<1xf32>
    %28 = vector.multi_reduction <add>, %27, %cst_30 [1, 2] : vector<1x128x100xf32> to vector<1xf32>
    %29 = vector.shape_cast %28 : vector<1xf32> to vector<1x1x1xf32>
    %30 = vector.extract %29[0, 0, 0] : f32 from vector<1x1x1xf32>
    %cst_31 = arith.constant 1.280000e+04 : f32
    %31 = arith.divf %25, %cst_31 : f32
    %cst_32 = arith.constant 1.280000e+04 : f32
    %32 = arith.divf %30, %cst_32 : f32
    %33 = arith.mulf %31, %31 : f32
    %34 = arith.subf %32, %33 : f32
    %cst_33 = arith.constant 0.000000e+00 : f32
    %35 = arith.maximumf %34, %cst_33 : f32
    %cst_34 = arith.constant 9.99999974E-6 : f32
    %36 = arith.addf %35, %cst_34 : f32
    %37 = math.rsqrt %36 : f32
    %38 = vector.broadcast %31 : f32 to vector<128x100xf32>
    %39 = arith.subf %19, %38 : vector<128x100xf32>
    %40 = vector.broadcast %37 : f32 to vector<128x100xf32>
    %41 = arith.mulf %39, %40 : vector<128x100xf32>
    %42 = arith.mulf %41, %20 : vector<128x100xf32>
    %43 = arith.addf %42, %21 : vector<128x100xf32>
    %cst_35 = arith.constant 0.000000e+00 : f32
    %44 = vector.broadcast %cst_35 : f32 to vector<128x100xf32>
    %45 = arith.maximumf %43, %44 : vector<128x100xf32>
    %46 = arith.truncf %45 : vector<128x100xf32> to vector<128x100xbf16>
    %c0_36 = arith.constant 0 : index
    %c0_37 = arith.constant 0 : index
    %c0_38 = arith.constant 0 : index
    %47 = vector.load %arg6[%c0_36, %c0_37, %c0_38] : memref<4x64x128xbf16, #tpu.memory_space<vmem>>, vector<1x64x128xbf16>
    %48 = vector.shape_cast %47 : vector<1x64x128xbf16> to vector<64x128xbf16>
    %49 = vector.extract_strided_slice %46 {offsets = [0, 0], sizes = [128, 89], strides = [1, 1]} : vector<128x100xbf16> to vector<128x89xbf16>
    %cst_39 = arith.constant dense<0.000000e+00> : vector<64x89xf32>
    %50 = tpu.matmul %48, %49, %cst_39 {dimension_numbers = #tpu.dot_dimension_numbers<[1], [0], [0], [1], [0, 0, 1, 1], [], []>} : vector<64x128xbf16>, vector<128x89xbf16>, vector<64x89xf32> -> vector<64x89xf32>
    %c1_40 = arith.constant 1 : index
    %c0_41 = arith.constant 0 : index
    %c0_42 = arith.constant 0 : index
    %51 = vector.load %arg6[%c1_40, %c0_41, %c0_42] : memref<4x64x128xbf16, #tpu.memory_space<vmem>>, vector<1x64x128xbf16>
    %52 = vector.shape_cast %51 : vector<1x64x128xbf16> to vector<64x128xbf16>
    %53 = vector.extract_strided_slice %46 {offsets = [0, 1], sizes = [128, 89], strides = [1, 1]} : vector<128x100xbf16> to vector<128x89xbf16>
    %cst_43 = arith.constant dense<0.000000e+00> : vector<64x89xf32>
    %54 = tpu.matmul %52, %53, %cst_43 {dimension_numbers = #tpu.dot_dimension_numbers<[1], [0], [0], [1], [0, 0, 1, 1], [], []>} : vector<64x128xbf16>, vector<128x89xbf16>, vector<64x89xf32> -> vector<64x89xf32>
    %55 = arith.addf %50, %54 : vector<64x89xf32>
    %c2_44 = arith.constant 2 : index
    %c0_45 = arith.constant 0 : index
    %c0_46 = arith.constant 0 : index
    %56 = vector.load %arg6[%c2_44, %c0_45, %c0_46] : memref<4x64x128xbf16, #tpu.memory_space<vmem>>, vector<1x64x128xbf16>
    %57 = vector.shape_cast %56 : vector<1x64x128xbf16> to vector<64x128xbf16>
    %58 = vector.extract_strided_slice %46 {offsets = [0, 10], sizes = [128, 89], strides = [1, 1]} : vector<128x100xbf16> to vector<128x89xbf16>
    %cst_47 = arith.constant dense<0.000000e+00> : vector<64x89xf32>
    %59 = tpu.matmul %57, %58, %cst_47 {dimension_numbers = #tpu.dot_dimension_numbers<[1], [0], [0], [1], [0, 0, 1, 1], [], []>} : vector<64x128xbf16>, vector<128x89xbf16>, vector<64x89xf32> -> vector<64x89xf32>
    %60 = arith.addf %55, %59 : vector<64x89xf32>
    %c3_48 = arith.constant 3 : index
    %c0_49 = arith.constant 0 : index
    %c0_50 = arith.constant 0 : index
    %61 = vector.load %arg6[%c3_48, %c0_49, %c0_50] : memref<4x64x128xbf16, #tpu.memory_space<vmem>>, vector<1x64x128xbf16>
    %62 = vector.shape_cast %61 : vector<1x64x128xbf16> to vector<64x128xbf16>
    %63 = vector.extract_strided_slice %46 {offsets = [0, 11], sizes = [128, 89], strides = [1, 1]} : vector<128x100xbf16> to vector<128x89xbf16>
    %cst_51 = arith.constant dense<0.000000e+00> : vector<64x89xf32>
    %64 = tpu.matmul %62, %63, %cst_51 {dimension_numbers = #tpu.dot_dimension_numbers<[1], [0], [0], [1], [0, 0, 1, 1], [], []>} : vector<64x128xbf16>, vector<128x89xbf16>, vector<64x89xf32> -> vector<64x89xf32>
    %65 = arith.addf %60, %64 : vector<64x89xf32>
    %c0_52 = arith.constant 0 : index
    %c0_53 = arith.constant 0 : index
    %66 = vector.load %arg7[%c0_52, %c0_53] : memref<64x1xf32, #tpu.memory_space<vmem>>, vector<64x1xf32>
    %67 = vector.broadcast %66 : vector<64x1xf32> to vector<64x89xf32>
    %68 = arith.addf %65, %67 : vector<64x89xf32>
    %c0_54 = arith.constant 0 : index
    %c0_55 = arith.constant 0 : index
    %69 = vector.load %arg8[%c0_54, %c0_55] : memref<64x89xf32, #tpu.memory_space<vmem>>, vector<64x89xf32>
    %c0_56 = arith.constant 0 : index
    %c0_57 = arith.constant 0 : index
    %70 = vector.load %arg9[%c0_56, %c0_57] : memref<64x89xf32, #tpu.memory_space<vmem>>, vector<64x89xf32>
    %c0_58 = arith.constant 0 : index
    %c0_59 = arith.constant 0 : index
    %71 = vector.load %arg10[%c0_58, %c0_59] : memref<1x89xf32, #tpu.memory_space<vmem>>, vector<1x89xf32>
    %72 = vector.broadcast %71 : vector<1x89xf32> to vector<64x89xf32>
    %73 = arith.mulf %68, %72 : vector<64x89xf32>
    %74 = vector.shape_cast %73 : vector<64x89xf32> to vector<1x64x89xf32>
    %cst_60 = arith.constant dense<0.000000e+00> : vector<1xf32>
    %75 = vector.multi_reduction <add>, %74, %cst_60 [1, 2] : vector<1x64x89xf32> to vector<1xf32>
    %76 = vector.shape_cast %75 : vector<1xf32> to vector<1x1x1xf32>
    %77 = vector.extract %76[0, 0, 0] : f32 from vector<1x1x1xf32>
    %78 = arith.mulf %73, %68 : vector<64x89xf32>
    %79 = vector.shape_cast %78 : vector<64x89xf32> to vector<1x64x89xf32>
    %cst_61 = arith.constant dense<0.000000e+00> : vector<1xf32>
    %80 = vector.multi_reduction <add>, %79, %cst_61 [1, 2] : vector<1x64x89xf32> to vector<1xf32>
    %81 = vector.shape_cast %80 : vector<1xf32> to vector<1x1x1xf32>
    %82 = vector.extract %81[0, 0, 0] : f32 from vector<1x1x1xf32>
    %cst_62 = arith.constant 5.184000e+03 : f32
    %83 = arith.divf %77, %cst_62 : f32
    %cst_63 = arith.constant 5.184000e+03 : f32
    %84 = arith.divf %82, %cst_63 : f32
    %85 = arith.mulf %83, %83 : f32
    %86 = arith.subf %84, %85 : f32
    %cst_64 = arith.constant 0.000000e+00 : f32
    %87 = arith.maximumf %86, %cst_64 : f32
    %cst_65 = arith.constant 9.99999974E-6 : f32
    %88 = arith.addf %87, %cst_65 : f32
    %89 = math.rsqrt %88 : f32
    %90 = vector.broadcast %83 : f32 to vector<64x89xf32>
    %91 = arith.subf %68, %90 : vector<64x89xf32>
    %92 = vector.broadcast %89 : f32 to vector<64x89xf32>
    %93 = arith.mulf %91, %92 : vector<64x89xf32>
    %94 = arith.mulf %93, %69 : vector<64x89xf32>
    %95 = arith.addf %94, %70 : vector<64x89xf32>
    %cst_66 = arith.constant 0.000000e+00 : f32
    %96 = vector.broadcast %cst_66 : f32 to vector<64x89xf32>
    %97 = arith.maximumf %95, %96 : vector<64x89xf32>
    %98 = arith.truncf %97 : vector<64x89xf32> to vector<64x89xbf16>
    %99 = vector.extract_strided_slice %98 {offsets = [0, 0], sizes = [64, 69], strides = [1, 1]} : vector<64x89xbf16> to vector<64x69xbf16>
    %100 = vector.extract_strided_slice %98 {offsets = [0, 10], sizes = [64, 69], strides = [1, 1]} : vector<64x89xbf16> to vector<64x69xbf16>
    %101 = vector.extract_strided_slice %98 {offsets = [0, 20], sizes = [64, 69], strides = [1, 1]} : vector<64x89xbf16> to vector<64x69xbf16>
    %102 = tpu.concatenate %99, %100, %101 in 0 : vector<64x69xbf16>, vector<64x69xbf16>, vector<64x69xbf16> -> vector<192x69xbf16>
    %c0_67 = arith.constant 0 : index
    %c0_68 = arith.constant 0 : index
    %c0_69 = arith.constant 0 : index
    %103 = vector.load %arg11[%c0_67, %c0_68, %c0_69] : memref<3x64x192xbf16, #tpu.memory_space<vmem>>, vector<1x64x192xbf16>
    %104 = vector.shape_cast %103 : vector<1x64x192xbf16> to vector<64x192xbf16>
    %105 = vector.extract_strided_slice %102 {offsets = [0, 0], sizes = [192, 67], strides = [1, 1]} : vector<192x69xbf16> to vector<192x67xbf16>
    %cst_70 = arith.constant dense<0.000000e+00> : vector<64x67xf32>
    %106 = tpu.matmul %104, %105, %cst_70 {dimension_numbers = #tpu.dot_dimension_numbers<[1], [0], [0], [1], [0, 0, 1, 1], [], []>} : vector<64x192xbf16>, vector<192x67xbf16>, vector<64x67xf32> -> vector<64x67xf32>
    %c1_71 = arith.constant 1 : index
    %c0_72 = arith.constant 0 : index
    %c0_73 = arith.constant 0 : index
    %107 = vector.load %arg11[%c1_71, %c0_72, %c0_73] : memref<3x64x192xbf16, #tpu.memory_space<vmem>>, vector<1x64x192xbf16>
    %108 = vector.shape_cast %107 : vector<1x64x192xbf16> to vector<64x192xbf16>
    %109 = vector.extract_strided_slice %102 {offsets = [0, 1], sizes = [192, 67], strides = [1, 1]} : vector<192x69xbf16> to vector<192x67xbf16>
    %cst_74 = arith.constant dense<0.000000e+00> : vector<64x67xf32>
    %110 = tpu.matmul %108, %109, %cst_74 {dimension_numbers = #tpu.dot_dimension_numbers<[1], [0], [0], [1], [0, 0, 1, 1], [], []>} : vector<64x192xbf16>, vector<192x67xbf16>, vector<64x67xf32> -> vector<64x67xf32>
    %111 = arith.addf %106, %110 : vector<64x67xf32>
    %c2_75 = arith.constant 2 : index
    %c0_76 = arith.constant 0 : index
    %c0_77 = arith.constant 0 : index
    %112 = vector.load %arg11[%c2_75, %c0_76, %c0_77] : memref<3x64x192xbf16, #tpu.memory_space<vmem>>, vector<1x64x192xbf16>
    %113 = vector.shape_cast %112 : vector<1x64x192xbf16> to vector<64x192xbf16>
    %114 = vector.extract_strided_slice %102 {offsets = [0, 2], sizes = [192, 67], strides = [1, 1]} : vector<192x69xbf16> to vector<192x67xbf16>
    %cst_78 = arith.constant dense<0.000000e+00> : vector<64x67xf32>
    %115 = tpu.matmul %113, %114, %cst_78 {dimension_numbers = #tpu.dot_dimension_numbers<[1], [0], [0], [1], [0, 0, 1, 1], [], []>} : vector<64x192xbf16>, vector<192x67xbf16>, vector<64x67xf32> -> vector<64x67xf32>
    %116 = arith.addf %111, %115 : vector<64x67xf32>
    %c0_79 = arith.constant 0 : index
    %c0_80 = arith.constant 0 : index
    %117 = vector.load %arg12[%c0_79, %c0_80] : memref<64x1xf32, #tpu.memory_space<vmem>>, vector<64x1xf32>
    %118 = vector.broadcast %117 : vector<64x1xf32> to vector<64x67xf32>
    %119 = arith.addf %116, %118 : vector<64x67xf32>
    %c0_81 = arith.constant 0 : index
    %c0_82 = arith.constant 0 : index
    %120 = vector.load %arg13[%c0_81, %c0_82] : memref<64x67xf32, #tpu.memory_space<vmem>>, vector<64x67xf32>
    %c0_83 = arith.constant 0 : index
    %c0_84 = arith.constant 0 : index
    %121 = vector.load %arg14[%c0_83, %c0_84] : memref<64x67xf32, #tpu.memory_space<vmem>>, vector<64x67xf32>
    %c0_85 = arith.constant 0 : index
    %c0_86 = arith.constant 0 : index
    %122 = vector.load %arg15[%c0_85, %c0_86] : memref<1x67xf32, #tpu.memory_space<vmem>>, vector<1x67xf32>
    %123 = vector.broadcast %122 : vector<1x67xf32> to vector<64x67xf32>
    %124 = arith.mulf %119, %123 : vector<64x67xf32>
    %125 = vector.shape_cast %124 : vector<64x67xf32> to vector<1x64x67xf32>
    %cst_87 = arith.constant dense<0.000000e+00> : vector<1xf32>
    %126 = vector.multi_reduction <add>, %125, %cst_87 [1, 2] : vector<1x64x67xf32> to vector<1xf32>
    %127 = vector.shape_cast %126 : vector<1xf32> to vector<1x1x1xf32>
    %128 = vector.extract %127[0, 0, 0] : f32 from vector<1x1x1xf32>
    %129 = arith.mulf %124, %119 : vector<64x67xf32>
    %130 = vector.shape_cast %129 : vector<64x67xf32> to vector<1x64x67xf32>
    %cst_88 = arith.constant dense<0.000000e+00> : vector<1xf32>
    %131 = vector.multi_reduction <add>, %130, %cst_88 [1, 2] : vector<1x64x67xf32> to vector<1xf32>
    %132 = vector.shape_cast %131 : vector<1xf32> to vector<1x1x1xf32>
    %133 = vector.extract %132[0, 0, 0] : f32 from vector<1x1x1xf32>
    %cst_89 = arith.constant 3.136000e+03 : f32
    %134 = arith.divf %128, %cst_89 : f32
    %cst_90 = arith.constant 3.136000e+03 : f32
    %135 = arith.divf %133, %cst_90 : f32
    %136 = arith.mulf %134, %134 : f32
    %137 = arith.subf %135, %136 : f32
    %cst_91 = arith.constant 0.000000e+00 : f32
    %138 = arith.maximumf %137, %cst_91 : f32
    %cst_92 = arith.constant 9.99999974E-6 : f32
    %139 = arith.addf %138, %cst_92 : f32
    %140 = math.rsqrt %139 : f32
    %141 = vector.broadcast %134 : f32 to vector<64x67xf32>
    %142 = arith.subf %119, %141 : vector<64x67xf32>
    %143 = vector.broadcast %140 : f32 to vector<64x67xf32>
    %144 = arith.mulf %142, %143 : vector<64x67xf32>
    %145 = arith.mulf %144, %120 : vector<64x67xf32>
    %146 = arith.addf %145, %121 : vector<64x67xf32>
    %cst_93 = arith.constant 0.000000e+00 : f32
    %147 = vector.broadcast %cst_93 : f32 to vector<64x67xf32>
    %148 = arith.maximumf %146, %147 : vector<64x67xf32>
    %cst_94 = arith.constant 0.000000e+00 : f32
    %149 = vector.broadcast %cst_94 : f32 to vector<64x61xf32>
    %150 = tpu.concatenate %148, %149 in 1 : vector<64x67xf32>, vector<64x61xf32> -> vector<64x128xf32>
    %c0_95 = arith.constant 0 : index
    %c0_96 = arith.constant 0 : index
    %c0_97 = arith.constant 0 : index
    %151 = vector.load %arg16[%c0_95, %c0_96, %c0_97] : memref<2x64x128xf32, #tpu.memory_space<vmem>>, vector<1x64x128xf32>
    %152 = vector.shape_cast %151 : vector<1x64x128xf32> to vector<64x128xf32>
    %153 = vector.shape_cast %150 : vector<64x128xf32> to vector<1x64x128xf32>
    tpu.vector_store %arg16[%c0_95, %c0_96, %c0_97], %153 {strides = array<i32>} : memref<2x64x128xf32, #tpu.memory_space<vmem>>, vector<1x64x128xf32>,
    %c0_98 = arith.constant 0 : index
    %c0_99 = arith.constant 0 : index
    %154 = vector.load %arg2[%c0_98, %c0_99] : memref<32x256xbf16, #tpu.memory_space<vmem>>, vector<32x256xbf16>
    %c1_100 = arith.constant 1 : index
    %c0_101 = arith.constant 0 : index
    %c0_102 = arith.constant 0 : index
    %c0_103 = arith.constant 0 : index
    %155 = vector.load %arg1[%c1_100, %c0_101, %c0_102, %c0_103] : memref<2x4x256x100xbf16, #tpu.memory_space<vmem>>, vector<1x1x256x100xbf16>
    %156 = vector.shape_cast %155 : vector<1x1x256x100xbf16> to vector<256x100xbf16>
    %cst_104 = arith.constant dense<0.000000e+00> : vector<32x100xf32>
    %157 = tpu.matmul %154, %156, %cst_104 {dimension_numbers = #tpu.dot_dimension_numbers<[1], [0], [0], [1], [0, 0, 1, 1], [], []>} : vector<32x256xbf16>, vector<256x100xbf16>, vector<32x100xf32> -> vector<32x100xf32>
    %c0_105 = arith.constant 0 : index
    %c0_106 = arith.constant 0 : index
    %158 = vector.load %arg2[%c0_105, %c0_106] : memref<32x256xbf16, #tpu.memory_space<vmem>>, vector<32x256xbf16>
    %c1_107 = arith.constant 1 : index
    %c1_108 = arith.constant 1 : index
    %c0_109 = arith.constant 0 : index
    %c0_110 = arith.constant 0 : index
    %159 = vector.load %arg1[%c1_107, %c1_108, %c0_109, %c0_110] : memref<2x4x256x100xbf16, #tpu.memory_space<vmem>>, vector<1x1x256x100xbf16>
    %160 = vector.shape_cast %159 : vector<1x1x256x100xbf16> to vector<256x100xbf16>
    %cst_111 = arith.constant dense<0.000000e+00> : vector<32x100xf32>
    %161 = tpu.matmul %158, %160, %cst_111 {dimension_numbers = #tpu.dot_dimension_numbers<[1], [0], [0], [1], [0, 0, 1, 1], [], []>} : vector<32x256xbf16>, vector<256x100xbf16>, vector<32x100xf32> -> vector<32x100xf32>
    %c0_112 = arith.constant 0 : index
    %c0_113 = arith.constant 0 : index
    %162 = vector.load %arg2[%c0_112, %c0_113] : memref<32x256xbf16, #tpu.memory_space<vmem>>, vector<32x256xbf16>
    %c1_114 = arith.constant 1 : index
    %c2_115 = arith.constant 2 : index
    %c0_116 = arith.constant 0 : index
    %c0_117 = arith.constant 0 : index
    %163 = vector.load %arg1[%c1_114, %c2_115, %c0_116, %c0_117] : memref<2x4x256x100xbf16, #tpu.memory_space<vmem>>, vector<1x1x256x100xbf16>
    %164 = vector.shape_cast %163 : vector<1x1x256x100xbf16> to vector<256x100xbf16>
    %cst_118 = arith.constant dense<0.000000e+00> : vector<32x100xf32>
    %165 = tpu.matmul %162, %164, %cst_118 {dimension_numbers = #tpu.dot_dimension_numbers<[1], [0], [0], [1], [0, 0, 1, 1], [], []>} : vector<32x256xbf16>, vector<256x100xbf16>, vector<32x100xf32> -> vector<32x100xf32>
    %c0_119 = arith.constant 0 : index
    %c0_120 = arith.constant 0 : index
    %166 = vector.load %arg2[%c0_119, %c0_120] : memref<32x256xbf16, #tpu.memory_space<vmem>>, vector<32x256xbf16>
    %c1_121 = arith.constant 1 : index
    %c3_122 = arith.constant 3 : index
    %c0_123 = arith.constant 0 : index
    %c0_124 = arith.constant 0 : index
    %167 = vector.load %arg1[%c1_121, %c3_122, %c0_123, %c0_124] : memref<2x4x256x100xbf16, #tpu.memory_space<vmem>>, vector<1x1x256x100xbf16>
    %168 = vector.shape_cast %167 : vector<1x1x256x100xbf16> to vector<256x100xbf16>
    %cst_125 = arith.constant dense<0.000000e+00> : vector<32x100xf32>
    %169 = tpu.matmul %166, %168, %cst_125 {dimension_numbers = #tpu.dot_dimension_numbers<[1], [0], [0], [1], [0, 0, 1, 1], [], []>} : vector<32x256xbf16>, vector<256x100xbf16>, vector<32x100xf32> -> vector<32x100xf32>
    %170 = tpu.concatenate %157, %161, %165, %169 in 0 : vector<32x100xf32>, vector<32x100xf32>, vector<32x100xf32>, vector<32x100xf32> -> vector<128x100xf32>
    %c0_126 = arith.constant 0 : index
    %c0_127 = arith.constant 0 : index
    %171 = vector.load %arg3[%c0_126, %c0_127] : memref<128x1xf32, #tpu.memory_space<vmem>>, vector<128x1xf32>
    %172 = vector.broadcast %171 : vector<128x1xf32> to vector<128x100xf32>
    %173 = arith.addf %170, %172 : vector<128x100xf32>
    %c0_128 = arith.constant 0 : index
    %c0_129 = arith.constant 0 : index
    %174 = vector.load %arg4[%c0_128, %c0_129] : memref<128x100xf32, #tpu.memory_space<vmem>>, vector<128x100xf32>
    %c0_130 = arith.constant 0 : index
    %c0_131 = arith.constant 0 : index
    %175 = vector.load %arg5[%c0_130, %c0_131] : memref<128x100xf32, #tpu.memory_space<vmem>>, vector<128x100xf32>
    %176 = vector.shape_cast %173 : vector<128x100xf32> to vector<1x128x100xf32>
    %cst_132 = arith.constant dense<0.000000e+00> : vector<1xf32>
    %177 = vector.multi_reduction <add>, %176, %cst_132 [1, 2] : vector<1x128x100xf32> to vector<1xf32>
    %178 = vector.shape_cast %177 : vector<1xf32> to vector<1x1x1xf32>
    %179 = vector.extract %178[0, 0, 0] : f32 from vector<1x1x1xf32>
    %180 = arith.mulf %173, %173 : vector<128x100xf32>
    %181 = vector.shape_cast %180 : vector<128x100xf32> to vector<1x128x100xf32>
    %cst_133 = arith.constant dense<0.000000e+00> : vector<1xf32>
    %182 = vector.multi_reduction <add>, %181, %cst_133 [1, 2] : vector<1x128x100xf32> to vector<1xf32>
    %183 = vector.shape_cast %182 : vector<1xf32> to vector<1x1x1xf32>
    %184 = vector.extract %183[0, 0, 0] : f32 from vector<1x1x1xf32>
    %cst_134 = arith.constant 1.280000e+04 : f32
    %185 = arith.divf %179, %cst_134 : f32
    %cst_135 = arith.constant 1.280000e+04 : f32
    %186 = arith.divf %184, %cst_135 : f32
    %187 = arith.mulf %185, %185 : f32
    %188 = arith.subf %186, %187 : f32
    %cst_136 = arith.constant 0.000000e+00 : f32
    %189 = arith.maximumf %188, %cst_136 : f32
    %cst_137 = arith.constant 9.99999974E-6 : f32
    %190 = arith.addf %189, %cst_137 : f32
    %191 = math.rsqrt %190 : f32
    %192 = vector.broadcast %185 : f32 to vector<128x100xf32>
    %193 = arith.subf %173, %192 : vector<128x100xf32>
    %194 = vector.broadcast %191 : f32 to vector<128x100xf32>
    %195 = arith.mulf %193, %194 : vector<128x100xf32>
    %196 = arith.mulf %195, %174 : vector<128x100xf32>
    %197 = arith.addf %196, %175 : vector<128x100xf32>
    %cst_138 = arith.constant 0.000000e+00 : f32
    %198 = vector.broadcast %cst_138 : f32 to vector<128x100xf32>
    %199 = arith.maximumf %197, %198 : vector<128x100xf32>
    %200 = arith.truncf %199 : vector<128x100xf32> to vector<128x100xbf16>
    %c0_139 = arith.constant 0 : index
    %c0_140 = arith.constant 0 : index
    %c0_141 = arith.constant 0 : index
    %201 = vector.load %arg6[%c0_139, %c0_140, %c0_141] : memref<4x64x128xbf16, #tpu.memory_space<vmem>>, vector<1x64x128xbf16>
    %202 = vector.shape_cast %201 : vector<1x64x128xbf16> to vector<64x128xbf16>
    %203 = vector.extract_strided_slice %200 {offsets = [0, 0], sizes = [128, 89], strides = [1, 1]} : vector<128x100xbf16> to vector<128x89xbf16>
    %cst_142 = arith.constant dense<0.000000e+00> : vector<64x89xf32>
    %204 = tpu.matmul %202, %203, %cst_142 {dimension_numbers = #tpu.dot_dimension_numbers<[1], [0], [0], [1], [0, 0, 1, 1], [], []>} : vector<64x128xbf16>, vector<128x89xbf16>, vector<64x89xf32> -> vector<64x89xf32>
    %c1_143 = arith.constant 1 : index
    %c0_144 = arith.constant 0 : index
    %c0_145 = arith.constant 0 : index
    %205 = vector.load %arg6[%c1_143, %c0_144, %c0_145] : memref<4x64x128xbf16, #tpu.memory_space<vmem>>, vector<1x64x128xbf16>
    %206 = vector.shape_cast %205 : vector<1x64x128xbf16> to vector<64x128xbf16>
    %207 = vector.extract_strided_slice %200 {offsets = [0, 1], sizes = [128, 89], strides = [1, 1]} : vector<128x100xbf16> to vector<128x89xbf16>
    %cst_146 = arith.constant dense<0.000000e+00> : vector<64x89xf32>
    %208 = tpu.matmul %206, %207, %cst_146 {dimension_numbers = #tpu.dot_dimension_numbers<[1], [0], [0], [1], [0, 0, 1, 1], [], []>} : vector<64x128xbf16>, vector<128x89xbf16>, vector<64x89xf32> -> vector<64x89xf32>
    %209 = arith.addf %204, %208 : vector<64x89xf32>
    %c2_147 = arith.constant 2 : index
    %c0_148 = arith.constant 0 : index
    %c0_149 = arith.constant 0 : index
    %210 = vector.load %arg6[%c2_147, %c0_148, %c0_149] : memref<4x64x128xbf16, #tpu.memory_space<vmem>>, vector<1x64x128xbf16>
    %211 = vector.shape_cast %210 : vector<1x64x128xbf16> to vector<64x128xbf16>
    %212 = vector.extract_strided_slice %200 {offsets = [0, 10], sizes = [128, 89], strides = [1, 1]} : vector<128x100xbf16> to vector<128x89xbf16>
    %cst_150 = arith.constant dense<0.000000e+00> : vector<64x89xf32>
    %213 = tpu.matmul %211, %212, %cst_150 {dimension_numbers = #tpu.dot_dimension_numbers<[1], [0], [0], [1], [0, 0, 1, 1], [], []>} : vector<64x128xbf16>, vector<128x89xbf16>, vector<64x89xf32> -> vector<64x89xf32>
    %214 = arith.addf %209, %213 : vector<64x89xf32>
    %c3_151 = arith.constant 3 : index
    %c0_152 = arith.constant 0 : index
    %c0_153 = arith.constant 0 : index
    %215 = vector.load %arg6[%c3_151, %c0_152, %c0_153] : memref<4x64x128xbf16, #tpu.memory_space<vmem>>, vector<1x64x128xbf16>
    %216 = vector.shape_cast %215 : vector<1x64x128xbf16> to vector<64x128xbf16>
    %217 = vector.extract_strided_slice %200 {offsets = [0, 11], sizes = [128, 89], strides = [1, 1]} : vector<128x100xbf16> to vector<128x89xbf16>
    %cst_154 = arith.constant dense<0.000000e+00> : vector<64x89xf32>
    %218 = tpu.matmul %216, %217, %cst_154 {dimension_numbers = #tpu.dot_dimension_numbers<[1], [0], [0], [1], [0, 0, 1, 1], [], []>} : vector<64x128xbf16>, vector<128x89xbf16>, vector<64x89xf32> -> vector<64x89xf32>
    %219 = arith.addf %214, %218 : vector<64x89xf32>
    %c0_155 = arith.constant 0 : index
    %c0_156 = arith.constant 0 : index
    %220 = vector.load %arg7[%c0_155, %c0_156] : memref<64x1xf32, #tpu.memory_space<vmem>>, vector<64x1xf32>
    %221 = vector.broadcast %220 : vector<64x1xf32> to vector<64x89xf32>
    %222 = arith.addf %219, %221 : vector<64x89xf32>
    %c0_157 = arith.constant 0 : index
    %c0_158 = arith.constant 0 : index
    %223 = vector.load %arg8[%c0_157, %c0_158] : memref<64x89xf32, #tpu.memory_space<vmem>>, vector<64x89xf32>
    %c0_159 = arith.constant 0 : index
    %c0_160 = arith.constant 0 : index
    %224 = vector.load %arg9[%c0_159, %c0_160] : memref<64x89xf32, #tpu.memory_space<vmem>>, vector<64x89xf32>
    %c0_161 = arith.constant 0 : index
    %c0_162 = arith.constant 0 : index
    %225 = vector.load %arg10[%c0_161, %c0_162] : memref<1x89xf32, #tpu.memory_space<vmem>>, vector<1x89xf32>
    %226 = vector.broadcast %225 : vector<1x89xf32> to vector<64x89xf32>
    %227 = arith.mulf %222, %226 : vector<64x89xf32>
    %228 = vector.shape_cast %227 : vector<64x89xf32> to vector<1x64x89xf32>
    %cst_163 = arith.constant dense<0.000000e+00> : vector<1xf32>
    %229 = vector.multi_reduction <add>, %228, %cst_163 [1, 2] : vector<1x64x89xf32> to vector<1xf32>
    %230 = vector.shape_cast %229 : vector<1xf32> to vector<1x1x1xf32>
    %231 = vector.extract %230[0, 0, 0] : f32 from vector<1x1x1xf32>
    %232 = arith.mulf %227, %222 : vector<64x89xf32>
    %233 = vector.shape_cast %232 : vector<64x89xf32> to vector<1x64x89xf32>
    %cst_164 = arith.constant dense<0.000000e+00> : vector<1xf32>
    %234 = vector.multi_reduction <add>, %233, %cst_164 [1, 2] : vector<1x64x89xf32> to vector<1xf32>
    %235 = vector.shape_cast %234 : vector<1xf32> to vector<1x1x1xf32>
    %236 = vector.extract %235[0, 0, 0] : f32 from vector<1x1x1xf32>
    %cst_165 = arith.constant 5.184000e+03 : f32
    %237 = arith.divf %231, %cst_165 : f32
    %cst_166 = arith.constant 5.184000e+03 : f32
    %238 = arith.divf %236, %cst_166 : f32
    %239 = arith.mulf %237, %237 : f32
    %240 = arith.subf %238, %239 : f32
    %cst_167 = arith.constant 0.000000e+00 : f32
    %241 = arith.maximumf %240, %cst_167 : f32
    %cst_168 = arith.constant 9.99999974E-6 : f32
    %242 = arith.addf %241, %cst_168 : f32
    %243 = math.rsqrt %242 : f32
    %244 = vector.broadcast %237 : f32 to vector<64x89xf32>
    %245 = arith.subf %222, %244 : vector<64x89xf32>
    %246 = vector.broadcast %243 : f32 to vector<64x89xf32>
    %247 = arith.mulf %245, %246 : vector<64x89xf32>
    %248 = arith.mulf %247, %223 : vector<64x89xf32>
    %249 = arith.addf %248, %224 : vector<64x89xf32>
    %cst_169 = arith.constant 0.000000e+00 : f32
    %250 = vector.broadcast %cst_169 : f32 to vector<64x89xf32>
    %251 = arith.maximumf %249, %250 : vector<64x89xf32>
    %252 = arith.truncf %251 : vector<64x89xf32> to vector<64x89xbf16>
    %253 = vector.extract_strided_slice %252 {offsets = [0, 0], sizes = [64, 69], strides = [1, 1]} : vector<64x89xbf16> to vector<64x69xbf16>
    %254 = vector.extract_strided_slice %252 {offsets = [0, 10], sizes = [64, 69], strides = [1, 1]} : vector<64x89xbf16> to vector<64x69xbf16>
    %255 = vector.extract_strided_slice %252 {offsets = [0, 20], sizes = [64, 69], strides = [1, 1]} : vector<64x89xbf16> to vector<64x69xbf16>
    %256 = tpu.concatenate %253, %254, %255 in 0 : vector<64x69xbf16>, vector<64x69xbf16>, vector<64x69xbf16> -> vector<192x69xbf16>
    %c0_170 = arith.constant 0 : index
    %c0_171 = arith.constant 0 : index
    %c0_172 = arith.constant 0 : index
    %257 = vector.load %arg11[%c0_170, %c0_171, %c0_172] : memref<3x64x192xbf16, #tpu.memory_space<vmem>>, vector<1x64x192xbf16>
    %258 = vector.shape_cast %257 : vector<1x64x192xbf16> to vector<64x192xbf16>
    %259 = vector.extract_strided_slice %256 {offsets = [0, 0], sizes = [192, 67], strides = [1, 1]} : vector<192x69xbf16> to vector<192x67xbf16>
    %cst_173 = arith.constant dense<0.000000e+00> : vector<64x67xf32>
    %260 = tpu.matmul %258, %259, %cst_173 {dimension_numbers = #tpu.dot_dimension_numbers<[1], [0], [0], [1], [0, 0, 1, 1], [], []>} : vector<64x192xbf16>, vector<192x67xbf16>, vector<64x67xf32> -> vector<64x67xf32>
    %c1_174 = arith.constant 1 : index
    %c0_175 = arith.constant 0 : index
    %c0_176 = arith.constant 0 : index
    %261 = vector.load %arg11[%c1_174, %c0_175, %c0_176] : memref<3x64x192xbf16, #tpu.memory_space<vmem>>, vector<1x64x192xbf16>
    %262 = vector.shape_cast %261 : vector<1x64x192xbf16> to vector<64x192xbf16>
    %263 = vector.extract_strided_slice %256 {offsets = [0, 1], sizes = [192, 67], strides = [1, 1]} : vector<192x69xbf16> to vector<192x67xbf16>
    %cst_177 = arith.constant dense<0.000000e+00> : vector<64x67xf32>
    %264 = tpu.matmul %262, %263, %cst_177 {dimension_numbers = #tpu.dot_dimension_numbers<[1], [0], [0], [1], [0, 0, 1, 1], [], []>} : vector<64x192xbf16>, vector<192x67xbf16>, vector<64x67xf32> -> vector<64x67xf32>
    %265 = arith.addf %260, %264 : vector<64x67xf32>
    %c2_178 = arith.constant 2 : index
    %c0_179 = arith.constant 0 : index
    %c0_180 = arith.constant 0 : index
    %266 = vector.load %arg11[%c2_178, %c0_179, %c0_180] : memref<3x64x192xbf16, #tpu.memory_space<vmem>>, vector<1x64x192xbf16>
    %267 = vector.shape_cast %266 : vector<1x64x192xbf16> to vector<64x192xbf16>
    %268 = vector.extract_strided_slice %256 {offsets = [0, 2], sizes = [192, 67], strides = [1, 1]} : vector<192x69xbf16> to vector<192x67xbf16>
    %cst_181 = arith.constant dense<0.000000e+00> : vector<64x67xf32>
    %269 = tpu.matmul %267, %268, %cst_181 {dimension_numbers = #tpu.dot_dimension_numbers<[1], [0], [0], [1], [0, 0, 1, 1], [], []>} : vector<64x192xbf16>, vector<192x67xbf16>, vector<64x67xf32> -> vector<64x67xf32>
    %270 = arith.addf %265, %269 : vector<64x67xf32>
    %c0_182 = arith.constant 0 : index
    %c0_183 = arith.constant 0 : index
    %271 = vector.load %arg12[%c0_182, %c0_183] : memref<64x1xf32, #tpu.memory_space<vmem>>, vector<64x1xf32>
    %272 = vector.broadcast %271 : vector<64x1xf32> to vector<64x67xf32>
    %273 = arith.addf %270, %272 : vector<64x67xf32>
    %c0_184 = arith.constant 0 : index
    %c0_185 = arith.constant 0 : index
    %274 = vector.load %arg13[%c0_184, %c0_185] : memref<64x67xf32, #tpu.memory_space<vmem>>, vector<64x67xf32>
    %c0_186 = arith.constant 0 : index
    %c0_187 = arith.constant 0 : index
    %275 = vector.load %arg14[%c0_186, %c0_187] : memref<64x67xf32, #tpu.memory_space<vmem>>, vector<64x67xf32>
    %c0_188 = arith.constant 0 : index
    %c0_189 = arith.constant 0 : index
    %276 = vector.load %arg15[%c0_188, %c0_189] : memref<1x67xf32, #tpu.memory_space<vmem>>, vector<1x67xf32>
    %277 = vector.broadcast %276 : vector<1x67xf32> to vector<64x67xf32>
    %278 = arith.mulf %273, %277 : vector<64x67xf32>
    %279 = vector.shape_cast %278 : vector<64x67xf32> to vector<1x64x67xf32>
    %cst_190 = arith.constant dense<0.000000e+00> : vector<1xf32>
    %280 = vector.multi_reduction <add>, %279, %cst_190 [1, 2] : vector<1x64x67xf32> to vector<1xf32>
    %281 = vector.shape_cast %280 : vector<1xf32> to vector<1x1x1xf32>
    %282 = vector.extract %281[0, 0, 0] : f32 from vector<1x1x1xf32>
    %283 = arith.mulf %278, %273 : vector<64x67xf32>
    %284 = vector.shape_cast %283 : vector<64x67xf32> to vector<1x64x67xf32>
    %cst_191 = arith.constant dense<0.000000e+00> : vector<1xf32>
    %285 = vector.multi_reduction <add>, %284, %cst_191 [1, 2] : vector<1x64x67xf32> to vector<1xf32>
    %286 = vector.shape_cast %285 : vector<1xf32> to vector<1x1x1xf32>
    %287 = vector.extract %286[0, 0, 0] : f32 from vector<1x1x1xf32>
    %cst_192 = arith.constant 3.136000e+03 : f32
    %288 = arith.divf %282, %cst_192 : f32
    %cst_193 = arith.constant 3.136000e+03 : f32
    %289 = arith.divf %287, %cst_193 : f32
    %290 = arith.mulf %288, %288 : f32
    %291 = arith.subf %289, %290 : f32
    %cst_194 = arith.constant 0.000000e+00 : f32
    %292 = arith.maximumf %291, %cst_194 : f32
    %cst_195 = arith.constant 9.99999974E-6 : f32
    %293 = arith.addf %292, %cst_195 : f32
    %294 = math.rsqrt %293 : f32
    %295 = vector.broadcast %288 : f32 to vector<64x67xf32>
    %296 = arith.subf %273, %295 : vector<64x67xf32>
    %297 = vector.broadcast %294 : f32 to vector<64x67xf32>
    %298 = arith.mulf %296, %297 : vector<64x67xf32>
    %299 = arith.mulf %298, %274 : vector<64x67xf32>
    %300 = arith.addf %299, %275 : vector<64x67xf32>
    %cst_196 = arith.constant 0.000000e+00 : f32
    %301 = vector.broadcast %cst_196 : f32 to vector<64x67xf32>
    %302 = arith.maximumf %300, %301 : vector<64x67xf32>
    %cst_197 = arith.constant 0.000000e+00 : f32
    %303 = vector.broadcast %cst_197 : f32 to vector<64x61xf32>
    %304 = tpu.concatenate %302, %303 in 1 : vector<64x67xf32>, vector<64x61xf32> -> vector<64x128xf32>
    %c1_198 = arith.constant 1 : index
    %c0_199 = arith.constant 0 : index
    %c0_200 = arith.constant 0 : index
    %305 = vector.load %arg16[%c1_198, %c0_199, %c0_200] : memref<2x64x128xf32, #tpu.memory_space<vmem>>, vector<1x64x128xf32>
    %306 = vector.shape_cast %305 : vector<1x64x128xf32> to vector<64x128xf32>
    %307 = vector.shape_cast %304 : vector<64x128xf32> to vector<1x64x128xf32>
    tpu.vector_store %arg16[%c1_198, %c0_199, %c0_200], %307 {strides = array<i32>} : memref<2x64x128xf32, #tpu.memory_space<vmem>>, vector<1x64x128xf32>,
    return
  }
  func.func @transform_0(%arg0: i32) -> (i32, i32, i32, i32) {
    %c0_i32 = arith.constant 0 : i32
    %c0_i32_0 = arith.constant 0 : i32
    %c0_i32_1 = arith.constant 0 : i32
    %c0_i32_2 = arith.constant 0 : i32
    return %arg0, %c0_i32, %c0_i32_0, %c0_i32_1 : i32, i32, i32, i32
  }
  func.func @transform_1(%arg0: i32) -> (i32, i32) {
    %c0_i32 = arith.constant 0 : i32
    %c0_i32_0 = arith.constant 0 : i32
    %c0_i32_1 = arith.constant 0 : i32
    return %c0_i32, %c0_i32_0 : i32, i32
  }
  func.func @transform_2(%arg0: i32) -> (i32, i32) {
    %c0_i32 = arith.constant 0 : i32
    %c0_i32_0 = arith.constant 0 : i32
    %c0_i32_1 = arith.constant 0 : i32
    return %c0_i32, %c0_i32_0 : i32, i32
  }
  func.func @transform_3(%arg0: i32) -> (i32, i32) {
    %c0_i32 = arith.constant 0 : i32
    %c0_i32_0 = arith.constant 0 : i32
    %c0_i32_1 = arith.constant 0 : i32
    return %c0_i32, %c0_i32_0 : i32, i32
  }
  func.func @transform_4(%arg0: i32) -> (i32, i32) {
    %c0_i32 = arith.constant 0 : i32
    %c0_i32_0 = arith.constant 0 : i32
    %c0_i32_1 = arith.constant 0 : i32
    return %c0_i32, %c0_i32_0 : i32, i32
  }
  func.func @transform_5(%arg0: i32) -> (i32, i32, i32) {
    %c0_i32 = arith.constant 0 : i32
    %c0_i32_0 = arith.constant 0 : i32
    %c0_i32_1 = arith.constant 0 : i32
    %c0_i32_2 = arith.constant 0 : i32
    return %c0_i32, %c0_i32_0, %c0_i32_1 : i32, i32, i32
  }
  func.func @transform_6(%arg0: i32) -> (i32, i32) {
    %c0_i32 = arith.constant 0 : i32
    %c0_i32_0 = arith.constant 0 : i32
    %c0_i32_1 = arith.constant 0 : i32
    return %c0_i32, %c0_i32_0 : i32, i32
  }
  func.func @transform_7(%arg0: i32) -> (i32, i32) {
    %c0_i32 = arith.constant 0 : i32
    %c0_i32_0 = arith.constant 0 : i32
    %c0_i32_1 = arith.constant 0 : i32
    return %c0_i32, %c0_i32_0 : i32, i32
  }
  func.func @transform_8(%arg0: i32) -> (i32, i32) {
    %c0_i32 = arith.constant 0 : i32
    %c0_i32_0 = arith.constant 0 : i32
    %c0_i32_1 = arith.constant 0 : i32
    return %c0_i32, %c0_i32_0 : i32, i32
  }
  func.func @transform_9(%arg0: i32) -> (i32, i32) {
    %c0_i32 = arith.constant 0 : i32
    %c0_i32_0 = arith.constant 0 : i32
    %c0_i32_1 = arith.constant 0 : i32
    return %c0_i32, %c0_i32_0 : i32, i32
  }
  func.func @transform_10(%arg0: i32) -> (i32, i32, i32) {
    %c0_i32 = arith.constant 0 : i32
    %c0_i32_0 = arith.constant 0 : i32
    %c0_i32_1 = arith.constant 0 : i32
    %c0_i32_2 = arith.constant 0 : i32
    return %c0_i32, %c0_i32_0, %c0_i32_1 : i32, i32, i32
  }
  func.func @transform_11(%arg0: i32) -> (i32, i32) {
    %c0_i32 = arith.constant 0 : i32
    %c0_i32_0 = arith.constant 0 : i32
    %c0_i32_1 = arith.constant 0 : i32
    return %c0_i32, %c0_i32_0 : i32, i32
  }
  func.func @transform_12(%arg0: i32) -> (i32, i32) {
    %c0_i32 = arith.constant 0 : i32
    %c0_i32_0 = arith.constant 0 : i32
    %c0_i32_1 = arith.constant 0 : i32
    return %c0_i32, %c0_i32_0 : i32, i32
  }
  func.func @transform_13(%arg0: i32) -> (i32, i32) {
    %c0_i32 = arith.constant 0 : i32
    %c0_i32_0 = arith.constant 0 : i32
    %c0_i32_1 = arith.constant 0 : i32
    return %c0_i32, %c0_i32_0 : i32, i32
  }
  func.func @transform_14(%arg0: i32) -> (i32, i32) {
    %c0_i32 = arith.constant 0 : i32
    %c0_i32_0 = arith.constant 0 : i32
    %c0_i32_1 = arith.constant 0 : i32
    return %c0_i32, %c0_i32_0 : i32, i32
  }
  func.func @transform_15(%arg0: i32) -> (i32, i32, i32) {
    %c0_i32 = arith.constant 0 : i32
    %c0_i32_0 = arith.constant 0 : i32
    %c0_i32_1 = arith.constant 0 : i32
    return %arg0, %c0_i32, %c0_i32_0 : i32, i32, i32
  }
}

</mosaic_0001>

<bundles_post_ra>
// kernel: a_call__.1
= control target key start
LH: loop header
LB: loop body
LE: loop exit
PB: predicated region body
PF: predicated region fallthrough
CT: control target
= control target key end

     0   :  { %v6381_v1 = vmov 0   ;;  %vm930_vm0 = vcmask 818176   ;;  %s6382_s27 = smov 0.0   ;;  %s8968_s16 = smov 117   ;;  %vm1704_vm1 = vcmask 728064   ;;  %vm1937_vm2 = vcmask 523264   ;;  %s8952_s0 = inlined_call_operand.vmem [shape: bf16[2,4,256,100], index: 0, kind: input, shape index: {}]   ;;  %s8953_s1 = inlined_call_operand.vmem [shape: bf16[32,256], index: 1, kind: input, shape index: {}]   ;;  %s8954_s2 = inlined_call_operand.vmem [shape: f32[128,1], index: 2, kind: input, shape index: {}]   ;;  %s8955_s3 = inlined_call_operand.vmem [shape: f32[128,100], index: 3, kind: input, shape index: {}]   ;;  %s8956_s4 = inlined_call_operand.vmem [shape: f32[128,100], index: 4, kind: input, shape index: {}]   ;;  %s8957_s5 = inlined_call_operand.vmem [shape: bf16[4,64,128], index: 5, kind: input, shape index: {}]   ;;  %s8958_s6 = inlined_call_operand.vmem [shape: f32[64,1], index: 6, kind: input, shape index: {}]   ;;  %s8959_s9 = inlined_call_operand.vmem [shape: f32[1,89], index: 9, kind: input, shape index: {}]   ;;  %s8960_s7 = inlined_call_operand.vmem [shape: f32[64,89], index: 7, kind: input, shape index: {}]   ;;  %s8961_s8 = inlined_call_operand.vmem [shape: f32[64,89], index: 8, kind: input, shape index: {}]   ;;  %s8962_s10 = inlined_call_operand.vmem [shape: bf16[3,64,192], index: 10, kind: input, shape index: {}]   ;;  %s8963_s11 = inlined_call_operand.vmem [shape: f32[64,1], index: 11, kind: input, shape index: {}]   ;;  %s8964_s14 = inlined_call_operand.vmem [shape: f32[1,67], index: 14, kind: input, shape index: {}]   ;;  %s8965_s12 = inlined_call_operand.vmem [shape: f32[64,67], index: 12, kind: input, shape index: {}]   ;;  %s8966_s13 = inlined_call_operand.vmem [shape: f32[64,67], index: 13, kind: input, shape index: {}]   ;;  %s8967_s15 = inlined_call_operand.vmem [shape: f32[2,64,128], index: 15, kind: output, shape index: {}]  }
   0x1   :  { %v6125_v0 = vld [vmem:[%s8952_s0 + $0x40] sm:$0xff]   ;;  %6123 = vset.pattern.permute.xlu0 %v6381_v1  ;;  %6124 = vset.pattern.permute.xlu1 %v6381_v1  ;;  %v6127_v3 = vld [vmem:[%s8952_s0 + $0x48] sm:$0xff]   ;;  %v6129_v5 = vld [vmem:[%s8952_s0 + $0x50] sm:$0xff]   ;;  %s8974_s18 = smov 126   ;;  %vm2381_vm3 = vcmask 547840  }
   0x2   :  { %v6126_v2 = vld [vmem:[%s8952_s0] sm:$0xff]   ;;  %5520 = vmatprep.subr.bf16.mxu0 %v6125_v0  ;;  %v6128_v4 = vld [vmem:[%s8952_s0 + $0x8] sm:$0xff]   ;;  %v6130_v6 = vld [vmem:[%s8952_s0 + $0x10] sm:$0xff]  }
   0x3   :  { %5521 = vmatpush3.bf16.msra.mxu0 %v6126_v2  ;;  %v6131_v7 = vld [vmem:[%s8952_s0 + $0x58] sm:$0xff]   ;;  %v6133_v9 = vld [vmem:[%s8952_s0 + $0x60] sm:$0xff]   ;;  %v6135_v11 = vld [vmem:[%s8952_s0 + $0x68] sm:$0xff]  }
   0x4   :  { %5522 = vmatprep.subr.bf16.mxu0 %v6127_v3  ;;  %v6132_v8 = vld [vmem:[%s8952_s0 + $0x18] sm:$0xff]   ;;  %v6134_v10 = vld [vmem:[%s8952_s0 + $0x20] sm:$0xff]   ;;  %v6136_v13 = vld [vmem:[%s8952_s0 + $0x28] sm:$0xff]  }
   0x5   :  { %v6506_v12 = vld [vmem:[%s8953_s1 + $0x4] ss:$8 sps:$4 sm:$0xff]   ;;  %v6137_v14 = vld [vmem:[%s8952_s0 + $0x70] sm:$0xff]   ;;  %v6139_v16 = vld [vmem:[%s8952_s0 + $0x78] sm:$0xff]  }
   0x6   :  { %235 = vmatprep.mubr.bf16.mxu0 %v6506_v12  ;;  %769 = vmatprep.mubr.bf16.mxu1 %v6506_v12  ;;  %v6138_v15 = vld [vmem:[%s8952_s0 + $0x30] sm:$0xff]   ;;  %v6153_v17 = vld [vmem:[%s8952_s0 + $0x1c0] sm:$0xff]   ;;  %v6140_v19 = vld [vmem:[%s8952_s0 + $0x38] sm:$0xff]  }
   0x7   :  { %5523 = vmatpush3.bf16.msra.mxu0 %v6128_v4  ;;  %v6154_v18 = vld [vmem:[%s8952_s0 + $0x180] sm:$0xff]   ;;  %5604 = vmatprep.subr.bf16.mxu1 %v6153_v17  ;;  %v6157_v23 = vld [vmem:[%s8952_s0 + $0x1c8] sm:$0xff]   ;;  %v6551_v25 = vld [vmem:[%s8953_s1 + $0x14] ss:$8 sps:$4 sm:$0xff]  }
   0x8   :  { %5524 = vmatprep.subr.bf16.mxu0 %v6129_v5  ;;  %v6534_v20 = vld [vmem:[%s8953_s1] ss:$8 sps:$4 sm:$0xff]   ;;  %5605 = vmatpush3.bf16.msra.mxu1 %v6154_v18  ;;  %v6161_v27 = vld [vmem:[%s8952_s0 + $0x1d0] sm:$0xff]   ;;  %v6165_v32 = vld [vmem:[%s8952_s0 + $0x1d8] sm:$0xff]  }
   0x9   :  { %v6144_v21 = vld [vmem:[%s8952_s0 + $0xc0] sm:$0xff]   ;;  %v6158_v24 = vld [vmem:[%s8952_s0 + $0x188] sm:$0xff]   ;;  %5606 = vmatprep.subr.bf16.mxu1 %v6157_v23  ;;  %v6162_v28 = vld [vmem:[%s8952_s0 + $0x190] sm:$0xff]  }
   0xa   :  { %v6145_v22 = vld [vmem:[%s8952_s0 + $0x80] sm:$0xff]   ;;  %v6146_v26 = vld [vmem:[%s8952_s0 + $0xc8] sm:$0xff]   ;;  %v6570_v30 = vld [vmem:[%s8953_s1 + $0x10] ss:$8 sps:$4 sm:$0xff]  }
   0xb   :  { %5525 = vmatpush3.bf16.msra.mxu0 %v6130_v6  ;;  %v6147_v29 = vld [vmem:[%s8952_s0 + $0x88] sm:$0xff]   ;;  %v6151_v31 = vld [vmem:[%s8952_s0 + $0xd0] sm:$0xff]   ;;  %v6166_v33 = vld [vmem:[%s8952_s0 + $0x198] sm:$0xff]  }
   0xc   :  { %5526 = vmatprep.subr.bf16.mxu0 %v6131_v7  ;;  %5607 = vmatpush3.bf16.msra.mxu1 %v6158_v24  ;;  %v6152_v34 = vld [vmem:[%s8952_s0 + $0x90] sm:$0xff]   ;;  %v6155_v35 = vld [vmem:[%s8952_s0 + $0xd8] sm:$0xff]   ;;  %v6169_v36 = vld [vmem:[%s8952_s0 + $0x1e0] sm:$0xff]  }
   0xd   :  { %5608 = vmatprep.subr.bf16.mxu1 %v6161_v27  ;;  %v6170_v37 = vld [vmem:[%s8952_s0 + $0x1a0] sm:$0xff]   ;;  %v6156_v38 = vld [vmem:[%s8952_s0 + $0x98] sm:$0xff]   ;;  %v6173_v40 = vld [vmem:[%s8952_s0 + $0x1e8] sm:$0xff]  }
   0xe   :  { %v6159_v39 = vld [vmem:[%s8952_s0 + $0xe0] sm:$0xff]   ;;  %v6174_v41 = vld [vmem:[%s8952_s0 + $0x1a8] sm:$0xff]   ;;  %v6177_v44 = vld [vmem:[%s8952_s0 + $0x1f0] sm:$0xff]  }
   0xf   :  { %5527 = vmatpush3.bf16.msra.mxu0 %v6132_v8  ;;  %v6160_v42 = vld [vmem:[%s8952_s0 + $0xa0] sm:$0xff]   ;;  %v6163_v43 = vld [vmem:[%s8952_s0 + $0xe8] sm:$0xff]   ;;  %v6178_v45 = vld [vmem:[%s8952_s0 + $0x1b0] sm:$0xff]  }
  0x10   :  { %5528 = vmatprep.subr.bf16.mxu0 %v6133_v9  ;;  %5609 = vmatpush3.bf16.msra.mxu1 %v6162_v28  ;;  %v6164_v46 = vld [vmem:[%s8952_s0 + $0xa8] sm:$0xff]   ;;  %v6167_v47 = vld [vmem:[%s8952_s0 + $0xf0] sm:$0xff]   ;;  %v6181_v48 = vld [vmem:[%s8952_s0 + $0x1f8] sm:$0xff]  }
  0x11   :  { %5610 = vmatprep.subr.bf16.mxu1 %v6165_v32  ;;  %v6182_v49 = vld [vmem:[%s8952_s0 + $0x1b8] sm:$0xff]   ;;  %v6168_v50 = vld [vmem:[%s8952_s0 + $0xb0] sm:$0xff]   ;;  %v6175_v53 = vld [vmem:[%s8952_s0 + $0x140] sm:$0xff]  }
  0x12   :  { %v6171_v51 = vld [vmem:[%s8952_s0 + $0xf8] sm:$0xff]   ;;  %v6176_v54 = vld [vmem:[%s8952_s0 + $0x100] sm:$0xff]   ;;  %v6179_v55 = vld [vmem:[%s8952_s0 + $0x148] sm:$0xff]  }
  0x13   :  { %5529 = vmatpush3.bf16.msra.mxu0 %v6134_v10  ;;  %v6172_v52 = vld [vmem:[%s8952_s0 + $0xb8] sm:$0xff]   ;;  %v786_v56 = vld [vmem:[%s8954_s2] sm:$0xff]  ;;  %v6180_v57 = vld [vmem:[%s8952_s0 + $0x108] sm:$0xff]  }
  0x14   :  { %5530 = vmatprep.subr.bf16.mxu0 %v6135_v11  ;;  %5611 = vmatpush3.bf16.msra.mxu1 %v6166_v33  ;;  %v788_v58 = vld [vmem:[%s8954_s2 + $0x10] sm:$0xff]  ;;  %v787_v60 = vld [vmem:[%s8954_s2 + $0x8] sm:$0xff]  ;;  %v789_v61 = vld [vmem:[%s8954_s2 + $0x18] sm:$0xff] }
  0x15   :  { %5612 = vmatprep.subr.bf16.mxu1 %v6169_v36  ;;  %v6183_v59 = vld [vmem:[%s8952_s0 + $0x150] sm:$0xff]   ;;  %804 = vperm.xlu0 %6123, %v786_v56   ;;  %v6185_v63 = vld [vmem:[%s8952_s0 + $0x158] sm:$0xff]   ;;  %v790_v0 = vld [vmem:[%s8954_s2 + $0x20] sm:$0xff] }
  0x16   :  { %814 = vperm.xlu1 %6124, %v788_v58   ;;  %v6184_v62 = vld [vmem:[%s8952_s0 + $0x110] sm:$0xff]   ;;  %v791_v2 = vld [vmem:[%s8954_s2 + $0x28] sm:$0xff]  ;;  %v6186_v3 = vld [vmem:[%s8952_s0 + $0x118] sm:$0xff]  }
  0x17   :  { %5531 = vmatpush3.bf16.msra.mxu0 %v6136_v13  ;;  %v6187_v4 = vld [vmem:[%s8952_s0 + $0x160] sm:$0xff]   ;;  %v792_v5 = vld [vmem:[%s8954_s2 + $0x30] sm:$0xff]  ;;  %v793_v6 = vld [vmem:[%s8954_s2 + $0x38] sm:$0xff] }
  0x18   :  { %5532 = vmatprep.subr.bf16.mxu0 %v6137_v14  ;;  %5613 = vmatpush3.bf16.msra.mxu1 %v6170_v37  ;;  %v6188_v7 = vld [vmem:[%s8952_s0 + $0x120] sm:$0xff]   ;;  %v6189_v8 = vld [vmem:[%s8952_s0 + $0x168] sm:$0xff]   ;;  %v796_v13 = vld [vmem:[%s8954_s2 + $0x50] sm:$0xff] }
  0x19   :  { %5614 = vmatprep.subr.bf16.mxu1 %v6173_v40  ;;  %809 = vperm.xlu0 %6123, %v787_v60   ;;  %v794_v9 = vld [vmem:[%s8954_s2 + $0x40] sm:$0xff]  ;;  %v795_v10 = vld [vmem:[%s8954_s2 + $0x48] sm:$0xff]  ;;  %v797_v14 = vld [vmem:[%s8954_s2 + $0x58] sm:$0xff] }
  0x1a   :  { %819 = vperm.xlu1 %6124, %v789_v61   ;;  %v6190_v11 = vld [vmem:[%s8952_s0 + $0x128] sm:$0xff]   ;;  %v798_v17 = vld [vmem:[%s8954_s2 + $0x60] sm:$0xff] }
  0x1b   :  { %5533 = vmatpush3.bf16.msra.mxu0 %v6138_v15  ;;  %v6192_v15 = vld [vmem:[%s8952_s0 + $0x130] sm:$0xff]   ;;  %v799_v18 = vld [vmem:[%s8954_s2 + $0x68] sm:$0xff] }
  0x1c   :  { %5534 = vmatprep.subr.bf16.mxu0 %v6139_v16  ;;  %5615 = vmatpush3.bf16.msra.mxu1 %v6174_v41  ;;  %v6193_v16 = vld [vmem:[%s8952_s0 + $0x178] sm:$0xff]  }
  0x1d   :  { %5616 = vmatprep.subr.bf16.mxu1 %v6177_v44  ;;  %824 = vperm.xlu0 %6123, %v790_v0  }
  0x1e   :  { %829 = vperm.xlu1 %6124, %v791_v2  }
  0x1f   :  { %5535 = vmatpush3.bf16.msra.mxu0 %v6140_v19  ;;  %v6194_v19 = vld [vmem:[%s8952_s0 + $0x138] sm:$0xff]  }
  0x20   :  { %5548 = vmatprep.subr.bf16.mxu0 %v6144_v21  ;;  %5617 = vmatpush3.bf16.msra.mxu1 %v6178_v45  ;;  %v800_v21 = vld [vmem:[%s8954_s2 + $0x70] sm:$0xff] }
  0x21   :  { %5618 = vmatprep.subr.bf16.mxu1 %v6181_v48  ;;  %834 = vperm.xlu0 %6123, %v792_v5  }
  0x22   :  { %236 = vmatmul.mubr.bf16.vlgmr.msra.gmra.mrb[0].mxu0 %v6534_v20  ;;  %839 = vperm.xlu1 %6124, %v793_v6  }
  0x23   :  { %5549 = vmatpush3.bf16.msra.mxu0 %v6145_v22  ;;  %243 = vmatprep.mubr.bf16.mxu0 %v6551_v25  ;;  %v801_v22 = vld [vmem:[%s8954_s2 + $0x78] sm:$0xff] }
  0x24   :  { %5550 = vmatprep.subr.bf16.mxu0 %v6146_v26  ;;  %5619 = vmatpush3.bf16.msra.mxu1 %v6182_v49 }
  0x25   :  { %1950 = vmatprep.subr.bf16.mxu1 %v6381_v1  ;;  %844 = vperm.xlu0 %6123, %v794_v9  }
  0x26   :  { %849 = vperm.xlu1 %6124, %v795_v10  }
  0x27   :  { %5551 = vmatpush3.bf16.msra.mxu0 %v6147_v29  ;;  %770 = vmatmul.mubr.bf16.vlgmr.msra.gmra.mrb[0].mxu1 %v6534_v20 }
  0x28   :  { %5552 = vmatprep.subr.bf16.mxu0 %v6151_v31  ;;  %777 = vmatprep.mubr.bf16.mxu1 %v6551_v25 }
  0x29   :  { %854 = vperm.xlu0 %6123, %v796_v13  }
  0x2a   :  { %244 = vmatmul.mubr.bf16.gmra.mrb[4].mxu0 %v6570_v30  ;;  %859 = vperm.xlu1 %6124, %v797_v14  }
  0x2b   :  { %5553 = vmatpush3.bf16.msra.mxu0 %v6152_v34  ;;  %413 = vmatprep.mubr.bf16.mxu0 %v6506_v12 }
  0x2c   :  { %5554 = vmatprep.subr.bf16.mxu0 %v6155_v35 }
  0x2d   :  { %864 = vperm.xlu0 %6123, %v798_v17  }
  0x2e   :  { %869 = vperm.xlu1 %6124, %v799_v18  }
  0x2f   :  { %5555 = vmatpush3.bf16.msra.mxu0 %v6156_v38  ;;  %778 = vmatmul.mubr.bf16.gmra.mrb[4].mxu1 %v6570_v30 }
  0x30   :  { %5556 = vmatprep.subr.bf16.mxu0 %v6159_v39 }
  0x31   :  { %874 = vperm.xlu0 %6123, %v800_v21  }
  0x32   :  { %879 = vperm.xlu1 %6124, %v801_v22  }
  0x33   :  { %5557 = vmatpush3.bf16.msra.mxu0 %v6160_v42 }
  0x34   :  { %5558 = vmatprep.subr.bf16.mxu0 %v6163_v43 }
  0x37   :  { %5559 = vmatpush3.bf16.msra.mxu0 %v6164_v46 }
  0x38   :  { %5560 = vmatprep.subr.bf16.mxu0 %v6167_v47 }
  0x3b   :  { %5561 = vmatpush3.bf16.msra.mxu0 %v6168_v50 }
  0x3c   :  { %5562 = vmatprep.subr.bf16.mxu0 %v6171_v51 }
  0x3f   :  { %5563 = vmatpush3.bf16.msra.mxu0 %v6172_v52 }
  0x40   :  { %5576 = vmatprep.subr.bf16.mxu0 %v6175_v53 }
  0x42   :  { %414 = vmatmul.mubr.bf16.vlgmr.msra.gmra.mrb[8].mxu0 %v6534_v20 }
  0x43   :  { %5577 = vmatpush3.bf16.msra.mxu0 %v6176_v54  ;;  %421 = vmatprep.mubr.bf16.mxu0 %v6551_v25 }
  0x44   :  { %5578 = vmatprep.subr.bf16.mxu0 %v6179_v55 }
  0x47   :  { %5579 = vmatpush3.bf16.msra.mxu0 %v6180_v57 }
  0x48   :  { %5580 = vmatprep.subr.bf16.mxu0 %v6183_v59 }
  0x4a   :  { %422 = vmatmul.mubr.bf16.gmra.mrb[12].mxu0 %v6570_v30 }
  0x4b   :  { %5581 = vmatpush3.bf16.msra.mxu0 %v6184_v62  ;;  %591 = vmatprep.mubr.bf16.mxu0 %v6506_v12  ;;  %v6191_v12 = vld [vmem:[%s8952_s0 + $0x170] sm:$0xff]  }
  0x4c   :  { %5582 = vmatprep.subr.bf16.mxu0 %v6185_v63 }
  0x4f   :  { %5583 = vmatpush3.bf16.msra.mxu0 %v6186_v3 }
  0x50   :  { %5584 = vmatprep.subr.bf16.mxu0 %v6187_v4 }
  0x53   :  { %5585 = vmatpush3.bf16.msra.mxu0 %v6188_v7 }
  0x54   :  { %5586 = vmatprep.subr.bf16.mxu0 %v6189_v8 }
  0x57   :  { %5587 = vmatpush3.bf16.msra.mxu0 %v6190_v11 }
  0x58   :  { %5588 = vmatprep.subr.bf16.mxu0 %v6191_v12 }
  0x5b   :  { %5589 = vmatpush3.bf16.msra.mxu0 %v6192_v15 }
  0x5c   :  { %5590 = vmatprep.subr.bf16.mxu0 %v6193_v16 }
  0x5f   :  { %5591 = vmatpush3.bf16.msra.mxu0 %v6194_v19 }
  0x62   :  { %592 = vmatmul.mubr.bf16.vlgmr.msra.gmra.mrb[16].mxu0 %v6534_v20 }
  0x63   :  { %599 = vmatprep.mubr.bf16.mxu0 %v6551_v25 }
  0x6a   :  { %600 = vmatmul.mubr.bf16.gmra.mrb[20].mxu0 %v6570_v30 }
  0x94   :  { %v805_v41 = vpop.permute.xlu0 %804 }
  0x95   :  { %v815_v52 = vpop.permute.xlu1 %814 }
  0x98   :  { %v810_v55 = vpop.permute.xlu0 %809 }
  0x99   :  { %v820_v62 = vpop.permute.xlu1 %819 }
  0x9c   :  { %v825_v2 = vpop.permute.xlu0 %824 }
  0x9d   :  { %v830_v4 = vpop.permute.xlu1 %829 }
  0xa0   :  { %v835_v14 = vpop.permute.xlu0 %834 }
  0xa1   :  { %v840_v21 = vpop.permute.xlu1 %839 }
  0xf5   :  { %v5536_v23 = vpop.f32.mrb[0].mxu0 }
  0xf6   :  { %v5537_v24 = vpop.f32.mrb[1].mxu0 }
  0xf7   :  { %v5538_v26 = vadd.f32 %v5537_v24, %v5536_v23  ;;  %v5539_v27 = vpop.f32.mrb[2].mxu0 }
  0xf8   :  { %v5540_v28 = vpop.f32.mrb[3].mxu0 }
  0xf9   :  { %v5541_v29 = vadd.f32 %v5540_v28, %v5539_v27  ;;  %v6757_v63 = vadd.f32 %v5538_v26, %v805_v41 }
  0xfa   :  { %v5620_v37 = vpop.f32.mrb[0].mxu1 }
  0xfb   :  { %v5621_v38 = vpop.f32.mrb[1].mxu1  ;;  %v6755_v60 = vadd.f32 %v5541_v29, %v810_v55  ;;  %v971_v5 = vmul.f32 %v6757_v63, %v6757_v63  ;;  %v931_v9 = vsel %vm930_vm0, %v6757_v63, 0.0 }
  0xfc   :  { %v6747_v39 = vadd.f32 %v5621_v38, %v5620_v37  ;;  %v5623_v20 = vpop.f32.mrb[2].mxu1  ;;  %v850_v37 = vpop.permute.xlu1 %849 }
  0xfd   :  { %v5542_v31 = vpop.f32.mrb[4].mxu0  ;;  %v5624_v25 = vpop.f32.mrb[3].mxu1  ;;  %v972_v3 = vmul.f32 %v6755_v60, %v6755_v60  ;;  %v932_v6 = vsel %vm930_vm0, %v6755_v60, 0.0  ;;  %v987_v15 = vsel %vm930_vm0, %v971_v5, 0.0 }
  0xfe   :  { %v5543_v32 = vpop.f32.mrb[5].mxu0  ;;  %v6749_v40 = vadd.f32 %v5624_v25, %v5623_v20  ;;  %v933_v13 = vadd.f32 %v932_v6, %v931_v9 }
  0xff   :  { %v5544_v33 = vadd.f32 %v5543_v32, %v5542_v31  ;;  %v5545_v34 = vpop.f32.mrb[6].mxu0  ;;  %v988_v10 = vsel %vm930_vm0, %v972_v3, 0.0  ;;  %v845_v32 = vpop.permute.xlu0 %844 }
 0x100   :  { %v5546_v35 = vpop.f32.mrb[7].mxu0  ;;  %v989_v18 = vadd.f32 %v988_v10, %v987_v15  ;;  %v860_v55 = vpop.permute.xlu1 %859 }
 0x101   :  { %v5547_v36 = vadd.f32 %v5546_v35, %v5545_v34  ;;  %v6759_v0 = vadd.f32 %v5544_v33, %v815_v52 }
 0x102   :  { %v5626_v45 = vpop.f32.mrb[4].mxu1 }
 0x103   :  { %v5627_v47 = vpop.f32.mrb[5].mxu1  ;;  %v973_v7 = vmul.f32 %v6759_v0, %v6759_v0  ;;  %v6769_v8 = vadd.f32 %v5547_v36, %v820_v62  ;;  %v934_v11 = vsel %vm930_vm0, %v6759_v0, 0.0 }
 0x104   :  { %v6751_v49 = vadd.f32 %v5627_v47, %v5626_v45  ;;  %v5629_v50 = vpop.f32.mrb[6].mxu1  ;;  %v935_v19 = vadd.f32 %v934_v11, %v933_v13  ;;  %v855_v45 = vpop.permute.xlu0 %854 }
 0x105   :  { %v5630_v51 = vpop.f32.mrb[7].mxu1  ;;  %v990_v16 = vsel %vm930_vm0, %v973_v7, 0.0  ;;  %v974_v17 = vmul.f32 %v6769_v8, %v6769_v8  ;;  %v936_v22 = vsel %vm930_vm0, %v6769_v8, 0.0  ;;  %v870_v13 = vpop.permute.xlu1 %869 }
 0x106   :  { %v6753_v53 = vadd.f32 %v5630_v51, %v5629_v50  ;;  %v991_v26 = vadd.f32 %v990_v16, %v989_v18  ;;  %v937_v31 = vadd.f32 %v936_v22, %v935_v19 }
 0x107   :  { %v992_v27 = vsel %vm930_vm0, %v974_v17, 0.0 }
 0x108   :  { %v993_v35 = vadd.f32 %v992_v27, %v991_v26  ;;  %v865_v6 = vpop.permute.xlu0 %864 }
 0x109   :  { %v6825_v19 = vadd.f32 %v6747_v39, %v865_v6 }
 0x115   :  { %v5564_v30 = vpop.f32.mrb[8].mxu0 }
 0x116   :  { %v5565_v42 = vpop.f32.mrb[9].mxu0 }
 0x117   :  { %v5566_v43 = vadd.f32 %v5565_v42, %v5564_v30  ;;  %v5567_v44 = vpop.f32.mrb[10].mxu0 }
 0x118   :  { %v5568_v46 = vpop.f32.mrb[11].mxu0 }
 0x119   :  { %v5569_v48 = vadd.f32 %v5568_v46, %v5567_v44  ;;  %v6776_v12 = vadd.f32 %v5566_v43, %v825_v2 }
 0x11b   :  { %v975_v23 = vmul.f32 %v6776_v12, %v6776_v12  ;;  %v6786_v24 = vadd.f32 %v5569_v48, %v830_v4  ;;  %v938_v28 = vsel %vm930_vm0, %v6776_v12, 0.0 }
 0x11c   :  { %v939_v36 = vadd.f32 %v938_v28, %v937_v31  ;;  %v875_v28 = vpop.permute.xlu0 %874 }
 0x11d   :  { %v5570_v54 = vpop.f32.mrb[12].mxu0  ;;  %v994_v33 = vsel %vm930_vm0, %v975_v23, 0.0  ;;  %v976_v34 = vmul.f32 %v6786_v24, %v6786_v24  ;;  %v940_v38 = vsel %vm930_vm0, %v6786_v24, 0.0 }
 0x11e   :  { %v5571_v56 = vpop.f32.mrb[13].mxu0  ;;  %v995_v30 = vadd.f32 %v994_v33, %v993_v35  ;;  %v941_v44 = vadd.f32 %v940_v38, %v939_v36  ;;  %v983_v35 = vmul.f32 %v6825_v19, %v6825_v19  ;;  %v880_v36 = vpop.permute.xlu1 %879 }
 0x11f   :  { %v5572_v57 = vadd.f32 %v5571_v56, %v5570_v54  ;;  %v5573_v58 = vpop.f32.mrb[14].mxu0  ;;  %v996_v41 = vsel %vm930_vm0, %v976_v34, 0.0 }
 0x120   :  { %v5574_v59 = vpop.f32.mrb[15].mxu0  ;;  %v997_v52 = vadd.f32 %v996_v41, %v995_v30 }
 0x121   :  { %v5575_v61 = vadd.f32 %v5574_v59, %v5573_v58  ;;  %v6791_v29 = vadd.f32 %v5572_v57, %v835_v14 }
 0x123   :  { %v977_v20 = vmul.f32 %v6791_v29, %v6791_v29  ;;  %v6800_v25 = vadd.f32 %v5575_v61, %v840_v21  ;;  %v942_v42 = vsel %vm930_vm0, %v6791_v29, 0.0 }
 0x124   :  { %v943_v54 = vadd.f32 %v942_v42, %v941_v44  ;;  %v954_v44 = vsel %vm930_vm0, %v6825_v19, 0.0 }
 0x125   :  { %v998_v47 = vsel %vm930_vm0, %v977_v20, 0.0  ;;  %v978_v48 = vmul.f32 %v6800_v25, %v6800_v25  ;;  %v944_v57 = vsel %vm930_vm0, %v6800_v25, 0.0  ;;  %v6842_v20 = vadd.f32 %v6751_v49, %v875_v28 }
 0x126   :  { %v999_v61 = vadd.f32 %v998_v47, %v997_v52  ;;  %v945_v5 = vadd.f32 %v944_v57, %v943_v54 }
 0x127   :  { %v1000_v62 = vsel %vm930_vm0, %v978_v48, 0.0  ;;  %v985_v52 = vmul.f32 %v6842_v20, %v6842_v20 }
 0x128   :  { %v1001_v11 = vadd.f32 %v1000_v62, %v999_v61 }
 0x135   :  { %v5592_v43 = vpop.f32.mrb[16].mxu0 }
 0x136   :  { %v5593_v46 = vpop.f32.mrb[17].mxu0 }
 0x137   :  { %v5594_v50 = vadd.f32 %v5593_v46, %v5592_v43  ;;  %v5595_v51 = vpop.f32.mrb[18].mxu0  ;;  %v6854_v46 = vadd.f32 %v6753_v53, %v880_v36 }
 0x138   :  { %v5596_v56 = vpop.f32.mrb[19].mxu0 }
 0x139   :  { %v6810_v58 = vadd.f32 %v5594_v50, %v845_v32  ;;  %v5597_v59 = vadd.f32 %v5596_v56, %v5595_v51  ;;  %v6831_v32 = vadd.f32 %v6749_v40, %v870_v13  ;;  %v1010_v50 = vsel %vm930_vm0, %v983_v35, 0.0 }
 0x13a   :  { %v958_v56 = vsel %vm930_vm0, %v6842_v20, 0.0  ;;  %v986_v53 = vmul.f32 %v6854_v46, %v6854_v46  ;;  %v960_v62 = vsel %vm930_vm0, %v6854_v46, 0.0 }
 0x13b   :  { %v946_v2 = vsel %vm930_vm0, %v6810_v58, 0.0  ;;  %v979_v3 = vmul.f32 %v6810_v58, %v6810_v58  ;;  %v6817_v4 = vadd.f32 %v5597_v59, %v850_v37  ;;  %v956_v51 = vsel %vm930_vm0, %v6831_v32, 0.0 }
 0x13c   :  { %v947_v14 = vadd.f32 %v946_v2, %v945_v5  ;;  %v1014_v2 = vsel %vm930_vm0, %v985_v52, 0.0  ;;  %v1016_v6 = vsel %vm930_vm0, %v986_v53, 0.0  ;;  %v902_v53 = vld [vmem:[%s8955_s3 + $0x20] sm:$0xff] }
 0x13d   :  { %v1002_v7 = vsel %vm930_vm0, %v979_v3, 0.0  ;;  %v980_v9 = vmul.f32 %v6817_v4, %v6817_v4  ;;  %v5598_v10 = vpop.f32.mrb[20].mxu0  ;;  %v948_v16 = vsel %vm930_vm0, %v6817_v4, 0.0 }
 0x13e   :  { %v5599_v15 = vpop.f32.mrb[21].mxu0  ;;  %v1003_v21 = vadd.f32 %v1002_v7, %v1001_v11  ;;  %v949_v31 = vadd.f32 %v948_v16, %v947_v14 }
 0x13f   :  { %v5600_v17 = vadd.f32 %v5599_v15, %v5598_v10  ;;  %v5601_v18 = vpop.f32.mrb[22].mxu0  ;;  %v1004_v23 = vsel %vm930_vm0, %v980_v9, 0.0 }
 0x140   :  { %v5602_v22 = vpop.f32.mrb[23].mxu0  ;;  %v1005_v37 = vadd.f32 %v1004_v23, %v1003_v21 }
 0x141   :  { %v6828_v26 = vadd.f32 %v5600_v17, %v855_v45  ;;  %v5603_v27 = vadd.f32 %v5602_v22, %v5601_v18  ;;  %v984_v45 = vmul.f32 %v6831_v32, %v6831_v32 }
 0x143   :  { %v950_v33 = vsel %vm930_vm0, %v6828_v26, 0.0  ;;  %v981_v34 = vmul.f32 %v6828_v26, %v6828_v26  ;;  %v6837_v39 = vadd.f32 %v5603_v27, %v860_v55  ;;  %v1012_v57 = vsel %vm930_vm0, %v984_v45, 0.0  ;;  %v899_v45 = vld [vmem:[%s8955_s3 + $0x8] sm:$0xff] }
 0x144   :  { %v951_v38 = vadd.f32 %v950_v33, %v949_v31 }
 0x145   :  { %v1006_v40 = vsel %vm930_vm0, %v981_v34, 0.0  ;;  %v952_v30 = vsel %vm930_vm0, %v6837_v39, 0.0  ;;  %v982_v41 = vmul.f32 %v6837_v39, %v6837_v39 }
 0x146   :  { %v1007_v42 = vadd.f32 %v1006_v40, %v1005_v37  ;;  %v953_v43 = vadd.f32 %v952_v30, %v951_v38 }
 0x147   :  { %v1008_v49 = vsel %vm930_vm0, %v982_v41, 0.0 }
 0x148   :  { %v955_v47 = vadd.f32 %v954_v44, %v953_v43  ;;  %v1009_v48 = vadd.f32 %v1008_v49, %v1007_v42  ;;  %v916_v43 = vld [vmem:[%s8956_s4 + $0x10] sm:$0xff]  ;;  %v917_v44 = vld [vmem:[%s8956_s4 + $0x18] sm:$0xff] }
 0x149   :  { %v904_v49 = vld [vmem:[%s8955_s3 + $0x30] sm:$0xff] }
 0x14a   :  { %v957_v54 = vadd.f32 %v956_v51, %v955_v47  ;;  %v1011_v55 = vadd.f32 %v1010_v50, %v1009_v48 }
 0x14c   :  { %v959_v59 = vadd.f32 %v958_v56, %v957_v54  ;;  %v1013_v61 = vadd.f32 %v1012_v57, %v1011_v55  ;;  %v905_v56 = vld [vmem:[%s8955_s3 + $0x38] sm:$0xff]  ;;  %v903_v57 = vld [vmem:[%s8955_s3 + $0x28] sm:$0xff] }
 0x14e   :  { %v961_v3 = vadd.f32 %v960_v62, %v959_v59  ;;  %v1015_v5 = vadd.f32 %v1014_v2, %v1013_v61  ;;  %v914_v59 = vld [vmem:[%s8956_s4] sm:$0xff]  ;;  %v915_v61 = vld [vmem:[%s8956_s4 + $0x8] sm:$0xff]  ;;  %v920_v62 = vld [vmem:[%s8956_s4 + $0x30] sm:$0xff] }
 0x150   :  { %962 = vadd.xlane.f32.xlu0 %v961_v3  ;;  %v1017_v7 = vadd.f32 %v1016_v6, %v1015_v5 }
 0x152   :  { %1018 = vadd.xlane.f32.xlu1 %v1017_v7 }
 0x1dd   :  { %v963_v9 = vpop.xlane.xlu0 %962 }
 0x1de   :  { %v964_v10 = vrot.slane %v963_v9, 4 }
 0x1df   :  { %v1019_v11 = vpop.xlane.xlu1 %1018 }
 0x1e0   :  { %v965_v13 = vadd.f32 %v964_v10, %v963_v9  ;;  %v1020_v14 = vrot.slane %v1019_v11, 4 }
 0x1e2   :  { %v1021_v15 = vadd.f32 %v1020_v14, %v1019_v11  ;;  %v966_v16 = vrot.slane %v965_v13, 2  ;;  %v918_v14 = vld [vmem:[%s8956_s4 + $0x20] sm:$0xff] }
 0x1e4   :  { %v967_v17 = vadd.f32 %v966_v16, %v965_v13  ;;  %v1022_v18 = vrot.slane %v1021_v15, 2  ;;  %v921_v13 = vld [vmem:[%s8956_s4 + $0x38] sm:$0xff] }
 0x1e6   :  { %v968_v21 = vrot.slane %v967_v17, 1  ;;  %v1023_v22 = vadd.f32 %v1022_v18, %v1021_v15  ;;  %v919_v15 = vld [vmem:[%s8956_s4 + $0x28] sm:$0xff] }
 0x1e8   :  { %v969_v23 = vadd.f32 %v968_v21, %v967_v17  ;;  %v1024_v27 = vrot.slane %v1023_v22, 1 }
 0x1ea   :  { %6080 = vpush %v969_v23  ;;  %v1025_v28 = vadd.f32 %v1024_v27, %v1023_v22 }
 0x1ec   :  { %6082 = vpush %v1025_v28 }
 0x21b   :  { %s6081_s21 = spop %6080 }
 0x21c   :  { %s1029_s22 = smul.f32 7.8125e-05, %s6081_s21 }
 0x21d   :  { %s6083_s23 = spop %6082 }
 0x21e   :  { %s1033_s24 = smul.f32 %s1029_s22, %s1029_s22  ;;  %v6872_v34 = vstv %s1029_s22 }
 0x21f   :  { %s1032_s25 = smul.f32 7.8125e-05, %s6083_s23  ;;  %v1043_v35 = vsub.f32 %v6759_v0, %v6872_v34  ;;  %v1044_v36 = vsub.f32 %v6769_v8, %v6872_v34  ;;  %v1041_v37 = vsub.f32 %v6757_v63, %v6872_v34  ;;  %v1042_v38 = vsub.f32 %v6755_v60, %v6872_v34  ;;  %v900_v60 = vld [vmem:[%s8955_s3 + $0x10] sm:$0xff]  ;;  %v901_v63 = vld [vmem:[%s8955_s3 + $0x18] sm:$0xff] }
 0x220   :  { %v1047_v40 = vsub.f32 %v6791_v29, %v6872_v34  ;;  %v1048_v30 = vsub.f32 %v6800_v25, %v6872_v34  ;;  %v1045_v41 = vsub.f32 %v6776_v12, %v6872_v34  ;;  %v1046_v0 = vsub.f32 %v6786_v24, %v6872_v34 }
 0x221   :  { %s1034_s26 = ssub.f32 %s1032_s25, %s1033_s24  ;;  %v1051_v8 = vsub.f32 %v6828_v26, %v6872_v34  ;;  %v1052_v29 = vsub.f32 %v6837_v39, %v6872_v34  ;;  %v1049_v12 = vsub.f32 %v6810_v58, %v6872_v34  ;;  %v1050_v24 = vsub.f32 %v6817_v4, %v6872_v34  ;;  %v898_v39 = vld [vmem:[%s8955_s3] sm:$0xff]  ;;  %s8970_s24 = smov 127   ;;  %v923_v4 = vld [vmem:[%s8956_s4 + $0x48] sm:$0xff] }
 0x222   :  { %v1055_v25 = vsub.f32 %v6842_v20, %v6872_v34  ;;  %v1056_v47 = vsub.f32 %v6854_v46, %v6872_v34  ;;  %v1053_v48 = vsub.f32 %v6825_v19, %v6872_v34  ;;  %v1054_v50 = vsub.f32 %v6831_v32, %v6872_v34  ;;  %v922_v26 = vld [vmem:[%s8956_s4 + $0x40] sm:$0xff]  ;;  %v911_v20 = vld [vmem:[%s8955_s3 + $0x68] sm:$0xff] }
 0x223   :  { %s1035_s28 = smax.f32 %s6382_s27, %s1034_s26  ;;  %v926_v46 = vld [vmem:[%s8956_s4 + $0x60] sm:$0xff]  ;;  %s8972_s26 = smov 118  }
 0x224   :  { %s1036_s29 = sadd.f32 1e-05, %s1035_s28 }
 0x226   :  { %v1037_v31 = vstv %s1036_s29 }
 0x227   :  { %6369 = vrsqrt.f32 %v1037_v31 }
 0x231   :  { %v6370_v33 = vpop.eup %6369 }
 0x232   :  { %6084 = vpush %v6370_v33 }
 0x263   :  { %s6085_s30 = spop %6084 }
 0x264   :  { %v6906_v42 = vstv %s6085_s30  ;;  %s6386_s30 = smov 108  }
 0x265   :  { %v1060_v51 = vmul.f32 %v6906_v42, %v1043_v35  ;;  %v1061_v52 = vmul.f32 %v6906_v42, %v1044_v36  ;;  %v1058_v54 = vmul.f32 %v6906_v42, %v1041_v37  ;;  %v1059_v55 = vmul.f32 %v6906_v42, %v1042_v38 }
 0x266   :  { %v1064_v2 = vmul.f32 %v6906_v42, %v1047_v40  ;;  %v1065_v3 = vmul.f32 %v6906_v42, %v1048_v30  ;;  %v1062_v5 = vmul.f32 %v6906_v42, %v1045_v41  ;;  %v1063_v6 = vmul.f32 %v6906_v42, %v1046_v0  ;;  %v908_v41 = vld [vmem:[%s8955_s3 + $0x50] sm:$0xff]  ;;  %v909_v0 = vld [vmem:[%s8955_s3 + $0x58] sm:$0xff] }
 0x267   :  { %v1076_v7 = vmul.f32 %v1060_v51, %v900_v60  ;;  %v1077_v9 = vmul.f32 %v1061_v52, %v901_v63  ;;  %v1074_v10 = vmul.f32 %v1058_v54, %v898_v39  ;;  %v1075_v11 = vmul.f32 %v1059_v55, %v899_v45  ;;  %v924_v39 = vld [vmem:[%s8956_s4 + $0x50] sm:$0xff]  ;;  %v925_v51 = vld [vmem:[%s8956_s4 + $0x58] sm:$0xff]  ;;  %v906_v55 = vld [vmem:[%s8955_s3 + $0x40] sm:$0xff] }
 0x268   :  { %v1080_v16 = vmul.f32 %v1064_v2, %v904_v49  ;;  %v1081_v17 = vmul.f32 %v1065_v3, %v905_v56  ;;  %v1078_v18 = vmul.f32 %v1062_v5, %v902_v53  ;;  %v1079_v21 = vmul.f32 %v1063_v6, %v903_v57  ;;  %v907_v56 = vld [vmem:[%s8955_s3 + $0x48] sm:$0xff]  ;;  %v928_v5 = vld [vmem:[%s8956_s4 + $0x70] sm:$0xff] }
 0x269   :  { %v1092_v22 = vadd.f32 %v1076_v7, %v916_v43  ;;  %v1093_v23 = vadd.f32 %v1077_v9, %v917_v44  ;;  %v1090_v27 = vadd.f32 %v1074_v10, %v914_v59  ;;  %v1091_v28 = vadd.f32 %v1075_v11, %v915_v61  ;;  %v912_v59 = vld [vmem:[%s8955_s3 + $0x70] sm:$0xff]  ;;  %v913_v61 = vld [vmem:[%s8955_s3 + $0x78] sm:$0xff] }
 0x26a   :  { %v1096_v31 = vadd.f32 %v1080_v16, %v920_v62  ;;  %v1097_v33 = vadd.f32 %v1081_v17, %v921_v13  ;;  %v1094_v35 = vadd.f32 %v1078_v18, %v918_v14  ;;  %v1095_v36 = vadd.f32 %v1079_v21, %v919_v15  ;;  %v910_v62 = vld [vmem:[%s8955_s3 + $0x60] sm:$0xff]  ;;  %v929_v10 = vld [vmem:[%s8956_s4 + $0x78] sm:$0xff] }
 0x26b   :  { %v1108_v37 = vmax.f32 %v1092_v22, 0.0  ;;  %v1109_v38 = vmax.f32 %v1093_v23, 0.0  ;;  %v1106_v40 = vmax.f32 %v1090_v27, 0.0  ;;  %v1107_v30 = vmax.f32 %v1091_v28, 0.0 }
 0x26c   :  { %v1112_v60 = vmax.f32 %v1096_v31, 0.0  ;;  %v1113_v63 = vmax.f32 %v1097_v33, 0.0  ;;  %v1110_v43 = vmax.f32 %v1094_v35, 0.0  ;;  %v1111_v44 = vmax.f32 %v1095_v36, 0.0 }
 0x26d   :  { %v6973_v45 = vpack.c.bf16 %v1109_v38, %v1108_v37  ;;  %v6975_v49 = vpack.c.bf16 %v1107_v30, %v1106_v40  ;;  %v1068_v52 = vmul.f32 %v6906_v42, %v1051_v8  ;;  %v1069_v54 = vmul.f32 %v6906_v42, %v1052_v29  ;;  %v6195_v38 = vld [vmem:[%s8957_s5 + $0x20] sm:$0xff]   ;;  %v1618_v40 = vld [vmem:[%s8958_s6 + $0x8] sm:$0xff] }
 0x26e   :  { %v6991_v53 = vpack.c.bf16 %v1113_v63, %v1112_v60  ;;  %v6993_v57 = vpack.c.bf16 %v1111_v44, %v1110_v43  ;;  %v1066_v8 = vmul.f32 %v6906_v42, %v1049_v12  ;;  %v1067_v29 = vmul.f32 %v6906_v42, %v1050_v24  ;;  %5856 = vmatprep.mubr.bf16.mxu0 %v6195_v38  ;;  %v1617_v30 = vld [vmem:[%s8958_s6] sm:$0xff]  ;;  %v1622_v60 = vld [vmem:[%s8958_s6 + $0x28] sm:$0xff]  ;;  %v1624_v43 = vld [vmem:[%s8958_s6 + $0x38] sm:$0xff] }
 0x26f   :  { %1181 = vrot.lane.b32.xlu1 %v6973_v45, %s8970_s24  ;;  %1179 = vrot.lane.b32.xlu0 %v6975_v49, %s8970_s24  ;;  %v1084_v58 = vmul.f32 %v1068_v52, %v908_v41  ;;  %v1085_v12 = vmul.f32 %v1069_v54, %v909_v0  ;;  %v1072_v24 = vmul.f32 %v6906_v42, %v1055_v25  ;;  %v1620_v41 = vld [vmem:[%s8958_s6 + $0x18] sm:$0xff]  ;;  %v1619_v0 = vld [vmem:[%s8958_s6 + $0x10] sm:$0xff] }
 0x270   :  { %v1082_v2 = vmul.f32 %v1066_v8, %v906_v55  ;;  %v1083_v3 = vmul.f32 %v1067_v29, %v907_v56  ;;  %v1073_v6 = vmul.f32 %v6906_v42, %v1056_v47  ;;  %v1070_v25 = vmul.f32 %v6906_v42, %v1053_v48  ;;  %v927_v48 = vld [vmem:[%s8956_s4 + $0x68] sm:$0xff]  ;;  %v1621_v63 = vld [vmem:[%s8958_s6 + $0x20] sm:$0xff]  ;;  %v1623_v44 = vld [vmem:[%s8958_s6 + $0x30] sm:$0xff] }
 0x271   :  { %v1100_v7 = vadd.f32 %v1084_v58, %v924_v39  ;;  %v1101_v9 = vadd.f32 %v1085_v12, %v925_v51  ;;  %v1088_v11 = vmul.f32 %v1072_v24, %v912_v59  ;;  %v1071_v47 = vmul.f32 %v6906_v42, %v1054_v50  ;;  %v6196_v29 = vld [vmem:[%s8957_s5 + $0x28] sm:$0xff]   ;;  %v6197_v59 = vld [vmem:[%s8957_s5 + $0x30] sm:$0xff]   ;;  %v6199_v58 = vld [vmem:[%s8957_s5] sm:$0xff]  }
 0x272   :  { %v1098_v13 = vadd.f32 %v1082_v2, %v922_v26  ;;  %v1099_v19 = vadd.f32 %v1083_v3, %v923_v4  ;;  %v1089_v14 = vmul.f32 %v1073_v6, %v913_v61  ;;  %v1086_v15 = vmul.f32 %v1070_v25, %v910_v62  ;;  %v6198_v61 = vld [vmem:[%s8957_s5 + $0x38] sm:$0xff]   ;;  %v6203_v24 = vld [vmem:[%s8957_s5 + $0x40] sm:$0xff]  }
 0x273   :  { %1185 = vrot.lane.b32.xlu1 %v6991_v53, %s8970_s24  ;;  %1183 = vrot.lane.b32.xlu0 %v6993_v57, %s8970_s24  ;;  %v1116_v16 = vmax.f32 %v1100_v7, 0.0  ;;  %v1117_v17 = vmax.f32 %v1101_v9, 0.0  ;;  %v1104_v18 = vadd.f32 %v1088_v11, %v928_v5  ;;  %v1087_v32 = vmul.f32 %v1071_v47, %v911_v20  ;;  %v6202_v12 = vld [vmem:[%s8957_s5 + $0x18] sm:$0xff]   ;;  %v6204_v20 = vld [vmem:[%s8957_s5 + $0x48] sm:$0xff]  }
 0x274   :  { %v1114_v34 = vmax.f32 %v1098_v13, 0.0  ;;  %v1115_v42 = vmax.f32 %v1099_v19, 0.0  ;;  %v1105_v50 = vadd.f32 %v1089_v14, %v929_v10  ;;  %v1102_v21 = vadd.f32 %v1086_v15, %v926_v46  ;;  %v6205_v7 = vld [vmem:[%s8957_s5 + $0x50] sm:$0xff]   ;;  %v6206_v10 = vld [vmem:[%s8957_s5 + $0x58] sm:$0xff]   ;;  %v6207_v46 = vld [vmem:[%s8957_s5 + $0x60] sm:$0xff]  }
 0x275   :  { %v7057_v22 = vpack.c.bf16 %v1117_v17, %v1116_v16  ;;  %v1120_v23 = vmax.f32 %v1104_v18, 0.0  ;;  %v1103_v27 = vadd.f32 %v1087_v32, %v927_v48  ;;  %v6208_v15 = vld [vmem:[%s8957_s5 + $0x68] sm:$0xff]   ;;  %v6209_v16 = vld [vmem:[%s8957_s5 + $0x70] sm:$0xff]   ;;  %v6210_v17 = vld [vmem:[%s8957_s5 + $0x78] sm:$0xff]  }
 0x276   :  { %v7059_v28 = vpack.c.bf16 %v1115_v42, %v1114_v34  ;;  %v1121_v31 = vmax.f32 %v1105_v50, 0.0  ;;  %v1118_v33 = vmax.f32 %v1102_v21, 0.0  ;;  %v5168_v21 = vld [vmem:[%s8959_s9] ss:$0 sm:$0xff] }
 0x277   :  { %1189 = vrot.lane.b32.xlu1 %v7057_v22, %s8970_s24  ;;  %v1119_v35 = vmax.f32 %v1103_v27, 0.0 }
 0x278   :  { %1187 = vrot.lane.b32.xlu0 %v7059_v28, %s8970_s24  ;;  %v7065_v36 = vpack.c.bf16 %v1121_v31, %v1120_v23 }
 0x279   :  { %v7067_v37 = vpack.c.bf16 %v1119_v35, %v1118_v33 }
 0x27b   :  { %1193 = vrot.lane.b32.xlu1 %v7065_v36, %s8970_s24 }
 0x27c   :  { %1191 = vrot.lane.b32.xlu0 %v7067_v37, %s8970_s24 }
 0x27f   :  { %1392 = vrot.lane.b32.xlu1 %v6973_v45, %s8972_s26 }
 0x280   :  { %1390 = vrot.lane.b32.xlu0 %v6975_v49, %s8972_s26 }
 0x283   :  { %1396 = vrot.lane.b32.xlu1 %v6991_v53, %s8972_s26 }
 0x284   :  { %1394 = vrot.lane.b32.xlu0 %v6993_v57, %s8972_s26 }
 0x287   :  { %1400 = vrot.lane.b32.xlu1 %v7057_v22, %s8972_s26 }
 0x288   :  { %1398 = vrot.lane.b32.xlu0 %v7059_v28, %s8972_s26 }
 0x28b   :  { %1404 = vrot.lane.b32.xlu1 %v7065_v36, %s8972_s26 }
 0x28c   :  { %1402 = vrot.lane.b32.xlu0 %v7067_v37, %s8972_s26 }
 0x28f   :  { %1522 = vrot.lane.b32.xlu1 %v6973_v45, %s8968_s16 }
 0x290   :  { %1520 = vrot.lane.b32.xlu0 %v6975_v49, %s8968_s16 }
 0x293   :  { %1526 = vrot.lane.b32.xlu1 %v6991_v53, %s8968_s16 }
 0x294   :  { %1524 = vrot.lane.b32.xlu0 %v6993_v57, %s8968_s16 }
 0x297   :  { %1530 = vrot.lane.b32.xlu1 %v7057_v22, %s8968_s16 }
 0x298   :  { %1528 = vrot.lane.b32.xlu0 %v7059_v28, %s8968_s16 }
 0x29b   :  { %1534 = vrot.lane.b32.xlu1 %v7065_v36, %s8968_s16 }
 0x29c   :  { %1532 = vrot.lane.b32.xlu0 %v7067_v37, %s8968_s16 }
 0x29f   :  { %1632 = vperm.xlu1 %6124, %v1618_v40  }
 0x2a0   :  { %1627 = vperm.xlu0 %6123, %v1617_v30  }
 0x2a3   :  { %1642 = vperm.xlu1 %6124, %v1620_v41  }
 0x2a4   :  { %1637 = vperm.xlu0 %6123, %v1619_v0  }
 0x2a7   :  { %1652 = vperm.xlu1 %6124, %v1622_v60  }
 0x2a8   :  { %1647 = vperm.xlu0 %6123, %v1621_v63  }
 0x2ab   :  { %1662 = vperm.xlu1 %6124, %v1624_v43  }
 0x2ac   :  { %1657 = vperm.xlu0 %6123, %v1623_v44  }
 0x2e1   :  { %v1180_v39 = vpop.permute.xlu0 %1179  ;;  %v1182_v51 = vpop.permute.xlu1 %1181 }
 0x2e2   :  { %5840 = vmatprep.subr.bf16.mxu0 %v1180_v39 }
 0x2e3   :  { %5841 = vmatpush3.bf16.msra.mxu0 %v1180_v39 }
 0x2e4   :  { %5842 = vmatprep.subr.bf16.mxu0 %v1182_v51 }
 0x2e5   :  { %v1184_v52 = vpop.permute.xlu0 %1183  ;;  %v1186_v54 = vpop.permute.xlu1 %1185 }
 0x2e7   :  { %5843 = vmatpush3.bf16.msra.mxu0 %v1182_v51 }
 0x2e8   :  { %5844 = vmatprep.subr.bf16.mxu0 %v1184_v52 }
 0x2e9   :  { %v1190_v56 = vpop.permute.xlu1 %1189 }
 0x2ea   :  { %v1188_v55 = vpop.permute.xlu0 %1187 }
 0x2eb   :  { %5845 = vmatpush3.bf16.msra.mxu0 %v1184_v52 }
 0x2ec   :  { %5846 = vmatprep.subr.bf16.mxu0 %v1186_v54 }
 0x2ed   :  { %v1194_v8 = vpop.permute.xlu1 %1193 }
 0x2ee   :  { %v1192_v26 = vpop.permute.xlu0 %1191 }
 0x2ef   :  { %5847 = vmatpush3.bf16.msra.mxu0 %v1186_v54 }
 0x2f0   :  { %5848 = vmatprep.subr.bf16.mxu0 %v1188_v55 }
 0x2f3   :  { %5849 = vmatpush3.bf16.msra.mxu0 %v1188_v55 }
 0x2f4   :  { %5850 = vmatprep.subr.bf16.mxu0 %v1190_v56 }
 0x2f7   :  { %5851 = vmatpush3.bf16.msra.mxu0 %v1190_v56 }
 0x2f8   :  { %5852 = vmatprep.subr.bf16.mxu0 %v1192_v26 }
 0x2fb   :  { %5853 = vmatpush3.bf16.msra.mxu0 %v1192_v26 }
 0x2fc   :  { %5854 = vmatprep.subr.bf16.mxu0 %v1194_v8 }
 0x2ff   :  { %5855 = vmatpush3.bf16.msra.mxu0 %v1194_v8 }
 0x300   :  { %5864 = vmatprep.subr.bf16.mxu0 %v6975_v49 }
 0x302   :  { %5857 = vmatmul.mubr.bf16.vlgmr.msra.gmra.mrb[24].mxu0 %v6196_v29 }
 0x303   :  { %5865 = vmatpush3.bf16.msra.mxu0 %v6975_v49  ;;  %5860 = vmatprep.mubr.bf16.mxu0 %v6197_v59  ;;  %v1391_v49 = vpop.permute.xlu0 %1390 }
 0x304   :  { %5866 = vmatprep.subr.bf16.mxu0 %v6973_v45 }
 0x307   :  { %5867 = vmatpush3.bf16.msra.mxu0 %v6973_v45  ;;  %v6200_v45 = vld [vmem:[%s8957_s5 + $0x8] sm:$0xff]   ;;  %v1395_v4 = vpop.permute.xlu0 %1394 }
 0x308   :  { %5868 = vmatprep.subr.bf16.mxu0 %v6993_v57 }
 0x30a   :  { %5861 = vmatmul.mubr.bf16.gmra.mrb[28].mxu0 %v6198_v61 }
 0x30b   :  { %5869 = vmatpush3.bf16.msra.mxu0 %v6993_v57  ;;  %5880 = vmatprep.mubr.bf16.mxu0 %v6199_v58  ;;  %v1393_v57 = vpop.permute.xlu1 %1392  ;;  %v1399_v2 = vpop.permute.xlu0 %1398 }
 0x30c   :  { %5870 = vmatprep.subr.bf16.mxu0 %v6991_v53 }
 0x30f   :  { %5871 = vmatpush3.bf16.msra.mxu0 %v6991_v53  ;;  %v6201_v53 = vld [vmem:[%s8957_s5 + $0x10] sm:$0xff]   ;;  %v1397_v62 = vpop.permute.xlu1 %1396  ;;  %v1403_v5 = vpop.permute.xlu0 %1402 }
 0x310   :  { %5872 = vmatprep.subr.bf16.mxu0 %v7059_v28 }
 0x313   :  { %5873 = vmatpush3.bf16.msra.mxu0 %v7059_v28  ;;  %v1401_v3 = vpop.permute.xlu1 %1400  ;;  %v1521_v25 = vpop.permute.xlu0 %1520 }
 0x314   :  { %5874 = vmatprep.subr.bf16.mxu0 %v7057_v22 }
 0x317   :  { %5875 = vmatpush3.bf16.msra.mxu0 %v7057_v22  ;;  %v1405_v6 = vpop.permute.xlu1 %1404  ;;  %v1525_v11 = vpop.permute.xlu0 %1524 }
 0x318   :  { %5876 = vmatprep.subr.bf16.mxu0 %v7067_v37 }
 0x31b   :  { %5877 = vmatpush3.bf16.msra.mxu0 %v7067_v37  ;;  %v1523_v9 = vpop.permute.xlu1 %1522  ;;  %v1529_v13 = vpop.permute.xlu0 %1528 }
 0x31c   :  { %5878 = vmatprep.subr.bf16.mxu0 %v7065_v36 }
 0x31f   :  { %5879 = vmatpush3.bf16.msra.mxu0 %v7065_v36  ;;  %v1527_v47 = vpop.permute.xlu1 %1526  ;;  %v1533_v14 = vpop.permute.xlu0 %1532 }
 0x320   :  { %5888 = vmatprep.subr.bf16.mxu0 %v1391_v49 }
 0x322   :  { %5881 = vmatmul.mubr.bf16.vlgmr.msra.gmra.mrb[24].mxu0 %v6200_v45 }
 0x323   :  { %5889 = vmatpush3.bf16.msra.mxu0 %v1391_v49  ;;  %5884 = vmatprep.mubr.bf16.mxu0 %v6201_v53  ;;  %v1531_v19 = vpop.permute.xlu1 %1530  ;;  %v1628_v18 = vpop.permute.xlu0 %1627 }
 0x324   :  { %5890 = vmatprep.subr.bf16.mxu0 %v1393_v57 }
 0x327   :  { %5891 = vmatpush3.bf16.msra.mxu0 %v1393_v57  ;;  %v1535_v48 = vpop.permute.xlu1 %1534  ;;  %v1638_v34 = vpop.permute.xlu0 %1637 }
 0x328   :  { %5892 = vmatprep.subr.bf16.mxu0 %v1395_v4 }
 0x32a   :  { %5885 = vmatmul.mubr.bf16.gmra.mrb[28].mxu0 %v6202_v12 }
 0x32b   :  { %5893 = vmatpush3.bf16.msra.mxu0 %v1395_v4  ;;  %5904 = vmatprep.mubr.bf16.mxu0 %v6203_v24  ;;  %v1633_v32 = vpop.permute.xlu1 %1632  ;;  %v1648_v27 = vpop.permute.xlu0 %1647 }
 0x32c   :  { %5894 = vmatprep.subr.bf16.mxu0 %v1397_v62 }
 0x32f   :  { %5895 = vmatpush3.bf16.msra.mxu0 %v1397_v62  ;;  %v1643_v42 = vpop.permute.xlu1 %1642  ;;  %v1658_v63 = vpop.permute.xlu0 %1657 }
 0x330   :  { %5896 = vmatprep.subr.bf16.mxu0 %v1399_v2 }
 0x333   :  { %5897 = vmatpush3.bf16.msra.mxu0 %v1399_v2  ;;  %v1653_v37 = vpop.permute.xlu1 %1652 }
 0x334   :  { %5898 = vmatprep.subr.bf16.mxu0 %v1401_v3 }
 0x337   :  { %5899 = vmatpush3.bf16.msra.mxu0 %v1401_v3  ;;  %v1663_v26 = vpop.permute.xlu1 %1662 }
 0x338   :  { %5900 = vmatprep.subr.bf16.mxu0 %v1403_v5 }
 0x33b   :  { %5901 = vmatpush3.bf16.msra.mxu0 %v1403_v5 }
 0x33c   :  { %5902 = vmatprep.subr.bf16.mxu0 %v1405_v6 }
 0x33f   :  { %5903 = vmatpush3.bf16.msra.mxu0 %v1405_v6 }
 0x340   :  { %5912 = vmatprep.subr.bf16.mxu0 %v1521_v25 }
 0x342   :  { %5905 = vmatmul.mubr.bf16.vlgmr.msra.gmra.mrb[24].mxu0 %v6204_v20 }
 0x343   :  { %5913 = vmatpush3.bf16.msra.mxu0 %v1521_v25  ;;  %5908 = vmatprep.mubr.bf16.mxu0 %v6205_v7 }
 0x344   :  { %5914 = vmatprep.subr.bf16.mxu0 %v1523_v9 }
 0x347   :  { %5915 = vmatpush3.bf16.msra.mxu0 %v1523_v9 }
 0x348   :  { %5916 = vmatprep.subr.bf16.mxu0 %v1525_v11 }
 0x34a   :  { %5909 = vmatmul.mubr.bf16.gmra.mrb[28].mxu0 %v6206_v10 }
 0x34b   :  { %5917 = vmatpush3.bf16.msra.mxu0 %v1525_v11  ;;  %5928 = vmatprep.mubr.bf16.mxu0 %v6207_v46 }
 0x34c   :  { %5918 = vmatprep.subr.bf16.mxu0 %v1527_v47 }
 0x34f   :  { %5919 = vmatpush3.bf16.msra.mxu0 %v1527_v47 }
 0x350   :  { %5920 = vmatprep.subr.bf16.mxu0 %v1529_v13 }
 0x353   :  { %5921 = vmatpush3.bf16.msra.mxu0 %v1529_v13 }
 0x354   :  { %5922 = vmatprep.subr.bf16.mxu0 %v1531_v19 }
 0x357   :  { %5923 = vmatpush3.bf16.msra.mxu0 %v1531_v19 }
 0x358   :  { %5924 = vmatprep.subr.bf16.mxu0 %v1533_v14 }
 0x35b   :  { %5925 = vmatpush3.bf16.msra.mxu0 %v1533_v14 }
 0x35c   :  { %5926 = vmatprep.subr.bf16.mxu0 %v1535_v48 }
 0x35f   :  { %5927 = vmatpush3.bf16.msra.mxu0 %v1535_v48 }
 0x362   :  { %5929 = vmatmul.mubr.bf16.vlgmr.msra.gmra.mrb[24].mxu0 %v6208_v15 }
 0x363   :  { %5932 = vmatprep.mubr.bf16.mxu0 %v6209_v16 }
 0x36a   :  { %5933 = vmatmul.mubr.bf16.gmra.mrb[28].mxu0 %v6210_v17 }
 0x435   :  { %v5930_v50 = vpop.f32.mrb[24].mxu0 }
 0x436   :  { %v7196_v22 = vadd.f32 %v5930_v50, %v1638_v34  ;;  %v1578_v23 = vpop.f32.mrb[25].mxu0 }
 0x437   :  { %v7198_v28 = vadd.f32 %v1628_v18, %v1578_v23  ;;  %v5931_v31 = vpop.f32.mrb[26].mxu0 }
 0x438   :  { %v1698_v33 = vmul.f32 %v5168_v21, %v7196_v22  ;;  %v7201_v35 = vadd.f32 %v5931_v31, %v1643_v42  ;;  %v1581_v36 = vpop.f32.mrb[27].mxu0 }
 0x439   :  { %v1696_v38 = vmul.f32 %v5168_v21, %v7198_v28  ;;  %v7204_v40 = vadd.f32 %v1633_v32, %v1581_v36 }
 0x43a   :  { %v1699_v30 = vmul.f32 %v5168_v21, %v7201_v35  ;;  %v1731_v60 = vmul.f32 %v1698_v33, %v7196_v22  ;;  %v1708_v8 = vsel %vm1704_vm1, %v1698_v33, 0.0 }
 0x43b   :  { %v1729_v41 = vmul.f32 %v1696_v38, %v7198_v28  ;;  %v1697_v0 = vmul.f32 %v5168_v21, %v7204_v40  ;;  %v1705_v43 = vsel %vm1704_vm1, %v1696_v38, 0.0 }
 0x43c   :  { %v1732_v52 = vmul.f32 %v1699_v30, %v7201_v35  ;;  %v1740_v45 = vsel %vm1704_vm1, %v1731_v60, 0.0  ;;  %v1710_v4 = vsel %vm1704_vm1, %v1699_v30, 0.0 }
 0x43d   :  { %v1706_v44 = vsel %vm1704_vm1, %v1697_v0, 0.0  ;;  %v1730_v39 = vmul.f32 %v1697_v0, %v7204_v40  ;;  %v5934_v51 = vpop.f32.mrb[28].mxu0  ;;  %v1737_v29 = vsel %vm1704_vm1, %v1729_v41, 0.0 }
 0x43e   :  { %v1707_v54 = vadd.f32 %v1706_v44, %v1705_v43  ;;  %v7214_v55 = vadd.f32 %v5934_v51, %v1658_v63  ;;  %v1594_v56 = vpop.f32.mrb[29].mxu0  ;;  %v1742_v3 = vsel %vm1704_vm1, %v1732_v52, 0.0  ;;  %v6211_v52 = vld [vmem:[%s8952_s0 + $0x240] sm:$0xff]  }
 0x43f   :  { %v1738_v59 = vsel %vm1704_vm1, %v1730_v39, 0.0  ;;  %v7219_v61 = vadd.f32 %v1648_v27, %v1594_v56  ;;  %v5935_v58 = vpop.f32.mrb[30].mxu0  ;;  %v6213_v56 = vld [vmem:[%s8952_s0 + $0x248] sm:$0xff]   ;;  %5680 = vmatprep.subr.bf16.mxu0 %v6211_v52 }
 0x440   :  { %v1709_v49 = vadd.f32 %v1708_v8, %v1707_v54  ;;  %v1739_v53 = vadd.f32 %v1738_v59, %v1737_v29  ;;  %v7222_v57 = vadd.f32 %v5935_v58, %v1663_v26  ;;  %v1597_v12 = vpop.f32.mrb[31].mxu0  ;;  %v1702_v24 = vmul.f32 %v5168_v21, %v7214_v55  ;;  %v6212_v54 = vld [vmem:[%s8952_s0 + $0x200] sm:$0xff]   ;;  %v6214_v26 = vld [vmem:[%s8952_s0 + $0x208] sm:$0xff]   ;;  %v6215_v8 = vld [vmem:[%s8952_s0 + $0x250] sm:$0xff]  }
 0x441   :  { %v1700_v62 = vmul.f32 %v5168_v21, %v7219_v61  ;;  %v7227_v2 = vadd.f32 %v1653_v37, %v1597_v12  ;;  %5681 = vmatpush3.bf16.msra.mxu0 %v6212_v54  ;;  %v7262_v29 = vld [vmem:[%s8953_s1 + $0x4] ss:$8 sps:$4 sm:$0xff]   ;;  %v6216_v59 = vld [vmem:[%s8952_s0 + $0x210] sm:$0xff]   ;;  %v6217_v58 = vld [vmem:[%s8952_s0 + $0x258] sm:$0xff]  }
 0x442   :  { %v1741_v5 = vadd.f32 %v1740_v45, %v1739_v53  ;;  %v1711_v6 = vadd.f32 %v1710_v4, %v1709_v49  ;;  %v1703_v9 = vmul.f32 %v5168_v21, %v7222_v57  ;;  %v1735_v46 = vmul.f32 %v1702_v24, %v7214_v55  ;;  %5682 = vmatprep.subr.bf16.mxu0 %v6213_v56  ;;  %v6218_v45 = vld [vmem:[%s8952_s0 + $0x218] sm:$0xff]   ;;  %v6219_v49 = vld [vmem:[%s8952_s0 + $0x260] sm:$0xff]   ;;  %v6221_v12 = vld [vmem:[%s8952_s0 + $0x268] sm:$0xff]  }
 0x443   :  { %v1712_v20 = vsel %vm1704_vm1, %v1700_v62, 0.0  ;;  %v1733_v25 = vmul.f32 %v1700_v62, %v7219_v61  ;;  %v1701_v7 = vmul.f32 %v5168_v21, %v7227_v2  ;;  %v1716_v15 = vsel %vm1704_vm1, %v1702_v24, 0.0  ;;  %2694 = vmatprep.mubr.bf16.mxu0 %v7262_v29  ;;  %v6220_v53 = vld [vmem:[%s8952_s0 + $0x220] sm:$0xff]   ;;  %v6222_v4 = vld [vmem:[%s8952_s0 + $0x228] sm:$0xff]   ;;  %v6223_v24 = vld [vmem:[%s8952_s0 + $0x270] sm:$0xff]  }
 0x444   :  { %v1713_v10 = vadd.f32 %v1712_v20, %v1711_v6  ;;  %v1743_v11 = vadd.f32 %v1742_v3, %v1741_v5  ;;  %v1736_v16 = vmul.f32 %v1703_v9, %v7222_v57  ;;  %v1718_v34 = vsel %vm1704_vm1, %v1703_v9, 0.0  ;;  %v6224_v62 = vld [vmem:[%s8952_s0 + $0x230] sm:$0xff]   ;;  %v6225_v3 = vld [vmem:[%s8952_s0 + $0x278] sm:$0xff]   ;;  %v6230_v6 = vld [vmem:[%s8952_s0 + $0x340] sm:$0xff]  }
 0x445   :  { %v1744_v47 = vsel %vm1704_vm1, %v1733_v25, 0.0  ;;  %v1734_v13 = vmul.f32 %v1701_v7, %v7227_v2  ;;  %v1714_v19 = vsel %vm1704_vm1, %v1701_v7, 0.0  ;;  %v1748_v42 = vsel %vm1704_vm1, %v1735_v46, 0.0  ;;  %5683 = vmatpush3.bf16.msra.mxu0 %v6214_v26  ;;  %v6226_v5 = vld [vmem:[%s8952_s0 + $0x238] sm:$0xff]   ;;  %v7308_v20 = vld [vmem:[%s8953_s1] ss:$8 sps:$4 sm:$0xff]  }
 0x446   :  { %v1715_v14 = vadd.f32 %v1714_v19, %v1713_v10  ;;  %v1745_v48 = vadd.f32 %v1744_v47, %v1743_v11  ;;  %v1750_v23 = vsel %vm1704_vm1, %v1736_v16, 0.0  ;;  %5684 = vmatprep.subr.bf16.mxu0 %v6215_v8  ;;  %v6231_v25 = vld [vmem:[%s8952_s0 + $0x300] sm:$0xff]   ;;  %v7316_v7 = vld [vmem:[%s8953_s1 + $0x14] ss:$8 sps:$4 sm:$0xff]   ;;  %v6232_v9 = vld [vmem:[%s8952_s0 + $0x348] sm:$0xff]  }
 0x447   :  { %v1746_v17 = vsel %vm1704_vm1, %v1734_v13, 0.0  ;;  %v6233_v11 = vld [vmem:[%s8952_s0 + $0x308] sm:$0xff]   ;;  %v6234_v46 = vld [vmem:[%s8952_s0 + $0x350] sm:$0xff]   ;;  %v6236_v19 = vld [vmem:[%s8952_s0 + $0x358] sm:$0xff]  }
 0x448   :  { %v1717_v18 = vadd.f32 %v1716_v15, %v1715_v14  ;;  %v1747_v32 = vadd.f32 %v1746_v17, %v1745_v48  ;;  %v7333_v47 = vld [vmem:[%s8953_s1 + $0x10] ss:$8 sps:$4 sm:$0xff]   ;;  %v6238_v48 = vld [vmem:[%s8952_s0 + $0x360] sm:$0xff]   ;;  %v6240_v17 = vld [vmem:[%s8952_s0 + $0x368] sm:$0xff]  }
 0x449   :  { %5685 = vmatpush3.bf16.msra.mxu0 %v6216_v59  ;;  %v6235_v13 = vld [vmem:[%s8952_s0 + $0x310] sm:$0xff]   ;;  %v6237_v14 = vld [vmem:[%s8952_s0 + $0x318] sm:$0xff]   ;;  %v6239_v16 = vld [vmem:[%s8952_s0 + $0x320] sm:$0xff]  }
 0x44a   :  { %v1719_v50 = vadd.f32 %v1718_v34, %v1717_v18  ;;  %v1749_v21 = vadd.f32 %v1748_v42, %v1747_v32  ;;  %5686 = vmatprep.subr.bf16.mxu0 %v6217_v58  ;;  %v6241_v18 = vld [vmem:[%s8952_s0 + $0x328] sm:$0xff]   ;;  %v6245_v32 = vld [vmem:[%s8952_s0 + $0x370] sm:$0xff]   ;;  %v6247_v42 = vld [vmem:[%s8952_s0 + $0x378] sm:$0xff]  }
 0x44b   :  { %v6246_v34 = vld [vmem:[%s8952_s0 + $0x330] sm:$0xff]   ;;  %v1681_v26 = vld [vmem:[%s8961_s8] sm:$0xff]  ;;  %v1682_v8 = vld [vmem:[%s8961_s8 + $0x8] sm:$0xff] }
 0x44c   :  { %1720 = vadd.xlane.f32.xlu0 %v1719_v50  ;;  %v1751_v27 = vadd.f32 %v1750_v23, %v1749_v21  ;;  %v6248_v50 = vld [vmem:[%s8952_s0 + $0x338] sm:$0xff]   ;;  %v1687_v59 = vld [vmem:[%s8961_s8 + $0x30] sm:$0xff] }
 0x44d   :  { %5687 = vmatpush3.bf16.msra.mxu0 %v6218_v45 }
 0x44e   :  { %1752 = vadd.xlane.f32.xlu1 %v1751_v27  ;;  %5688 = vmatprep.subr.bf16.mxu0 %v6219_v49 }
 0x451   :  { %5689 = vmatpush3.bf16.msra.mxu0 %v6220_v53 }
 0x452   :  { %5690 = vmatprep.subr.bf16.mxu0 %v6221_v12  ;;  %v1688_v12 = vld [vmem:[%s8961_s8 + $0x38] sm:$0xff] }
 0x455   :  { %5691 = vmatpush3.bf16.msra.mxu0 %v6222_v4  ;;  %v1685_v4 = vld [vmem:[%s8961_s8 + $0x20] sm:$0xff] }
 0x456   :  { %5692 = vmatprep.subr.bf16.mxu0 %v6223_v24  ;;  %v1686_v24 = vld [vmem:[%s8961_s8 + $0x28] sm:$0xff] }
 0x459   :  { %5693 = vmatpush3.bf16.msra.mxu0 %v6224_v62 }
 0x45a   :  { %5694 = vmatprep.subr.bf16.mxu0 %v6225_v3 }
 0x45d   :  { %5695 = vmatpush3.bf16.msra.mxu0 %v6226_v5 }
 0x45e   :  { %5736 = vmatprep.subr.bf16.mxu0 %v6230_v6 }
 0x460   :  { %2695 = vmatmul.mubr.bf16.vlgmr.msra.gmra.mrb[32].mxu0 %v7308_v20 }
 0x461   :  { %5737 = vmatpush3.bf16.msra.mxu0 %v6231_v25  ;;  %2702 = vmatprep.mubr.bf16.mxu0 %v7316_v7 }
 0x462   :  { %5738 = vmatprep.subr.bf16.mxu0 %v6232_v9 }
 0x465   :  { %5739 = vmatpush3.bf16.msra.mxu0 %v6233_v11 }
 0x466   :  { %5740 = vmatprep.subr.bf16.mxu0 %v6234_v46 }
 0x468   :  { %2703 = vmatmul.mubr.bf16.gmra.mrb[36].mxu0 %v7333_v47 }
 0x469   :  { %5741 = vmatpush3.bf16.msra.mxu0 %v6235_v13  ;;  %3050 = vmatprep.mubr.bf16.mxu0 %v7262_v29 }
 0x46a   :  { %5742 = vmatprep.subr.bf16.mxu0 %v6236_v19 }
 0x46d   :  { %5743 = vmatpush3.bf16.msra.mxu0 %v6237_v14 }
 0x46e   :  { %5744 = vmatprep.subr.bf16.mxu0 %v6238_v48 }
 0x471   :  { %5745 = vmatpush3.bf16.msra.mxu0 %v6239_v16 }
 0x472   :  { %5746 = vmatprep.subr.bf16.mxu0 %v6240_v17 }
 0x475   :  { %5747 = vmatpush3.bf16.msra.mxu0 %v6241_v18 }
 0x476   :  { %5748 = vmatprep.subr.bf16.mxu0 %v6245_v32 }
 0x479   :  { %5749 = vmatpush3.bf16.msra.mxu0 %v6246_v34 }
 0x47a   :  { %5750 = vmatprep.subr.bf16.mxu0 %v6247_v42 }
 0x47d   :  { %5751 = vmatpush3.bf16.msra.mxu0 %v6248_v50 }
 0x480   :  { %3051 = vmatmul.mubr.bf16.vlgmr.msra.gmra.mrb[40].mxu0 %v7308_v20 }
 0x481   :  { %3058 = vmatprep.mubr.bf16.mxu0 %v7316_v7 }
 0x488   :  { %3059 = vmatmul.mubr.bf16.gmra.mrb[44].mxu0 %v7333_v47 }
 0x4d9   :  { %v1721_v31 = vpop.xlane.xlu0 %1720 }
 0x4da   :  { %v1722_v33 = vrot.slane %v1721_v31, 4 }
 0x4db   :  { %v1753_v36 = vpop.xlane.xlu1 %1752 }
 0x4dc   :  { %v1723_v37 = vadd.f32 %v1722_v33, %v1721_v31  ;;  %v1754_v38 = vrot.slane %v1753_v36, 4 }
 0x4de   :  { %v1755_v30 = vadd.f32 %v1754_v38, %v1753_v36  ;;  %v1724_v41 = vrot.slane %v1723_v37, 2  ;;  %v1676_v38 = vld [vmem:[%s8960_s7 + $0x18] sm:$0xff] }
 0x4e0   :  { %v1725_v0 = vadd.f32 %v1724_v41, %v1723_v37  ;;  %v1756_v60 = vrot.slane %v1755_v30, 2  ;;  %v1675_v37 = vld [vmem:[%s8960_s7 + $0x10] sm:$0xff] }
 0x4e2   :  { %v1726_v63 = vrot.slane %v1725_v0, 1  ;;  %v1757_v43 = vadd.f32 %v1756_v60, %v1755_v30 }
 0x4e4   :  { %v1727_v44 = vadd.f32 %v1726_v63, %v1725_v0  ;;  %v1758_v39 = vrot.slane %v1757_v43, 1 }
 0x4e6   :  { %6086 = vpush %v1727_v44  ;;  %v1759_v51 = vadd.f32 %v1758_v39, %v1757_v43  ;;  %v1680_v43 = vld [vmem:[%s8960_s7 + $0x38] sm:$0xff]  ;;  %v1677_v44 = vld [vmem:[%s8960_s7 + $0x20] sm:$0xff]  ;;  %v1678_v39 = vld [vmem:[%s8960_s7 + $0x28] sm:$0xff] }
 0x4e8   :  { %6088 = vpush %v1759_v51 }
 0x517   :  { %s6087_s17 = spop %6086 }
 0x518   :  { %s7295_s20 = smul.f32 0.00019290124, %s6087_s17 }
 0x519   :  { %s6089_s21 = spop %6088 }
 0x51a   :  { %s1767_s22 = smul.f32 %s7295_s20, %s7295_s20  ;;  %v1774_v21 = vstv %s7295_s20  ;;  %s8977_s20 = smov 127  }
 0x51b   :  { %s1766_s28 = smul.f32 0.00019290124, %s6089_s21  ;;  %v1775_v23 = vsub.f32 %v7198_v28, %v1774_v21  ;;  %v1776_v27 = vsub.f32 %v7204_v40, %v1774_v21  ;;  %v1777_v31 = vsub.f32 %v7196_v22, %v1774_v21  ;;  %v1778_v33 = vsub.f32 %v7201_v35, %v1774_v21  ;;  %v1683_v22 = vld [vmem:[%s8961_s8 + $0x10] sm:$0xff]  ;;  %v1684_v35 = vld [vmem:[%s8961_s8 + $0x18] sm:$0xff] }
 0x51c   :  { %v1779_v36 = vsub.f32 %v7219_v61, %v1774_v21  ;;  %v1780_v30 = vsub.f32 %v7227_v2, %v1774_v21  ;;  %v1781_v28 = vsub.f32 %v7214_v55, %v1774_v21  ;;  %v1782_v40 = vsub.f32 %v7222_v57, %v1774_v21  ;;  %v1673_v61 = vld [vmem:[%s8960_s7] sm:$0xff]  ;;  %v1674_v2 = vld [vmem:[%s8960_s7 + $0x8] sm:$0xff]  ;;  %v1679_v55 = vld [vmem:[%s8960_s7 + $0x30] sm:$0xff] }
 0x51d   :  { %s1768_s16 = ssub.f32 %s1766_s28, %s1767_s22 }
 0x51f   :  { %s1769_s21 = smax.f32 %s6382_s27, %s1768_s16  ;;  %s8976_s16 = smov 118  }
 0x520   :  { %s1770_s28 = sadd.f32 1e-05, %s1769_s21 }
 0x522   :  { %v1771_v10 = vstv %s1770_s28 }
 0x523   :  { %6371 = vrsqrt.f32 %v1771_v10 }
 0x52d   :  { %v6372_v15 = vpop.eup %6371 }
 0x52e   :  { %6090 = vpush %v6372_v15 }
 0x55f   :  { %s6091_s29 = spop %6090 }
 0x560   :  { %v1783_v41 = vstv %s6091_s29 }
 0x561   :  { %v1784_v57 = vmul.f32 %v1783_v41, %v1775_v23  ;;  %v1785_v0 = vmul.f32 %v1783_v41, %v1776_v27  ;;  %v1786_v60 = vmul.f32 %v1783_v41, %v1777_v31  ;;  %v1787_v63 = vmul.f32 %v1783_v41, %v1778_v33 }
 0x562   :  { %v1788_v51 = vmul.f32 %v1783_v41, %v1779_v36  ;;  %v1789_v52 = vmul.f32 %v1783_v41, %v1780_v30  ;;  %v1790_v54 = vmul.f32 %v1783_v41, %v1781_v28  ;;  %v1791_v56 = vmul.f32 %v1783_v41, %v1782_v40 }
 0x563   :  { %v1794_v58 = vmul.f32 %v1786_v60, %v1675_v37  ;;  %v1795_v45 = vmul.f32 %v1787_v63, %v1676_v38  ;;  %v1792_v49 = vmul.f32 %v1784_v57, %v1673_v61  ;;  %v1793_v53 = vmul.f32 %v1785_v0, %v1674_v2  ;;  %v2294_v57 = vld [vmem:[%s8963_s11] sm:$0xff]  ;;  %v2297_v0 = vld [vmem:[%s8963_s11 + $0x18] sm:$0xff]  ;;  %v2296_v60 = vld [vmem:[%s8963_s11 + $0x10] sm:$0xff] }
 0x564   :  { %v1798_v62 = vmul.f32 %v1790_v54, %v1679_v55  ;;  %v1799_v3 = vmul.f32 %v1791_v56, %v1680_v43  ;;  %v1796_v5 = vmul.f32 %v1788_v51, %v1677_v44  ;;  %v1797_v6 = vmul.f32 %v1789_v52, %v1678_v39  ;;  %v2295_v55 = vld [vmem:[%s8963_s11 + $0x8] sm:$0xff]  ;;  %v2298_v43 = vld [vmem:[%s8963_s11 + $0x20] sm:$0xff]  ;;  %v5696_v44 = vpop.f32.mrb[32].mxu0  ;;  %v2301_v39 = vld [vmem:[%s8963_s11 + $0x38] sm:$0xff] }
 0x565   :  { %v1802_v25 = vadd.f32 %v1794_v58, %v1683_v22  ;;  %v1803_v9 = vadd.f32 %v1795_v45, %v1684_v35  ;;  %v1800_v10 = vadd.f32 %v1792_v49, %v1681_v26  ;;  %v1801_v11 = vadd.f32 %v1793_v53, %v1682_v8  ;;  %v6251_v22 = vld [vmem:[%s8962_s10 + $0x44] ss:$8 sps:$4 sm:$0xff]   ;;  %v2300_v51 = vld [vmem:[%s8963_s11 + $0x30] sm:$0xff]  ;;  %v5697_v52 = vpop.f32.mrb[33].mxu0 }
 0x566   :  { %v1806_v46 = vadd.f32 %v1798_v62, %v1687_v59  ;;  %v1807_v13 = vadd.f32 %v1799_v3, %v1688_v12  ;;  %v1804_v19 = vadd.f32 %v1796_v5, %v1685_v4  ;;  %v1805_v14 = vadd.f32 %v1797_v6, %v1686_v24  ;;  %5185 = vmatprep.mubr.msk.bf16.mxu1 %vm1937_vm2, %v6251_v22  ;;  %v2299_v63 = vld [vmem:[%s8963_s11 + $0x28] sm:$0xff]  ;;  %v5699_v56 = vpop.f32.mrb[34].mxu0  ;;  %v3245_v59 = vld [vmem:[%s8954_s2] sm:$0xff]  ;;  %v3248_v12 = vld [vmem:[%s8954_s2 + $0x18] sm:$0xff] }
 0x567   :  { %v1810_v48 = vmax.f32 %v1802_v25, 0.0  ;;  %v1811_v15 = vmax.f32 %v1803_v9, 0.0  ;;  %v1808_v16 = vmax.f32 %v1800_v10, 0.0  ;;  %v1809_v17 = vmax.f32 %v1801_v11, 0.0  ;;  %v5700_v26 = vpop.f32.mrb[35].mxu0  ;;  %v3246_v8 = vld [vmem:[%s8954_s2 + $0x8] sm:$0xff] }
 0x568   :  { %v1814_v18 = vmax.f32 %v1806_v46, 0.0  ;;  %v1815_v32 = vmax.f32 %v1807_v13, 0.0  ;;  %v1812_v50 = vmax.f32 %v1804_v19, 0.0  ;;  %v1813_v21 = vmax.f32 %v1805_v14, 0.0  ;;  %v5702_v45 = vpop.f32.mrb[36].mxu0  ;;  %v3247_v4 = vld [vmem:[%s8954_s2 + $0x10] sm:$0xff] }
 0x569   :  { %v7430_v34 = vpack.c.bf16 %v1811_v15, %v1810_v48  ;;  %v7432_v42 = vpack.c.bf16 %v1809_v17, %v1808_v16  ;;  %v7550_v54 = vadd.f32 %v5697_v52, %v5696_v44  ;;  %v7558_v58 = vadd.f32 %v5700_v26, %v5699_v56  ;;  %v5703_v49 = vpop.f32.mrb[37].mxu0  ;;  %v3250_v24 = vld [vmem:[%s8954_s2 + $0x28] sm:$0xff]  ;;  %v3249_v62 = vld [vmem:[%s8954_s2 + $0x20] sm:$0xff]  ;;  %v3252_v25 = vld [vmem:[%s8954_s2 + $0x38] sm:$0xff] }
 0x56a   :  { %v7438_v23 = vpack.c.bf16 %v1815_v32, %v1814_v18  ;;  %v7440_v27 = vpack.c.bf16 %v1813_v21, %v1812_v50  ;;  %v7560_v53 = vadd.f32 %v5703_v49, %v5702_v45  ;;  %v5705_v3 = vpop.f32.mrb[38].mxu0  ;;  %v3251_v9 = vld [vmem:[%s8954_s2 + $0x30] sm:$0xff]  ;;  %v3254_v46 = vld [vmem:[%s8954_s2 + $0x48] sm:$0xff]  ;;  %v3253_v13 = vld [vmem:[%s8954_s2 + $0x40] sm:$0xff] }
 0x56b   :  { %1826 = vrot.lane.b32.xlu1 %v7430_v34, %s8976_s16  ;;  %1824 = vrot.lane.b32.xlu0 %v7432_v42, %s8976_s16  ;;  %v5706_v5 = vpop.f32.mrb[39].mxu0  ;;  %v3256_v18 = vld [vmem:[%s8954_s2 + $0x58] sm:$0xff]  ;;  %v3255_v32 = vld [vmem:[%s8954_s2 + $0x50] sm:$0xff] }
 0x56c   :  { %v7574_v6 = vadd.f32 %v5706_v5, %v5705_v3  ;;  %v5752_v10 = vpop.f32.mrb[40].mxu0  ;;  %v3257_v22 = vld [vmem:[%s8954_s2 + $0x60] sm:$0xff]  ;;  %v6252_v56 = vld [vmem:[%s8962_s10 + $0x54] ss:$8 sps:$4 sm:$0xff]   ;;  %v6254_v26 = vld [vmem:[%s8962_s10 + $0x50] ss:$8 sps:$4 sm:$0xff]  }
 0x56d   :  { %v5753_v11 = vpop.f32.mrb[41].mxu0  ;;  %v6249_v52 = vld [vmem:[%s8962_s10 + $0x40] ss:$8 sps:$4 sm:$0xff]   ;;  %v6270_v45 = vld [vmem:[%s8962_s10 + $0x34] ss:$8 sps:$4 sm:$0xff]  }
 0x56e   :  { %v7588_v19 = vadd.f32 %v5753_v11, %v5752_v10  ;;  %v5755_v14 = vpop.f32.mrb[42].mxu0  ;;  %v6276_v10 = vld [vmem:[%s8952_s0 + $0x2c0] sm:$0xff]  }
 0x56f   :  { %1830 = vrot.lane.b32.xlu1 %v7438_v23, %s8976_s16  ;;  %1828 = vrot.lane.b32.xlu0 %v7440_v27, %s8976_s16  ;;  %v5756_v48 = vpop.f32.mrb[43].mxu0 }
 0x570   :  { %v7590_v15 = vadd.f32 %v5756_v48, %v5755_v14  ;;  %v5758_v16 = vpop.f32.mrb[44].mxu0  ;;  %v6280_v14 = vld [vmem:[%s8962_s10 + $0x94] ss:$8 sps:$4 sm:$0xff]   ;;  %v6278_v48 = vld [vmem:[%s8952_s0 + $0x2c8] sm:$0xff]  }
 0x571   :  { %v5759_v17 = vpop.f32.mrb[45].mxu0 }
 0x572   :  { %v7598_v50 = vadd.f32 %v5759_v17, %v5758_v16  ;;  %v5761_v21 = vpop.f32.mrb[46].mxu0  ;;  %v6279_v16 = vld [vmem:[%s8952_s0 + $0x288] sm:$0xff]   ;;  %v6283_v17 = vld [vmem:[%s8952_s0 + $0x2d0] sm:$0xff]  }
 0x573   :  { %1838 = vrot.lane.b32.xlu1 %v7430_v34, %s6386_s30  ;;  %1836 = vrot.lane.b32.xlu0 %v7432_v42, %s6386_s30 }
 0x577   :  { %1842 = vrot.lane.b32.xlu1 %v7438_v23, %s6386_s30  ;;  %1840 = vrot.lane.b32.xlu0 %v7440_v27, %s6386_s30 }
 0x57b   :  { %1903 = vrot.lane.b32.xlu1 %v7430_v34, %s8977_s20  ;;  %1901 = vrot.lane.b32.xlu0 %v7432_v42, %s8977_s20 }
 0x57f   :  { %1907 = vrot.lane.b32.xlu1 %v7438_v23, %s8977_s20  ;;  %1905 = vrot.lane.b32.xlu0 %v7440_v27, %s8977_s20 }
 0x5dd   :  { %v7462_v31 = vpop.permute.xlu1 %1826  ;;  %v7464_v33 = vpop.permute.xlu0 %1824 }
 0x5de   :  { %1911 = vrot.lane.b32.xlu1 %v7462_v31, %s8977_s20  ;;  %1909 = vrot.lane.b32.xlu0 %v7464_v33, %s8977_s20 }
 0x5e1   :  { %v7470_v36 = vpop.permute.xlu1 %1830  ;;  %v7472_v37 = vpop.permute.xlu0 %1828 }
 0x5e2   :  { %1915 = vrot.lane.b32.xlu1 %v7470_v36, %s8977_s20  ;;  %1913 = vrot.lane.b32.xlu0 %v7472_v37, %s8977_s20 }
 0x5e5   :  { %v7478_v38 = vpop.permute.xlu1 %1838  ;;  %v7480_v30 = vpop.permute.xlu0 %1836 }
 0x5e6   :  { %1919 = vrot.lane.b32.xlu1 %v7478_v38, %s8977_s20  ;;  %1917 = vrot.lane.b32.xlu0 %v7480_v30, %s8977_s20 }
 0x5e9   :  { %v7486_v28 = vpop.permute.xlu1 %1842  ;;  %v7488_v40 = vpop.permute.xlu0 %1840 }
 0x5ea   :  { %1923 = vrot.lane.b32.xlu1 %v7486_v28, %s8977_s20  ;;  %1921 = vrot.lane.b32.xlu0 %v7488_v40, %s8977_s20 }
 0x5ed   :  { %v1902_v41 = vpop.permute.xlu0 %1901  ;;  %v1904_v35 = vpop.permute.xlu1 %1903 }
 0x5ee   :  { %2175 = vrot.lane.b32.xlu1 %v7430_v34, %s8974_s18  ;;  %2173 = vrot.lane.b32.xlu0 %v7432_v42, %s8974_s18 }
 0x5ef   :  { %1951 = vmatpush1.bf16.msra.mxu1 %v1902_v41  ;;  %v3258_v41 = vld [vmem:[%s8954_s2 + $0x68] sm:$0xff] }
 0x5f0   :  { %1952 = vmatprep.subr.bf16.mxu1 %v6381_v1 }
 0x5f1   :  { %v1906_v61 = vpop.permute.xlu0 %1905  ;;  %v1908_v2 = vpop.permute.xlu1 %1907 }
 0x5f2   :  { %2179 = vrot.lane.b32.xlu1 %v7438_v23, %s8974_s18  ;;  %2177 = vrot.lane.b32.xlu0 %v7440_v27, %s8974_s18 }
 0x5f3   :  { %1953 = vmatpush1.bf16.msra.mxu1 %v1904_v35  ;;  %v5762_v35 = vpop.f32.mrb[47].mxu0 }
 0x5f4   :  { %1954 = vmatprep.subr.bf16.mxu1 %v6381_v1 }
 0x5f6   :  { %2183 = vrot.lane.b32.xlu1 %v7462_v31, %s8974_s18  ;;  %2181 = vrot.lane.b32.xlu0 %v7464_v33, %s8974_s18 }
 0x5f7   :  { %1955 = vmatpush1.bf16.msra.mxu1 %v1906_v61  ;;  %v7606_v61 = vadd.f32 %v5762_v35, %v5761_v21  ;;  %v6287_v21 = vld [vmem:[%s8962_s10 + $0xa4] ss:$8 sps:$4 sm:$0xff]  }
 0x5f8   :  { %1956 = vmatprep.subr.bf16.mxu1 %v6381_v1  ;;  %v6290_v35 = vld [vmem:[%s8952_s0 + $0x2e0] sm:$0xff]  }
 0x5fa   :  { %2187 = vrot.lane.b32.xlu1 %v7470_v36, %s8974_s18  ;;  %2185 = vrot.lane.b32.xlu0 %v7472_v37, %s8974_s18 }
 0x5fb   :  { %1957 = vmatpush1.bf16.msra.mxu1 %v1908_v2  ;;  %v3259_v2 = vld [vmem:[%s8954_s2 + $0x70] sm:$0xff] }
 0x5fc   :  { %1958 = vmatprep.subr.bf16.mxu1 %v6381_v1 }
 0x5fe   :  { %2191 = vrot.lane.b32.xlu1 %v7478_v38, %s8974_s18  ;;  %2189 = vrot.lane.b32.xlu0 %v7480_v30, %s8974_s18 }
 0x602   :  { %2195 = vrot.lane.b32.xlu1 %v7486_v28, %s8974_s18  ;;  %2193 = vrot.lane.b32.xlu0 %v7488_v40, %s8974_s18 }
 0x606   :  { %2309 = vperm.xlu1 %6124, %v2295_v55   ;;  %2304 = vperm.xlu0 %6123, %v2294_v57   ;;  %v3260_v55 = vld [vmem:[%s8954_s2 + $0x78] sm:$0xff] }
 0x60a   :  { %2319 = vperm.xlu1 %6124, %v2297_v0   ;;  %2314 = vperm.xlu0 %6123, %v2296_v60  }
 0x60e   :  { %2329 = vperm.xlu1 %6124, %v2299_v63   ;;  %2324 = vperm.xlu0 %6123, %v2298_v43  }
 0x612   :  { %2339 = vperm.xlu1 %6124, %v2301_v39   ;;  %2334 = vperm.xlu0 %6123, %v2300_v51  }
 0x616   :  { %3268 = vperm.xlu1 %6124, %v3246_v8   ;;  %3263 = vperm.xlu0 %6123, %v3245_v59   ;;  %v6255_v8 = vld [vmem:[%s8962_s10 + $0x64] ss:$8 sps:$4 sm:$0xff]   ;;  %v6269_v59 = vld [vmem:[%s8962_s10 + $0x20] ss:$8 sps:$4 sm:$0xff]  }
 0x61a   :  { %3278 = vperm.xlu1 %6124, %v3248_v12   ;;  %3273 = vperm.xlu0 %6123, %v3247_v4   ;;  %v6272_v4 = vld [vmem:[%s8962_s10 + $0x30] ss:$8 sps:$4 sm:$0xff]  }
 0x61e   :  { %3288 = vperm.xlu1 %6124, %v3250_v24   ;;  %3283 = vperm.xlu0 %6123, %v3249_v62   ;;  %v6275_v24 = vld [vmem:[%s8962_s10 + $0x84] ss:$8 sps:$4 sm:$0xff]  }
 0x622   :  { %3298 = vperm.xlu1 %6124, %v3252_v25   ;;  %3293 = vperm.xlu0 %6123, %v3251_v9  }
 0x626   :  { %3308 = vperm.xlu1 %6124, %v3254_v46   ;;  %3303 = vperm.xlu0 %6123, %v3253_v13   ;;  %v6273_v46 = vld [vmem:[%s8962_s10 + $0x80] ss:$8 sps:$4 sm:$0xff]  }
 0x627   :  { %v6277_v13 = vld [vmem:[%s8952_s0 + $0x280] sm:$0xff]  }
 0x62a   :  { %3318 = vperm.xlu1 %6124, %v3256_v18   ;;  %3313 = vperm.xlu0 %6123, %v3255_v32   ;;  %v6282_v18 = vld [vmem:[%s8962_s10 + $0x90] ss:$8 sps:$4 sm:$0xff]  }
 0x62b   :  { %v6284_v32 = vld [vmem:[%s8952_s0 + $0x290] sm:$0xff]  }
 0x62e   :  { %3328 = vperm.xlu1 %6124, %v3258_v41   ;;  %3323 = vperm.xlu0 %6123, %v3257_v22   ;;  %v6285_v41 = vld [vmem:[%s8952_s0 + $0x2d8] sm:$0xff]  }
 0x62f   :  { %v6286_v22 = vld [vmem:[%s8952_s0 + $0x298] sm:$0xff]  }
 0x632   :  { %3333 = vperm.xlu0 %6123, %v3259_v2   ;;  %v6289_v2 = vld [vmem:[%s8962_s10 + $0xa0] ss:$8 sps:$4 sm:$0xff]  }
 0x636   :  { %3338 = vperm.xlu0 %6123, %v3260_v55   ;;  %v6291_v55 = vld [vmem:[%s8952_s0 + $0x2a0] sm:$0xff]  }
 0x650   :  { %v1910_v57 = vpop.permute.xlu0 %1909  ;;  %v1912_v0 = vpop.permute.xlu1 %1911 }
 0x651   :  { %1959 = vmatpush1.bf16.msra.mxu1 %v1910_v57  ;;  %v6294_v57 = vld [vmem:[%s8962_s10 + $0xb4] ss:$8 sps:$4 sm:$0xff]  }
 0x652   :  { %1960 = vmatprep.subr.bf16.mxu1 %v6381_v1 }
 0x654   :  { %v1914_v60 = vpop.permute.xlu0 %1913  ;;  %v1916_v63 = vpop.permute.xlu1 %1915 }
 0x655   :  { %1961 = vmatpush1.bf16.msra.mxu1 %v1912_v0  ;;  %v6292_v0 = vld [vmem:[%s8952_s0 + $0x2e8] sm:$0xff]  }
 0x656   :  { %1962 = vmatprep.subr.bf16.mxu1 %v6381_v1 }
 0x658   :  { %v1918_v43 = vpop.permute.xlu0 %1917  ;;  %v1920_v44 = vpop.permute.xlu1 %1919 }
 0x659   :  { %1963 = vmatpush1.bf16.msra.mxu1 %v1914_v60  ;;  %v6293_v60 = vld [vmem:[%s8952_s0 + $0x2a8] sm:$0xff]  }
 0x65a   :  { %1964 = vmatprep.subr.bf16.mxu1 %v6381_v1 }
 0x65c   :  { %v1922_v39 = vpop.permute.xlu0 %1921  ;;  %v1924_v51 = vpop.permute.xlu1 %1923 }
 0x65d   :  { %1965 = vmatpush1.bf16.msra.mxu1 %v1916_v63  ;;  %v6297_v63 = vld [vmem:[%s8952_s0 + $0x2f0] sm:$0xff]  }
 0x65e   :  { %1966 = vmatprep.subr.bf16.mxu1 %v6381_v1 }
 0x661   :  { %1967 = vmatpush1.bf16.msra.mxu1 %v1918_v43  ;;  %v6296_v43 = vld [vmem:[%s8962_s10 + $0xb0] ss:$8 sps:$4 sm:$0xff]  }
 0x662   :  { %1968 = vmatprep.subr.bf16.mxu1 %v6381_v1 }
 0x665   :  { %1969 = vmatpush1.bf16.msra.mxu1 %v1920_v44  ;;  %v6298_v44 = vld [vmem:[%s8952_s0 + $0x2b0] sm:$0xff]  }
 0x666   :  { %1970 = vmatprep.subr.bf16.mxu1 %v6381_v1 }
 0x669   :  { %1971 = vmatpush1.bf16.msra.mxu1 %v1922_v39  ;;  %v6299_v39 = vld [vmem:[%s8952_s0 + $0x2f8] sm:$0xff]  }
 0x66a   :  { %1972 = vmatprep.subr.bf16.mxu1 %v6381_v1 }
 0x66d   :  { %1973 = vmatpush1.bf16.msra.mxu1 %v1924_v51  ;;  %v6300_v51 = vld [vmem:[%s8952_s0 + $0x2b8] sm:$0xff]  }
 0x66e   :  { %2063 = vmatprep.subr.bf16.mxu1 %v6381_v1 }
 0x670   :  { %1983 = vmatmul.mubr.bf16.vlgmr.msra.gmra.mrb[8].mxu1 %v6249_v52  ;;  %v6301_v52 = vld [vmem:[%s8952_s0 + $0x3c0] sm:$0xff]  }
 0x671   :  { %2064 = vmatpush1.bf16.msra.mxu1 %v7432_v42  ;;  %5186 = vmatprep.mubr.msk.bf16.mxu1 %vm1937_vm2, %v6252_v56  ;;  %v6257_v42 = vld [vmem:[%s8962_s10 + $0x60] ss:$8 sps:$4 sm:$0xff]  }
 0x672   :  { %2065 = vmatprep.subr.bf16.mxu1 %v6381_v1  ;;  %v6302_v56 = vld [vmem:[%s8952_s0 + $0x380] sm:$0xff]  }
 0x675   :  { %2066 = vmatpush1.bf16.msra.mxu1 %v7430_v34  ;;  %v6258_v34 = vld [vmem:[%s8962_s10 + $0x74] ss:$8 sps:$4 sm:$0xff]  }
 0x676   :  { %2067 = vmatprep.subr.bf16.mxu1 %v6381_v1 }
 0x678   :  { %1991 = vmatmul.mubr.bf16.gmra.mrb[12].mxu1 %v6254_v26  ;;  %v6303_v26 = vld [vmem:[%s8952_s0 + $0x3c8] sm:$0xff]  }
 0x679   :  { %2068 = vmatpush1.bf16.msra.mxu1 %v7440_v27  ;;  %5187 = vmatprep.mubr.msk.bf16.mxu1 %vm1937_vm2, %v6255_v8  ;;  %v6260_v27 = vld [vmem:[%s8962_s10 + $0x70] ss:$8 sps:$4 sm:$0xff]   ;;  %v6304_v8 = vld [vmem:[%s8952_s0 + $0x388] sm:$0xff]  }
 0x67a   :  { %2069 = vmatprep.subr.bf16.mxu1 %v6381_v1 }
 0x67d   :  { %2070 = vmatpush1.bf16.msra.mxu1 %v7438_v23  ;;  %v6263_v23 = vld [vmem:[%s8962_s10 + $0x4] ss:$8 sps:$4 sm:$0xff]  }
 0x67e   :  { %2071 = vmatprep.subr.bf16.mxu1 %v6381_v1 }
 0x680   :  { %1999 = vmatmul.mubr.bf16.gmra.mrb[16].mxu1 %v6257_v42  ;;  %v6305_v42 = vld [vmem:[%s8952_s0 + $0x3d0] sm:$0xff]  }
 0x681   :  { %2072 = vmatpush1.bf16.msra.mxu1 %v7464_v33  ;;  %5188 = vmatprep.mubr.msk.bf16.mxu1 %vm1937_vm2, %v6258_v34  ;;  %v6264_v33 = vld [vmem:[%s8962_s10 + $0x14] ss:$8 sps:$4 sm:$0xff]  }
 0x682   :  { %2073 = vmatprep.subr.bf16.mxu1 %v6381_v1  ;;  %v6306_v34 = vld [vmem:[%s8952_s0 + $0x390] sm:$0xff]  }
 0x685   :  { %2074 = vmatpush1.bf16.msra.mxu1 %v7462_v31  ;;  %v6261_v31 = vld [vmem:[%s8962_s10] ss:$8 sps:$4 sm:$0xff]  }
 0x686   :  { %2075 = vmatprep.subr.bf16.mxu1 %v6381_v1 }
 0x688   :  { %2007 = vmatmul.mubr.bf16.gmra.mrb[20].mxu1 %v6260_v27  ;;  %v6307_v27 = vld [vmem:[%s8952_s0 + $0x3d8] sm:$0xff]  }
 0x689   :  { %2076 = vmatpush1.bf16.msra.mxu1 %v7472_v37  ;;  %5197 = vmatprep.mubr.msk.bf16.mxu1 %vm1937_vm2, %v6263_v23  ;;  %v2176_v37 = vpop.permute.xlu1 %2175  ;;  %v6308_v23 = vld [vmem:[%s8952_s0 + $0x398] sm:$0xff]  }
 0x68a   :  { %2077 = vmatprep.subr.bf16.mxu1 %v6381_v1 }
 0x68d   :  { %2078 = vmatpush1.bf16.msra.mxu1 %v7470_v36  ;;  %v2174_v36 = vpop.permute.xlu0 %2173 }
 0x68e   :  { %2079 = vmatprep.subr.bf16.mxu1 %v6381_v1 }
 0x691   :  { %2080 = vmatpush1.bf16.msra.mxu1 %v7480_v30  ;;  %v6267_v30 = vld [vmem:[%s8962_s10 + $0x24] ss:$8 sps:$4 sm:$0xff]  }
 0x692   :  { %2081 = vmatprep.subr.bf16.mxu1 %v6381_v1 }
 0x695   :  { %2082 = vmatpush1.bf16.msra.mxu1 %v7478_v38  ;;  %v6266_v38 = vld [vmem:[%s8962_s10 + $0x10] ss:$8 sps:$4 sm:$0xff]  }
 0x696   :  { %2083 = vmatprep.subr.bf16.mxu1 %v6381_v1 }
 0x699   :  { %2084 = vmatpush1.bf16.msra.mxu1 %v7488_v40  ;;  %v2180_v40 = vpop.permute.xlu1 %2179 }
 0x69a   :  { %2085 = vmatprep.subr.bf16.mxu1 %v6381_v1 }
 0x69d   :  { %2086 = vmatpush1.bf16.msra.mxu1 %v7486_v28  ;;  %v2178_v28 = vpop.permute.xlu0 %2177  ;;  %v2184_v12 = vpop.permute.xlu1 %2183 }
 0x69e   :  { %2221 = vmatprep.subr.bf16.mxu1 %v6381_v1 }
 0x6a0   :  { %2096 = vmatmul.mubr.bf16.vlgmr.msra.gmra.mrb[24].mxu1 %v6261_v31  ;;  %v6309_v31 = vld [vmem:[%s8952_s0 + $0x3e0] sm:$0xff]  }
 0x6a1   :  { %2222 = vmatpush1.bf16.msra.mxu1 %v2174_v36  ;;  %5198 = vmatprep.mubr.msk.bf16.mxu1 %vm1937_vm2, %v6264_v33  ;;  %v2182_v49 = vpop.permute.xlu0 %2181  ;;  %v2188_v3 = vpop.permute.xlu1 %2187  ;;  %v6310_v33 = vld [vmem:[%s8952_s0 + $0x3a0] sm:$0xff]   ;;  %v6311_v36 = vld [vmem:[%s8952_s0 + $0x3e8] sm:$0xff]  }
 0x6a2   :  { %2223 = vmatprep.subr.bf16.mxu1 %v6381_v1 }
 0x6a5   :  { %2224 = vmatpush1.bf16.msra.mxu1 %v2176_v37  ;;  %v2186_v62 = vpop.permute.xlu0 %2185  ;;  %v2192_v25 = vpop.permute.xlu1 %2191  ;;  %v6313_v37 = vld [vmem:[%s8952_s0 + $0x3f0] sm:$0xff]  }
 0x6a6   :  { %2225 = vmatprep.subr.bf16.mxu1 %v6381_v1 }
 0x6a8   :  { %2104 = vmatmul.mubr.bf16.gmra.mrb[28].mxu1 %v6266_v38  ;;  %v6314_v38 = vld [vmem:[%s8952_s0 + $0x3b0] sm:$0xff]  }
 0x6a9   :  { %2226 = vmatpush1.bf16.msra.mxu1 %v2178_v28  ;;  %5199 = vmatprep.mubr.msk.bf16.mxu1 %vm1937_vm2, %v6267_v30  ;;  %v2190_v5 = vpop.permute.xlu0 %2189  ;;  %v2196_v11 = vpop.permute.xlu1 %2195  ;;  %v6315_v30 = vld [vmem:[%s8952_s0 + $0x3f8] sm:$0xff]  }
 0x6aa   :  { %2227 = vmatprep.subr.bf16.mxu1 %v6381_v1  ;;  %v6316_v28 = vld [vmem:[%s8952_s0 + $0x3b8] sm:$0xff]  }
 0x6ad   :  { %2228 = vmatpush1.bf16.msra.mxu1 %v2180_v40  ;;  %v2194_v9 = vpop.permute.xlu0 %2193 }
 0x6ae   :  { %2229 = vmatprep.subr.bf16.mxu1 %v6381_v1 }
 0x6b0   :  { %2112 = vmatmul.mubr.bf16.gmra.mrb[32].mxu1 %v6269_v59 }
 0x6b1   :  { %2230 = vmatpush1.bf16.msra.mxu1 %v2182_v49  ;;  %5200 = vmatprep.mubr.msk.bf16.mxu1 %vm1937_vm2, %v6270_v45 }
 0x6b2   :  { %2231 = vmatprep.subr.bf16.mxu1 %v6381_v1 }
 0x6b5   :  { %2232 = vmatpush1.bf16.msra.mxu1 %v2184_v12 }
 0x6b6   :  { %2233 = vmatprep.subr.bf16.mxu1 %v6381_v1 }
 0x6b8   :  { %2120 = vmatmul.mubr.bf16.gmra.mrb[36].mxu1 %v6272_v4 }
 0x6b9   :  { %2234 = vmatpush1.bf16.msra.mxu1 %v2186_v62  ;;  %5217 = vmatprep.mubr.msk.bf16.mxu1 %vm1937_vm2, %v6275_v24 }
 0x6ba   :  { %2235 = vmatprep.subr.bf16.mxu1 %v6381_v1 }
 0x6bd   :  { %2236 = vmatpush1.bf16.msra.mxu1 %v2188_v3 }
 0x6be   :  { %2237 = vmatprep.subr.bf16.mxu1 %v6381_v1 }
 0x6c1   :  { %2238 = vmatpush1.bf16.msra.mxu1 %v2190_v5 }
 0x6c2   :  { %2239 = vmatprep.subr.bf16.mxu1 %v6381_v1 }
 0x6c5   :  { %2240 = vmatpush1.bf16.msra.mxu1 %v2192_v25 }
 0x6c6   :  { %2241 = vmatprep.subr.bf16.mxu1 %v6381_v1 }
 0x6c9   :  { %2242 = vmatpush1.bf16.msra.mxu1 %v2194_v9 }
 0x6ca   :  { %2243 = vmatprep.subr.bf16.mxu1 %v6381_v1 }
 0x6cd   :  { %2244 = vmatpush1.bf16.msra.mxu1 %v2196_v11 }
 0x6ce   :  { %5708 = vmatprep.subr.bf16.mxu1 %v6276_v10 }
 0x6d0   :  { %2254 = vmatmul.mubr.bf16.vlgmr.msra.gmra.mrb[40].mxu1 %v6273_v46 }
 0x6d1   :  { %5709 = vmatpush3.bf16.msra.mxu1 %v6277_v13  ;;  %5218 = vmatprep.mubr.msk.bf16.mxu1 %vm1937_vm2, %v6280_v14 }
 0x6d2   :  { %5710 = vmatprep.subr.bf16.mxu1 %v6278_v48 }
 0x6d5   :  { %5711 = vmatpush3.bf16.msra.mxu1 %v6279_v16 }
 0x6d6   :  { %5712 = vmatprep.subr.bf16.mxu1 %v6283_v17 }
 0x6d8   :  { %2262 = vmatmul.mubr.bf16.gmra.mrb[44].mxu1 %v6282_v18 }
 0x6d9   :  { %5713 = vmatpush3.bf16.msra.mxu1 %v6284_v32  ;;  %5219 = vmatprep.mubr.msk.bf16.mxu1 %vm1937_vm2, %v6287_v21 }
 0x6da   :  { %5714 = vmatprep.subr.bf16.mxu1 %v6285_v41 }
 0x6dd   :  { %5715 = vmatpush3.bf16.msra.mxu1 %v6286_v22 }
 0x6de   :  { %5716 = vmatprep.subr.bf16.mxu1 %v6290_v35 }
 0x6e0   :  { %2270 = vmatmul.mubr.bf16.gmra.mrb[48].mxu1 %v6289_v2 }
 0x6e1   :  { %5717 = vmatpush3.bf16.msra.mxu1 %v6291_v55  ;;  %5220 = vmatprep.mubr.msk.bf16.mxu1 %vm1937_vm2, %v6294_v57 }
 0x6e2   :  { %5718 = vmatprep.subr.bf16.mxu1 %v6292_v0 }
 0x6e5   :  { %5719 = vmatpush3.bf16.msra.mxu1 %v6293_v60 }
 0x6e6   :  { %5720 = vmatprep.subr.bf16.mxu1 %v6297_v63 }
 0x6e8   :  { %2278 = vmatmul.mubr.bf16.gmra.mrb[52].mxu1 %v6296_v43 }
 0x6e9   :  { %5721 = vmatpush3.bf16.msra.mxu1 %v6298_v44  ;;  %2872 = vmatprep.mubr.bf16.mxu1 %v7262_v29 }
 0x6ea   :  { %5722 = vmatprep.subr.bf16.mxu1 %v6299_v39 }
 0x6ed   :  { %5723 = vmatpush3.bf16.msra.mxu1 %v6300_v51 }
 0x6ee   :  { %5764 = vmatprep.subr.bf16.mxu1 %v6301_v52 }
 0x6f0   :  { %2873 = vmatmul.mubr.bf16.vlgmr.msra.gmra.mrb[56].mxu1 %v7308_v20 }
 0x6f1   :  { %5765 = vmatpush3.bf16.msra.mxu1 %v6302_v56  ;;  %2880 = vmatprep.mubr.bf16.mxu1 %v7316_v7  ;;  %v2305_v56 = vpop.permute.xlu0 %2304 }
 0x6f2   :  { %5766 = vmatprep.subr.bf16.mxu1 %v6303_v26  ;;  %v2310_v26 = vpop.permute.xlu1 %2309 }
 0x6f5   :  { %5767 = vmatpush3.bf16.msra.mxu1 %v6304_v8 }
 0x6f6   :  { %5768 = vmatprep.subr.bf16.mxu1 %v6305_v42 }
 0x6f8   :  { %2881 = vmatmul.mubr.bf16.gmra.mrb[60].mxu1 %v7333_v47 }
 0x6f9   :  { %5769 = vmatpush3.bf16.msra.mxu1 %v6306_v34  ;;  %3228 = vmatprep.mubr.bf16.mxu1 %v7262_v29  ;;  %v6312_v29 = vld [vmem:[%s8952_s0 + $0x3a8] sm:$0xff]  }
 0x6fa   :  { %5770 = vmatprep.subr.bf16.mxu1 %v6307_v27 }
 0x6fd   :  { %5771 = vmatpush3.bf16.msra.mxu1 %v6308_v23  ;;  %v2315_v23 = vpop.permute.xlu0 %2314 }
 0x6fe   :  { %5772 = vmatprep.subr.bf16.mxu1 %v6309_v31 }
 0x701   :  { %5773 = vmatpush3.bf16.msra.mxu1 %v6310_v33 }
 0x702   :  { %5774 = vmatprep.subr.bf16.mxu1 %v6311_v36  ;;  %v2320_v36 = vpop.permute.xlu1 %2319 }
 0x705   :  { %5775 = vmatpush3.bf16.msra.mxu1 %v6312_v29 }
 0x706   :  { %5776 = vmatprep.subr.bf16.mxu1 %v6313_v37 }
 0x709   :  { %5777 = vmatpush3.bf16.msra.mxu1 %v6314_v38  ;;  %v7853_v38 = vld [vmem:[%s8964_s14] ss:$0 sm:$0xff] }
 0x70a   :  { %5778 = vmatprep.subr.bf16.mxu1 %v6315_v30 }
 0x70d   :  { %5779 = vmatpush3.bf16.msra.mxu1 %v6316_v28  ;;  %v2325_v28 = vpop.permute.xlu0 %2324 }
 0x70e   :  { %4402 = vmatprep.subr.bf16.mxu1 %v6381_v1 }
 0x710   :  { %3229 = vmatmul.mubr.bf16.vlgmr.msra.gmra.mrb[64].mxu1 %v7308_v20 }
 0x711   :  { %3236 = vmatprep.mubr.bf16.mxu1 %v7316_v7 }
 0x718   :  { %3237 = vmatmul.mubr.bf16.gmra.mrb[68].mxu1 %v7333_v47 }
 0x743   :  { %v1984_v40 = vpop.f32.mrb[8].mxu1 }
 0x744   :  { %v1986_v59 = vpop.f32.mrb[9].mxu1 }
 0x745   :  { %v1987_v45 = vpop.f32.mrb[10].mxu1 }
 0x746   :  { %v1989_v49 = vpop.f32.mrb[11].mxu1 }
 0x74b   :  { %v1992_v12 = vpop.f32.mrb[12].mxu1 }
 0x74c   :  { %v1994_v4 = vpop.f32.mrb[13].mxu1 }
 0x74d   :  { %v1995_v24 = vpop.f32.mrb[14].mxu1  ;;  %v2330_v4 = vpop.permute.xlu1 %2329 }
 0x74e   :  { %v1997_v62 = vpop.f32.mrb[15].mxu1 }
 0x753   :  { %v2000_v3 = vpop.f32.mrb[16].mxu1 }
 0x754   :  { %v2002_v5 = vpop.f32.mrb[17].mxu1 }
 0x755   :  { %v2003_v25 = vpop.f32.mrb[18].mxu1 }
 0x756   :  { %v2005_v9 = vpop.f32.mrb[19].mxu1 }
 0x75b   :  { %v2008_v10 = vpop.f32.mrb[20].mxu1 }
 0x75c   :  { %v2010_v11 = vpop.f32.mrb[21].mxu1 }
 0x75d   :  { %v2011_v46 = vpop.f32.mrb[22].mxu1  ;;  %v2335_v11 = vpop.permute.xlu0 %2334 }
 0x75e   :  { %v2013_v20 = vpop.f32.mrb[23].mxu1 }
 0x773   :  { %v2097_v13 = vpop.f32.mrb[24].mxu1 }
 0x774   :  { %v2098_v7 = vadd.f32 %v2097_v13, %v1984_v40  ;;  %v2099_v14 = vpop.f32.mrb[25].mxu1 }
 0x775   :  { %v2100_v47 = vpop.f32.mrb[26].mxu1  ;;  %v2340_v14 = vpop.permute.xlu1 %2339 }
 0x776   :  { %v2101_v48 = vadd.f32 %v2100_v47, %v1987_v45  ;;  %v2102_v16 = vpop.f32.mrb[27].mxu1 }
 0x77b   :  { %v2105_v17 = vpop.f32.mrb[28].mxu1 }
 0x77c   :  { %v2106_v18 = vadd.f32 %v2105_v17, %v1992_v12  ;;  %v2107_v32 = vpop.f32.mrb[29].mxu1 }
 0x77d   :  { %v2108_v21 = vpop.f32.mrb[30].mxu1 }
 0x77e   :  { %v2109_v41 = vadd.f32 %v2108_v21, %v1995_v24  ;;  %v2110_v22 = vpop.f32.mrb[31].mxu1 }
 0x783   :  { %v2113_v35 = vpop.f32.mrb[32].mxu1 }
 0x784   :  { %v2114_v2 = vadd.f32 %v2113_v35, %v2000_v3  ;;  %v2115_v55 = vpop.f32.mrb[33].mxu1 }
 0x785   :  { %v2116_v57 = vpop.f32.mrb[34].mxu1 }
 0x786   :  { %v2117_v0 = vadd.f32 %v2116_v57, %v2003_v25  ;;  %v2118_v60 = vpop.f32.mrb[35].mxu1 }
 0x78b   :  { %v2121_v63 = vpop.f32.mrb[36].mxu1 }
 0x78c   :  { %v7842_v43 = vadd.f32 %v2121_v63, %v2008_v10  ;;  %v2123_v44 = vpop.f32.mrb[37].mxu1 }
 0x78d   :  { %v2124_v39 = vpop.f32.mrb[38].mxu1 }
 0x78e   :  { %v7844_v51 = vadd.f32 %v2124_v39, %v2011_v46  ;;  %v2126_v52 = vpop.f32.mrb[39].mxu1  ;;  %v3264_v39 = vpop.permute.xlu0 %3263 }
 0x7a3   :  { %v2255_v8 = vpop.f32.mrb[40].mxu1 }
 0x7a4   :  { %v2286_v42 = vadd.f32 %v2255_v8, %v2098_v7  ;;  %v2257_v34 = vpop.f32.mrb[41].mxu1  ;;  %v3269_v8 = vpop.permute.xlu1 %3268 }
 0x7a5   :  { %v2258_v27 = vpop.f32.mrb[42].mxu1 }
 0x7a6   :  { %v2287_v31 = vadd.f32 %v2258_v27, %v2101_v48  ;;  %v2260_v33 = vpop.f32.mrb[43].mxu1  ;;  %v7848_v37 = vadd.f32 %v2305_v56, %v2286_v42 }
 0x7a8   :  { %v7846_v29 = vadd.f32 %v2310_v26, %v2287_v31  ;;  %v2373_v49 = vmul.f32 %v7853_v38, %v7848_v37 }
 0x7aa   :  { %v2374_v40 = vmul.f32 %v7853_v38, %v7846_v29  ;;  %v2406_v10 = vmul.f32 %v2373_v49, %v7848_v37  ;;  %v2382_v47 = vsel %vm2381_vm3, %v2373_v49, 0.0 }
 0x7ab   :  { %v2263_v30 = vpop.f32.mrb[44].mxu1 }
 0x7ac   :  { %v2288_v59 = vadd.f32 %v2263_v30, %v2106_v18  ;;  %v2265_v45 = vpop.f32.mrb[45].mxu1  ;;  %v2407_v5 = vmul.f32 %v2374_v40, %v7846_v29  ;;  %v2383_v46 = vsel %vm2381_vm3, %v2374_v40, 0.0  ;;  %v2414_v32 = vsel %vm2381_vm3, %v2406_v10, 0.0 }
 0x7ad   :  { %v2266_v12 = vpop.f32.mrb[46].mxu1  ;;  %v2384_v21 = vadd.f32 %v2383_v46, %v2382_v47  ;;  %v7893_v40 = vadd.f32 %v7558_v58, %v3269_v8 }
 0x7ae   :  { %v7859_v24 = vadd.f32 %v2315_v23, %v2288_v59  ;;  %v2289_v62 = vadd.f32 %v2266_v12, %v2109_v41  ;;  %v2268_v3 = vpop.f32.mrb[47].mxu1  ;;  %v2415_v48 = vsel %vm2381_vm3, %v2407_v5, 0.0  ;;  %v7896_v12 = vadd.f32 %v7550_v54, %v3264_v39 }
 0x7af   :  { %v2416_v63 = vadd.f32 %v2415_v48, %v2414_v32  ;;  %v3430_v54 = vmul.f32 %v7893_v40, %v7893_v40  ;;  %v3390_v47 = vsel %vm930_vm0, %v7893_v40, 0.0  ;;  %v3279_v48 = vpop.permute.xlu1 %3278 }
 0x7b0   :  { %v2375_v25 = vmul.f32 %v7853_v38, %v7859_v24  ;;  %v7864_v9 = vadd.f32 %v2320_v36, %v2289_v62 }
 0x7b2   :  { %v2408_v20 = vmul.f32 %v2375_v25, %v7859_v24  ;;  %v2376_v13 = vmul.f32 %v7853_v38, %v7864_v9  ;;  %v2385_v16 = vsel %vm2381_vm3, %v2375_v25, 0.0 }
 0x7b3   :  { %v2271_v7 = vpop.f32.mrb[48].mxu1  ;;  %v2386_v44 = vadd.f32 %v2385_v16, %v2384_v21 }
 0x7b4   :  { %v2290_v17 = vadd.f32 %v2271_v7, %v2114_v2  ;;  %v2273_v18 = vpop.f32.mrb[49].mxu1  ;;  %v2417_v22 = vsel %vm2381_vm3, %v2408_v20, 0.0  ;;  %v2409_v35 = vmul.f32 %v2376_v13, %v7864_v9  ;;  %v2387_v52 = vsel %vm2381_vm3, %v2376_v13, 0.0 }
 0x7b5   :  { %v2274_v41 = vpop.f32.mrb[50].mxu1  ;;  %v2418_v26 = vadd.f32 %v2417_v22, %v2416_v63  ;;  %v2388_v23 = vadd.f32 %v2387_v52, %v2386_v44  ;;  %v3446_v44 = vsel %vm930_vm0, %v3430_v54, 0.0  ;;  %v7930_v52 = vadd.f32 %v7574_v6, %v3279_v48 }
 0x7b6   :  { %v7877_v55 = vadd.f32 %v2325_v28, %v2290_v17  ;;  %v2291_v57 = vadd.f32 %v2274_v41, %v2117_v0  ;;  %v2276_v60 = vpop.f32.mrb[51].mxu1  ;;  %v2419_v42 = vsel %vm2381_vm3, %v2409_v35, 0.0 }
 0x7b7   :  { %v2420_v59 = vadd.f32 %v2419_v42, %v2418_v26  ;;  %v3432_v6 = vmul.f32 %v7930_v52, %v7930_v52 }
 0x7b8   :  { %v2377_v2 = vmul.f32 %v7853_v38, %v7877_v55  ;;  %v7882_v56 = vadd.f32 %v2330_v4, %v2291_v57  ;;  %v3274_v4 = vpop.permute.xlu0 %3273 }
 0x7b9   :  { %v7910_v20 = vadd.f32 %v7560_v53, %v3274_v4  ;;  %v3389_v53 = vsel %vm930_vm0, %v7896_v12, 0.0 }
 0x7ba   :  { %v2389_v34 = vsel %vm2381_vm3, %v2377_v2, 0.0  ;;  %v2410_v27 = vmul.f32 %v2377_v2, %v7877_v55  ;;  %v2378_v0 = vmul.f32 %v7853_v38, %v7882_v56 }
 0x7bb   :  { %v2279_v31 = vpop.f32.mrb[52].mxu1  ;;  %v2390_v49 = vadd.f32 %v2389_v34, %v2388_v23  ;;  %v3392_v42 = vsel %vm930_vm0, %v7910_v20, 0.0  ;;  %v3391_v23 = vadd.f32 %v3390_v47, %v3389_v53 }
 0x7bc   :  { %v2421_v33 = vsel %vm2381_vm3, %v2410_v27, 0.0  ;;  %v2411_v36 = vmul.f32 %v2378_v0, %v7882_v56  ;;  %v2292_v30 = vadd.f32 %v2279_v31, %v7842_v43  ;;  %v2281_v28 = vpop.f32.mrb[53].mxu1  ;;  %v2391_v25 = vsel %vm2381_vm3, %v2378_v0, 0.0  ;;  %v3284_v2 = vpop.permute.xlu0 %3283 }
 0x7bd   :  { %v2282_v45 = vpop.f32.mrb[54].mxu1  ;;  %v2422_v10 = vadd.f32 %v2421_v33, %v2420_v59 }
 0x7be   :  { %v7898_v62 = vadd.f32 %v2335_v11, %v2292_v30  ;;  %v2293_v3 = vadd.f32 %v2282_v45, %v7844_v51  ;;  %v2284_v5 = vpop.f32.mrb[55].mxu1  ;;  %v2423_v46 = vsel %vm2381_vm3, %v2411_v36, 0.0  ;;  %v2392_v11 = vadd.f32 %v2391_v25, %v2390_v49  ;;  %v3289_v30 = vpop.permute.xlu1 %3288 }
 0x7bf   :  { %v3429_v51 = vmul.f32 %v7896_v12, %v7896_v12  ;;  %v2424_v18 = vadd.f32 %v2423_v46, %v2422_v10  ;;  %v3393_v36 = vadd.f32 %v3392_v42, %v3391_v23 }
 0x7c0   :  { %v2379_v43 = vmul.f32 %v7853_v38, %v7898_v62  ;;  %v7904_v58 = vadd.f32 %v2340_v14, %v2293_v3  ;;  %v3394_v3 = vsel %vm930_vm0, %v7930_v52, 0.0  ;;  %v3294_v54 = vpop.permute.xlu0 %3293 }
 0x7c1   :  { %v3445_v39 = vsel %vm930_vm0, %v3429_v51, 0.0  ;;  %v3395_v46 = vadd.f32 %v3394_v3, %v3393_v36 }
 0x7c2   :  { %v2412_v13 = vmul.f32 %v2379_v43, %v7898_v62  ;;  %v2380_v7 = vmul.f32 %v7853_v38, %v7904_v58  ;;  %v2393_v14 = vsel %vm2381_vm3, %v2379_v43, 0.0  ;;  %v3431_v38 = vmul.f32 %v7910_v20, %v7910_v20  ;;  %v3299_v48 = vpop.permute.xlu1 %3298 }
 0x7c3   :  { %v5724_v16 = vpop.f32.mrb[56].mxu1  ;;  %v2394_v17 = vadd.f32 %v2393_v14, %v2392_v11  ;;  %v3447_v33 = vadd.f32 %v3446_v44, %v3445_v39  ;;  %v3450_v43 = vsel %vm930_vm0, %v3432_v6, 0.0 }
 0x7c4   :  { %v5725_v32 = vpop.f32.mrb[57].mxu1  ;;  %v2395_v21 = vsel %vm2381_vm3, %v2380_v7, 0.0  ;;  %v2413_v41 = vmul.f32 %v2380_v7, %v7904_v58  ;;  %v2425_v22 = vsel %vm2381_vm3, %v2412_v13, 0.0  ;;  %v3448_v31 = vsel %vm930_vm0, %v3431_v38, 0.0 }
 0x7c5   :  { %v5726_v35 = vadd.f32 %v5725_v32, %v5724_v16  ;;  %v5727_v57 = vpop.f32.mrb[58].mxu1  ;;  %v2396_v60 = vadd.f32 %v2395_v21, %v2394_v17  ;;  %v2426_v63 = vadd.f32 %v2425_v22, %v2424_v18  ;;  %v3449_v49 = vadd.f32 %v3448_v31, %v3447_v33  ;;  %v3304_v22 = vpop.permute.xlu0 %3303 }
 0x7c6   :  { %v5728_v26 = vpop.f32.mrb[59].mxu1  ;;  %v2427_v8 = vsel %vm2381_vm3, %v2413_v41, 0.0  ;;  %v7967_v44 = vadd.f32 %v7588_v19, %v3304_v22 }
 0x7c7   :  { %v7935_v34 = vadd.f32 %v5726_v35, %v3284_v2  ;;  %v5729_v27 = vadd.f32 %v5728_v26, %v5727_v57  ;;  %2397 = vadd.xlane.f32.xlu1 %v2396_v60  ;;  %v2428_v0 = vadd.f32 %v2427_v8, %v2426_v63  ;;  %v3451_v47 = vadd.f32 %v3450_v43, %v3449_v49  ;;  %v3309_v2 = vpop.permute.xlu1 %3308 }
 0x7c8   :  { %v3404_v19 = vsel %vm930_vm0, %v7967_v44, 0.0 }
 0x7c9   :  { %2429 = vadd.xlane.f32.xlu0 %v2428_v0  ;;  %v3433_v28 = vmul.f32 %v7935_v34, %v7935_v34  ;;  %v7942_v59 = vadd.f32 %v5729_v27, %v3289_v30  ;;  %v3396_v5 = vsel %vm930_vm0, %v7935_v34, 0.0  ;;  %v7973_v27 = vadd.f32 %v7590_v15, %v3309_v2  ;;  %v3314_v23 = vpop.permute.xlu0 %3313 }
 0x7ca   :  { %v3397_v16 = vadd.f32 %v3396_v5, %v3395_v46  ;;  %v3437_v0 = vmul.f32 %v7967_v44, %v7967_v44  ;;  %v7983_v30 = vadd.f32 %v7598_v50, %v3314_v23 }
 0x7cb   :  { %v5730_v45 = vpop.f32.mrb[60].mxu1  ;;  %v3452_v51 = vsel %vm930_vm0, %v3433_v28, 0.0  ;;  %v3434_v13 = vmul.f32 %v7942_v59, %v7942_v59  ;;  %v3398_v17 = vsel %vm930_vm0, %v7942_v59, 0.0  ;;  %v3438_v6 = vmul.f32 %v7973_v27, %v7973_v27  ;;  %v3319_v28 = vpop.permute.xlu1 %3318 }
 0x7cc   :  { %v5731_v4 = vpop.f32.mrb[61].mxu1  ;;  %v3453_v32 = vadd.f32 %v3452_v51, %v3451_v47  ;;  %v3399_v38 = vadd.f32 %v3398_v17, %v3397_v16  ;;  %v3460_v36 = vsel %vm930_vm0, %v3437_v0, 0.0  ;;  %v7989_v3 = vadd.f32 %v7606_v61, %v3319_v28 }
 0x7cd   :  { %v5732_v25 = vadd.f32 %v5731_v4, %v5730_v45  ;;  %v5733_v10 = vpop.f32.mrb[62].mxu1  ;;  %v3454_v21 = vsel %vm930_vm0, %v3434_v13, 0.0  ;;  %v3406_v45 = vsel %vm930_vm0, %v7973_v27, 0.0  ;;  %v3462_v4 = vsel %vm930_vm0, %v3438_v6, 0.0 }
 0x7ce   :  { %v5734_v11 = vpop.f32.mrb[63].mxu1  ;;  %v3455_v60 = vadd.f32 %v3454_v21, %v3453_v32  ;;  %v3439_v5 = vmul.f32 %v7983_v30, %v7983_v30  ;;  %v3408_v50 = vsel %vm930_vm0, %v7983_v30, 0.0 }
 0x7cf   :  { %v7952_v7 = vadd.f32 %v5732_v25, %v3294_v54  ;;  %v5735_v14 = vadd.f32 %v5734_v11, %v5733_v10  ;;  %v3324_v10 = vpop.permute.xlu0 %3323  ;;  %v3329_v16 = vpop.permute.xlu1 %3328 }
 0x7d0   :  { %v3464_v61 = vsel %vm930_vm0, %v3439_v5, 0.0 }
 0x7d1   :  { %v3435_v18 = vmul.f32 %v7952_v7, %v7952_v7  ;;  %v7958_v53 = vadd.f32 %v5735_v14, %v3299_v48  ;;  %v3400_v41 = vsel %vm930_vm0, %v7952_v7, 0.0  ;;  %v3440_v14 = vmul.f32 %v7989_v3, %v7989_v3 }
 0x7d2   :  { %v3401_v63 = vadd.f32 %v3400_v41, %v3399_v38 }
 0x7d3   :  { %v3456_v35 = vsel %vm930_vm0, %v3435_v18, 0.0  ;;  %v3436_v57 = vmul.f32 %v7958_v53, %v7958_v53  ;;  %v3402_v39 = vsel %vm930_vm0, %v7958_v53, 0.0  ;;  %v3410_v18 = vsel %vm930_vm0, %v7989_v3, 0.0  ;;  %v3334_v22 = vpop.permute.xlu0 %3333 }
 0x7d4   :  { %v3457_v26 = vadd.f32 %v3456_v35, %v3455_v60  ;;  %v3403_v42 = vadd.f32 %v3402_v39, %v3401_v63  ;;  %v3466_v35 = vsel %vm930_vm0, %v3440_v14, 0.0 }
 0x7d5   :  { %v3458_v8 = vsel %vm930_vm0, %v3436_v57, 0.0 }
 0x7d6   :  { %v3459_v31 = vadd.f32 %v3458_v8, %v3457_v26  ;;  %v3405_v33 = vadd.f32 %v3404_v19, %v3403_v42 }
 0x7d8   :  { %v3461_v15 = vadd.f32 %v3460_v36, %v3459_v31  ;;  %v3407_v49 = vadd.f32 %v3406_v45, %v3405_v33  ;;  %v3339_v36 = vpop.permute.xlu0 %3338 }
 0x7da   :  { %v3463_v43 = vadd.f32 %v3462_v4, %v3461_v15  ;;  %v3409_v51 = vadd.f32 %v3408_v50, %v3407_v49 }
 0x7dc   :  { %v3465_v17 = vadd.f32 %v3464_v61, %v3463_v43  ;;  %v3411_v38 = vadd.f32 %v3410_v18, %v3409_v51 }
 0x7de   :  { %v3467_v26 = vadd.f32 %v3466_v35, %v3465_v17 }
 0x7e3   :  { %v5780_v25 = vpop.f32.mrb[64].mxu1 }
 0x7e4   :  { %v5781_v46 = vpop.f32.mrb[65].mxu1 }
 0x7e5   :  { %v5782_v54 = vadd.f32 %v5781_v46, %v5780_v25  ;;  %v5783_v11 = vpop.f32.mrb[66].mxu1 }
 0x7e6   :  { %v5784_v13 = vpop.f32.mrb[67].mxu1 }
 0x7e7   :  { %v7998_v47 = vadd.f32 %v5782_v54, %v3324_v10  ;;  %v5785_v48 = vadd.f32 %v5784_v13, %v5783_v11 }
 0x7e9   :  { %v3412_v32 = vsel %vm930_vm0, %v7998_v47, 0.0  ;;  %v3441_v21 = vmul.f32 %v7998_v47, %v7998_v47  ;;  %v8006_v41 = vadd.f32 %v5785_v48, %v3329_v16 }
 0x7ea   :  { %v3413_v39 = vadd.f32 %v3412_v32, %v3411_v38 }
 0x7eb   :  { %v3468_v57 = vsel %vm930_vm0, %v3441_v21, 0.0  ;;  %v3442_v60 = vmul.f32 %v8006_v41, %v8006_v41  ;;  %v5786_v63 = vpop.f32.mrb[68].mxu1  ;;  %v3414_v8 = vsel %vm930_vm0, %v8006_v41, 0.0 }
 0x7ec   :  { %v5787_v2 = vpop.f32.mrb[69].mxu1  ;;  %v3469_v31 = vadd.f32 %v3468_v57, %v3467_v26  ;;  %v3415_v28 = vadd.f32 %v3414_v8, %v3413_v39 }
 0x7ed   :  { %v5788_v42 = vadd.f32 %v5787_v2, %v5786_v63  ;;  %v5789_v0 = vpop.f32.mrb[70].mxu1  ;;  %v3470_v6 = vsel %vm930_vm0, %v3442_v60, 0.0 }
 0x7ee   :  { %v5790_v23 = vpop.f32.mrb[71].mxu1  ;;  %v3471_v5 = vadd.f32 %v3470_v6, %v3469_v31 }
 0x7ef   :  { %v8014_v19 = vadd.f32 %v5788_v42, %v3334_v22  ;;  %v5791_v33 = vadd.f32 %v5790_v23, %v5789_v0 }
 0x7f1   :  { %v3443_v15 = vmul.f32 %v8014_v19, %v8014_v19  ;;  %v8019_v45 = vadd.f32 %v5791_v33, %v3339_v36  ;;  %v3416_v49 = vsel %vm930_vm0, %v8014_v19, 0.0 }
 0x7f2   :  { %v3417_v4 = vadd.f32 %v3416_v49, %v3415_v28 }
 0x7f3   :  { %v3418_v25 = vsel %vm930_vm0, %v8019_v45, 0.0  ;;  %v3444_v10 = vmul.f32 %v8019_v45, %v8019_v45  ;;  %v3472_v43 = vsel %vm930_vm0, %v3443_v15, 0.0 }
 0x7f4   :  { %v3419_v46 = vadd.f32 %v3418_v25, %v3417_v4  ;;  %v3473_v50 = vadd.f32 %v3472_v43, %v3471_v5  ;;  %v2350_v5 = vld [vmem:[%s8965_s12] sm:$0xff]  ;;  %v2352_v43 = vld [vmem:[%s8965_s12 + $0x10] sm:$0xff] }
 0x7f5   :  { %v3474_v54 = vsel %vm930_vm0, %v3444_v10, 0.0  ;;  %v2351_v10 = vld [vmem:[%s8965_s12 + $0x8] sm:$0xff] }
 0x7f6   :  { %3420 = vadd.xlane.f32.xlu1 %v3419_v46  ;;  %v3475_v11 = vadd.f32 %v3474_v54, %v3473_v50  ;;  %v2353_v46 = vld [vmem:[%s8965_s12 + $0x18] sm:$0xff] }
 0x7f8   :  { %3476 = vadd.xlane.f32.xlu0 %v3475_v11 }
 0x854   :  { %v2398_v51 = vpop.xlane.xlu1 %2397 }
 0x855   :  { %v2399_v13 = vrot.slane %v2398_v51, 4 }
 0x856   :  { %v2430_v14 = vpop.xlane.xlu0 %2429 }
 0x857   :  { %v2400_v61 = vadd.f32 %v2399_v13, %v2398_v51  ;;  %v2431_v48 = vrot.slane %v2430_v14, 4  ;;  %v2354_v51 = vld [vmem:[%s8965_s12 + $0x20] sm:$0xff]  ;;  %v2355_v13 = vld [vmem:[%s8965_s12 + $0x28] sm:$0xff] }
 0x859   :  { %v2401_v16 = vrot.slane %v2400_v61, 2  ;;  %v2432_v17 = vadd.f32 %v2431_v48, %v2430_v14  ;;  %v2356_v14 = vld [vmem:[%s8965_s12 + $0x30] sm:$0xff]  ;;  %v2358_v48 = vld [vmem:[%s8966_s13] sm:$0xff] }
 0x85b   :  { %v2433_v18 = vrot.slane %v2432_v17, 2  ;;  %v2402_v32 = vadd.f32 %v2401_v16, %v2400_v61  ;;  %v2359_v16 = vld [vmem:[%s8966_s13 + $0x8] sm:$0xff] }
 0x85d   :  { %v2403_v21 = vrot.slane %v2402_v32, 1  ;;  %v2434_v22 = vadd.f32 %v2433_v18, %v2432_v17 }
 0x85f   :  { %v2404_v38 = vadd.f32 %v2403_v21, %v2402_v32  ;;  %v2435_v35 = vrot.slane %v2434_v22, 1  ;;  %v2361_v32 = vld [vmem:[%s8966_s13 + $0x18] sm:$0xff]  ;;  %v2362_v21 = vld [vmem:[%s8966_s13 + $0x20] sm:$0xff] }
 0x861   :  { %6092 = vpush %v2404_v38  ;;  %v2436_v57 = vadd.f32 %v2435_v35, %v2434_v22 }
 0x863   :  { %6094 = vpush %v2436_v57 }
 0x883   :  { %v3421_v60 = vpop.xlane.xlu1 %3420 }
 0x884   :  { %v3422_v39 = vrot.slane %v3421_v60, 4 }
 0x885   :  { %v3477_v63 = vpop.xlane.xlu0 %3476 }
 0x886   :  { %v3478_v2 = vrot.slane %v3477_v63, 4  ;;  %v3423_v26 = vadd.f32 %v3422_v39, %v3421_v60  ;;  %v2363_v60 = vld [vmem:[%s8966_s13 + $0x28] sm:$0xff]  ;;  %v2365_v39 = vld [vmem:[%s8966_s13 + $0x38] sm:$0xff] }
 0x888   :  { %v3479_v8 = vadd.f32 %v3478_v2, %v3477_v63  ;;  %v3424_v42 = vrot.slane %v3423_v26, 2  ;;  %v2364_v63 = vld [vmem:[%s8966_s13 + $0x30] sm:$0xff] }
 0x88a   :  { %v3480_v0 = vrot.slane %v3479_v8, 2  ;;  %v3425_v31 = vadd.f32 %v3424_v42, %v3423_v26 }
 0x88c   :  { %v3481_v33 = vadd.f32 %v3480_v0, %v3479_v8  ;;  %v3426_v6 = vrot.slane %v3425_v31, 1 }
 0x88e   :  { %v3482_v36 = vrot.slane %v3481_v33, 1  ;;  %v3427_v15 = vadd.f32 %v3426_v6, %v3425_v31 }
 0x890   :  { %v3483_v49 = vadd.f32 %v3482_v36, %v3481_v33 }
 0x892   :  { %s6093_s29 = spop %6092 }
 0x893   :  { %s2440_s24 = smul.f32 0.00031887754, %s6093_s29 }
 0x894   :  { %s6095_s26 = spop %6094 }
 0x895   :  { %s2444_s19 = smul.f32 %s2440_s24, %s2440_s24  ;;  %v2451_v4 = vstv %s2440_s24 }
 0x896   :  { %s2443_s17 = smul.f32 0.00031887754, %s6095_s26  ;;  %v2452_v25 = vsub.f32 %v7848_v37, %v2451_v4  ;;  %v2453_v50 = vsub.f32 %v7846_v29, %v2451_v4  ;;  %v2454_v54 = vsub.f32 %v7859_v24, %v2451_v4  ;;  %v2455_v11 = vsub.f32 %v7864_v9, %v2451_v4 }
 0x897   :  { %v2456_v37 = vsub.f32 %v7877_v55, %v2451_v4  ;;  %v2457_v29 = vsub.f32 %v7882_v56, %v2451_v4  ;;  %v2458_v24 = vsub.f32 %v7898_v62, %v2451_v4  ;;  %v2459_v9 = vsub.f32 %v7904_v58, %v2451_v4  ;;  %v2357_v55 = vld [vmem:[%s8965_s12 + $0x38] sm:$0xff]  ;;  %v2360_v58 = vld [vmem:[%s8966_s13 + $0x10] sm:$0xff] }
 0x898   :  { %s2445_s23 = ssub.f32 %s2443_s17, %s2444_s19 }
 0x89a   :  { %s2446_s21 = smax.f32 %s6382_s27, %s2445_s23 }
 0x89b   :  { %s2447_s25 = sadd.f32 1e-05, %s2446_s21 }
 0x89d   :  { %v2448_v23 = vstv %s2447_s25 }
 0x89e   :  { %6373 = vrsqrt.f32 %v2448_v23 }
 0x8a8   :  { %v6374_v28 = vpop.eup %6373 }
 0x8a9   :  { %6096 = vpush %v6374_v28 }
 0x8aa   :  { %6098 = vpush %v3427_v15 }
 0x8ab   :  { %6100 = vpush %v3483_v49 }
 0x8da   :  { %s6097_s17 = spop %6096 }
 0x8db   :  { %v2460_v61 = vstv %s6097_s17  ;;  %s6099_s1 = spop %6098 }
 0x8dc   :  { %v2461_v17 = vmul.f32 %v2460_v61, %v2452_v25  ;;  %v2462_v56 = vmul.f32 %v2460_v61, %v2453_v50  ;;  %v2463_v18 = vmul.f32 %v2460_v61, %v2454_v54  ;;  %v2464_v62 = vmul.f32 %v2460_v61, %v2455_v11  ;;  %s8068_s23 = smul.f32 7.8125e-05, %s6099_s1  ;;  %s6101_s17 = spop %6100 }
 0x8dd   :  { %v2465_v22 = vmul.f32 %v2460_v61, %v2456_v37  ;;  %v2466_v38 = vmul.f32 %v2460_v61, %v2457_v29  ;;  %v2467_v35 = vmul.f32 %v2460_v61, %v2458_v24  ;;  %v2468_v57 = vmul.f32 %v2460_v61, %v2459_v9  ;;  %s3490_s1 = smul.f32 7.8125e-05, %s6101_s17 }
 0x8de   :  { %v2469_v2 = vmul.f32 %v2461_v17, %v2350_v5  ;;  %v2470_v26 = vmul.f32 %v2462_v56, %v2351_v10  ;;  %v2471_v8 = vmul.f32 %v2463_v18, %v2352_v43  ;;  %v2472_v42 = vmul.f32 %v2464_v62, %v2353_v46  ;;  %s3491_s22 = smul.f32 %s8068_s23, %s8068_s23 }
 0x8df   :  { %v2473_v0 = vmul.f32 %v2465_v22, %v2354_v51  ;;  %v2474_v23 = vmul.f32 %v2466_v38, %v2355_v13  ;;  %v2475_v31 = vmul.f32 %v2467_v35, %v2356_v14  ;;  %v2476_v33 = vmul.f32 %v2468_v57, %v2357_v55  ;;  %v3375_v57 = vld [vmem:[%s8956_s4 + $0x10] sm:$0xff] }
 0x8e0   :  { %v2477_v6 = vadd.f32 %v2469_v2, %v2358_v48  ;;  %v2478_v36 = vadd.f32 %v2470_v26, %v2359_v16  ;;  %v2479_v28 = vadd.f32 %v2471_v8, %v2360_v58  ;;  %v2480_v15 = vadd.f32 %v2472_v42, %v2361_v32  ;;  %s3492_s17 = ssub.f32 %s3490_s1, %s3491_s22 }
 0x8e1   :  { %v2481_v49 = vadd.f32 %v2473_v0, %v2362_v21  ;;  %v2482_v4 = vadd.f32 %v2474_v23, %v2363_v60  ;;  %v2483_v25 = vadd.f32 %v2475_v31, %v2364_v63  ;;  %v2484_v50 = vadd.f32 %v2476_v33, %v2365_v39  ;;  %v3376_v60 = vld [vmem:[%s8956_s4 + $0x18] sm:$0xff]  ;;  %v3358_v63 = vld [vmem:[%s8955_s3 + $0x8] sm:$0xff]  ;;  %v3365_v39 = vld [vmem:[%s8955_s3 + $0x40] sm:$0xff] }
 0x8e2   :  { %v2485_v54 = vmax.f32 %v2477_v6, 0.0  ;;  %v2486_v5 = vmax.f32 %v2478_v36, 0.0  ;;  %v2487_v10 = vmax.f32 %v2479_v28, 0.0  ;;  %v2488_v43 = vmax.f32 %v2480_v15, 0.0  ;;  %s3493_s2 = smax.f32 %s6382_s27, %s3492_s17  ;;  %v3366_v33 = vld [vmem:[%s8955_s3 + $0x48] sm:$0xff]  ;;  %v3361_v6 = vld [vmem:[%s8955_s3 + $0x20] sm:$0xff] }
 0x8e3   :  { %v2489_v46 = vmax.f32 %v2481_v49, 0.0  ;;  %v2490_v11 = vmax.f32 %v2482_v4, 0.0  ;;  %v2491_v37 = vmax.f32 %v2483_v25, 0.0  ;;  %v2492_v51 = vmax.f32 %v2484_v50, 0.0  ;;  %s3494_s0 = sadd.f32 1e-05, %s3493_s2 }
 0x8e4   :  { %v2493_v13 = vsel %vm2381_vm3, %v2485_v54, 0.0  ;;  %v2494_v14 = vsel %vm2381_vm3, %v2486_v5, 0.0  ;;  %v2495_v29 = vsel %vm2381_vm3, %v2487_v10, 0.0  ;;  %v2496_v24 = vsel %vm2381_vm3, %v2488_v43, 0.0  ;;  %v3362_v36 = vld [vmem:[%s8955_s3 + $0x28] sm:$0xff]  ;;  %v3373_v28 = vld [vmem:[%s8956_s4] sm:$0xff] }
 0x8e5   :  { %v2497_v9 = vsel %vm2381_vm3, %v2489_v46, 0.0  ;;  %v2498_v61 = vsel %vm2381_vm3, %v2490_v11, 0.0  ;;  %v2499_v55 = vsel %vm2381_vm3, %v2491_v37, 0.0  ;;  %v2500_v48 = vsel %vm2381_vm3, %v2492_v51, 0.0  ;;  %2501 = vst [vmem:[%s8967_s15] sm:$0xff] %v2493_v13  ;;  %2502 = vst [vmem:[%s8967_s15 + $0x8] sm:$0xff] %v2494_v14  ;;  %v3374_v15 = vld [vmem:[%s8956_s4 + $0x8] sm:$0xff] }
 0x8e6   :  { %2503 = vst [vmem:[%s8967_s15 + $0x10] sm:$0xff] %v2495_v29  ;;  %2504 = vst [vmem:[%s8967_s15 + $0x18] sm:$0xff] %v2496_v24  ;;  %v3495_v16 = vstv %s3494_s0  ;;  %v8124_v56 = vstv %s8068_s23  ;;  %s8978_s2 = smov 117  }
 0x8e7   :  { %2505 = vst [vmem:[%s8967_s15 + $0x20] sm:$0xff] %v2497_v9  ;;  %2506 = vst [vmem:[%s8967_s15 + $0x28] sm:$0xff] %v2498_v61  ;;  %6375 = vrsqrt.f32 %v3495_v16  ;;  %v3501_v18 = vsub.f32 %v7910_v20, %v8124_v56  ;;  %v3502_v62 = vsub.f32 %v7930_v52, %v8124_v56  ;;  %v3499_v58 = vsub.f32 %v7896_v12, %v8124_v56  ;;  %v3360_v12 = vld [vmem:[%s8955_s3 + $0x18] sm:$0xff]  ;;  %v3381_v49 = vld [vmem:[%s8956_s4 + $0x40] sm:$0xff] }
 0x8e8   :  { %2507 = vst [vmem:[%s8967_s15 + $0x30] sm:$0xff] %v2499_v55  ;;  %2508 = vst [vmem:[%s8967_s15 + $0x38] sm:$0xff] %v2500_v48  ;;  %v3500_v32 = vsub.f32 %v7893_v40, %v8124_v56  ;;  %v3507_v21 = vsub.f32 %v7967_v44, %v8124_v56  ;;  %v3508_v22 = vsub.f32 %v7973_v27, %v8124_v56  ;;  %v3359_v40 = vld [vmem:[%s8955_s3 + $0x10] sm:$0xff]  ;;  %v3382_v11 = vld [vmem:[%s8956_s4 + $0x48] sm:$0xff] }
 0x8e9   :  { %v3503_v38 = vsub.f32 %v7935_v34, %v8124_v56  ;;  %v3504_v20 = vsub.f32 %v7942_v59, %v8124_v56  ;;  %v3511_v52 = vsub.f32 %v7998_v47, %v8124_v56  ;;  %v3512_v44 = vsub.f32 %v8006_v41, %v8124_v56  ;;  %v3357_v41 = vld [vmem:[%s8955_s3] sm:$0xff]  ;;  %v3378_v51 = vld [vmem:[%s8956_s4 + $0x28] sm:$0xff]  ;;  %v3379_v47 = vld [vmem:[%s8956_s4 + $0x30] sm:$0xff] }
 0x8ea   :  { %v3505_v34 = vsub.f32 %v7952_v7, %v8124_v56  ;;  %v3506_v59 = vsub.f32 %v7958_v53, %v8124_v56  ;;  %v3509_v27 = vsub.f32 %v7983_v30, %v8124_v56  ;;  %v3510_v2 = vsub.f32 %v7989_v3, %v8124_v56  ;;  %v3377_v37 = vld [vmem:[%s8956_s4 + $0x20] sm:$0xff]  ;;  %v3368_v7 = vld [vmem:[%s8955_s3 + $0x58] sm:$0xff] }
 0x8eb   :  { %v3513_v26 = vsub.f32 %v8014_v19, %v8124_v56  ;;  %v3514_v8 = vsub.f32 %v8019_v45, %v8124_v56  ;;  %v3372_v30 = vld [vmem:[%s8955_s3 + $0x78] sm:$0xff]  ;;  %v3387_v19 = vld [vmem:[%s8956_s4 + $0x70] sm:$0xff] }
 0x8ec   :  { %v3388_v45 = vld [vmem:[%s8956_s4 + $0x78] sm:$0xff] }
 0x8f1   :  { %v6376_v17 = vpop.eup %6375 }
 0x8f2   :  { %6102 = vpush %v6376_v17 }
 0x923   :  { %s6103_s18 = spop %6102 }
 0x924   :  { %v8158_v35 = vstv %s6103_s18 }
 0x925   :  { %v3518_v42 = vmul.f32 %v8158_v35, %v3501_v18  ;;  %v3519_v0 = vmul.f32 %v8158_v35, %v3502_v62  ;;  %v3516_v23 = vmul.f32 %v8158_v35, %v3499_v58  ;;  %v3517_v31 = vmul.f32 %v8158_v35, %v3500_v32 }
 0x926   :  { %v3524_v4 = vmul.f32 %v8158_v35, %v3507_v21  ;;  %v3525_v25 = vmul.f32 %v8158_v35, %v3508_v22  ;;  %v3520_v50 = vmul.f32 %v8158_v35, %v3503_v38  ;;  %v3521_v54 = vmul.f32 %v8158_v35, %v3504_v20  ;;  %v3369_v38 = vld [vmem:[%s8955_s3 + $0x60] sm:$0xff] }
 0x927   :  { %v3534_v5 = vmul.f32 %v3518_v42, %v3359_v40  ;;  %v3535_v10 = vmul.f32 %v3519_v0, %v3360_v12  ;;  %v3532_v43 = vmul.f32 %v3516_v23, %v3357_v41  ;;  %v3533_v46 = vmul.f32 %v3517_v31, %v3358_v63  ;;  %v3386_v42 = vld [vmem:[%s8956_s4 + $0x68] sm:$0xff]  ;;  %v3363_v31 = vld [vmem:[%s8955_s3 + $0x30] sm:$0xff] }
 0x928   :  { %v3540_v13 = vmul.f32 %v3524_v4, %v3365_v39  ;;  %v3541_v14 = vmul.f32 %v3525_v25, %v3366_v33  ;;  %v3536_v29 = vmul.f32 %v3520_v50, %v3361_v6  ;;  %v3537_v24 = vmul.f32 %v3521_v54, %v3362_v36  ;;  %v3364_v33 = vld [vmem:[%s8955_s3 + $0x38] sm:$0xff]  ;;  %v3383_v50 = vld [vmem:[%s8956_s4 + $0x50] sm:$0xff] }
 0x929   :  { %v3550_v9 = vadd.f32 %v3534_v5, %v3375_v57  ;;  %v3551_v61 = vadd.f32 %v3535_v10, %v3376_v60  ;;  %v3548_v55 = vadd.f32 %v3532_v43, %v3373_v28  ;;  %v3549_v48 = vadd.f32 %v3533_v46, %v3374_v15  ;;  %v3370_v57 = vld [vmem:[%s8955_s3 + $0x68] sm:$0xff]  ;;  %v3385_v60 = vld [vmem:[%s8956_s4 + $0x60] sm:$0xff]  ;;  %v3367_v15 = vld [vmem:[%s8955_s3 + $0x50] sm:$0xff] }
 0x92a   :  { %v3556_v16 = vadd.f32 %v3540_v13, %v3381_v49  ;;  %v3557_v17 = vadd.f32 %v3541_v14, %v3382_v11  ;;  %v3552_v18 = vadd.f32 %v3536_v29, %v3377_v37  ;;  %v3553_v62 = vadd.f32 %v3537_v24, %v3378_v51  ;;  %v3384_v43 = vld [vmem:[%s8956_s4 + $0x58] sm:$0xff] }
 0x92b   :  { %v3566_v58 = vmax.f32 %v3550_v9, 0.0  ;;  %v3567_v32 = vmax.f32 %v3551_v61, 0.0  ;;  %v3564_v21 = vmax.f32 %v3548_v55, 0.0  ;;  %v3565_v22 = vmax.f32 %v3549_v48, 0.0 }
 0x92c   :  { %v3572_v20 = vmax.f32 %v3556_v16, 0.0  ;;  %v3573_v40 = vmax.f32 %v3557_v17, 0.0  ;;  %v3568_v12 = vmax.f32 %v3552_v18, 0.0  ;;  %v3569_v41 = vmax.f32 %v3553_v62, 0.0 }
 0x92d   :  { %v8225_v63 = vpack.c.bf16 %v3567_v32, %v3566_v58  ;;  %v8227_v39 = vpack.c.bf16 %v3565_v22, %v3564_v21  ;;  %v3528_v0 = vmul.f32 %v8158_v35, %v3511_v52  ;;  %v3529_v23 = vmul.f32 %v8158_v35, %v3512_v44  ;;  %v3380_v52 = vld [vmem:[%s8956_s4 + $0x38] sm:$0xff]  ;;  %v6317_v32 = vld [vmem:[%s8957_s5 + $0x20] sm:$0xff]   ;;  %v4074_v22 = vld [vmem:[%s8958_s6 + $0x10] sm:$0xff] }
 0x92e   :  { %v8243_v6 = vpack.c.bf16 %v3573_v40, %v3572_v20  ;;  %v8245_v36 = vpack.c.bf16 %v3569_v41, %v3568_v12  ;;  %v3522_v44 = vmul.f32 %v8158_v35, %v3505_v34  ;;  %v3523_v28 = vmul.f32 %v8158_v35, %v3506_v59  ;;  %v3371_v34 = vld [vmem:[%s8955_s3 + $0x70] sm:$0xff]  ;;  %5952 = vmatprep.mubr.bf16.mxu0 %v6317_v32  ;;  %v4072_v21 = vld [vmem:[%s8958_s6] sm:$0xff]  ;;  %v4073_v20 = vld [vmem:[%s8958_s6 + $0x8] sm:$0xff] }
 0x92f   :  { %3638 = vrot.lane.b32.xlu0 %v8225_v63, %s8977_s20  ;;  %3636 = vrot.lane.b32.xlu1 %v8227_v39, %s8977_s20  ;;  %v3544_v49 = vmul.f32 %v3528_v0, %v3369_v38  ;;  %v3545_v4 = vmul.f32 %v3529_v23, %v3370_v57  ;;  %v3526_v53 = vmul.f32 %v8158_v35, %v3509_v27  ;;  %v4076_v38 = vld [vmem:[%s8958_s6 + $0x20] sm:$0xff]  ;;  %v4078_v40 = vld [vmem:[%s8958_s6 + $0x30] sm:$0xff] }
 0x930   :  { %v3538_v59 = vmul.f32 %v3522_v44, %v3363_v31  ;;  %v3539_v25 = vmul.f32 %v3523_v28, %v3364_v33  ;;  %v3527_v54 = vmul.f32 %v8158_v35, %v3510_v2  ;;  %v3530_v27 = vmul.f32 %v8158_v35, %v3513_v26  ;;  %v4075_v12 = vld [vmem:[%s8958_s6 + $0x18] sm:$0xff]  ;;  %v4077_v41 = vld [vmem:[%s8958_s6 + $0x28] sm:$0xff]  ;;  %v6319_v28 = vld [vmem:[%s8957_s5 + $0x30] sm:$0xff]  }
 0x931   :  { %v3560_v5 = vadd.f32 %v3544_v49, %v3385_v60  ;;  %v3561_v10 = vadd.f32 %v3545_v4, %v3386_v42  ;;  %v3542_v46 = vmul.f32 %v3526_v53, %v3367_v15  ;;  %v3531_v3 = vmul.f32 %v8158_v35, %v3514_v8  ;;  %v4079_v57 = vld [vmem:[%s8958_s6 + $0x38] sm:$0xff]  ;;  %v6318_v44 = vld [vmem:[%s8957_s5 + $0x28] sm:$0xff]   ;;  %v6321_v49 = vld [vmem:[%s8957_s5] sm:$0xff]  }
 0x932   :  { %v3554_v2 = vadd.f32 %v3538_v59, %v3379_v47  ;;  %v3555_v11 = vadd.f32 %v3539_v25, %v3380_v52  ;;  %v3543_v37 = vmul.f32 %v3527_v54, %v3368_v7  ;;  %v3546_v26 = vmul.f32 %v3530_v27, %v3371_v34  ;;  %v6320_v15 = vld [vmem:[%s8957_s5 + $0x38] sm:$0xff]   ;;  %v6325_v53 = vld [vmem:[%s8957_s5 + $0x40] sm:$0xff]  }
 0x933   :  { %3644 = vrot.lane.b32.xlu0 %v8243_v6, %s8977_s20  ;;  %3640 = vrot.lane.b32.xlu1 %v8245_v36, %s8977_s20  ;;  %v3576_v51 = vmax.f32 %v3560_v5, 0.0  ;;  %v3577_v13 = vmax.f32 %v3561_v10, 0.0  ;;  %v3558_v14 = vadd.f32 %v3542_v46, %v3383_v50  ;;  %v3547_v56 = vmul.f32 %v3531_v3, %v3372_v30  ;;  %v6324_v4 = vld [vmem:[%s8957_s5 + $0x18] sm:$0xff]   ;;  %v6326_v30 = vld [vmem:[%s8957_s5 + $0x48] sm:$0xff]  }
 0x934   :  { %v3570_v35 = vmax.f32 %v3554_v2, 0.0  ;;  %v3571_v8 = vmax.f32 %v3555_v11, 0.0  ;;  %v3559_v29 = vadd.f32 %v3543_v37, %v3384_v43  ;;  %v3562_v9 = vadd.f32 %v3546_v26, %v3387_v19  ;;  %v6327_v5 = vld [vmem:[%s8957_s5 + $0x50] sm:$0xff]   ;;  %v6328_v43 = vld [vmem:[%s8957_s5 + $0x58] sm:$0xff]   ;;  %v6329_v3 = vld [vmem:[%s8957_s5 + $0x60] sm:$0xff]  }
 0x935   :  { %v8309_v24 = vpack.c.bf16 %v3577_v13, %v3576_v51  ;;  %v3574_v55 = vmax.f32 %v3558_v14, 0.0  ;;  %v3563_v16 = vadd.f32 %v3547_v56, %v3388_v45  ;;  %v6330_v51 = vld [vmem:[%s8957_s5 + $0x68] sm:$0xff]   ;;  %v6331_v13 = vld [vmem:[%s8957_s5 + $0x70] sm:$0xff]   ;;  %v6332_v14 = vld [vmem:[%s8957_s5 + $0x78] sm:$0xff]  }
 0x936   :  { %v8311_v61 = vpack.c.bf16 %v3571_v8, %v3570_v35  ;;  %v3575_v48 = vmax.f32 %v3559_v29, 0.0  ;;  %v3578_v18 = vmax.f32 %v3562_v9, 0.0 }
 0x937   :  { %3648 = vrot.lane.b32.xlu0 %v8309_v24, %s8977_s20  ;;  %v3579_v62 = vmax.f32 %v3563_v16, 0.0 }
 0x938   :  { %3642 = vrot.lane.b32.xlu1 %v8311_v61, %s8977_s20  ;;  %v8317_v17 = vpack.c.bf16 %v3575_v48, %v3574_v55 }
 0x939   :  { %v8323_v58 = vpack.c.bf16 %v3579_v62, %v3578_v18 }
 0x93b   :  { %3846 = vrot.lane.b32.xlu0 %v8227_v39, %s8976_s16 }
 0x93c   :  { %3646 = vrot.lane.b32.xlu1 %v8317_v17, %s8977_s20 }
 0x93f   :  { %3850 = vrot.lane.b32.xlu0 %v8245_v36, %s8976_s16 }
 0x940   :  { %3650 = vrot.lane.b32.xlu1 %v8323_v58, %s8977_s20 }
 0x943   :  { %3854 = vrot.lane.b32.xlu0 %v8243_v6, %s8976_s16 }
 0x944   :  { %3848 = vrot.lane.b32.xlu1 %v8225_v63, %s8976_s16 }
 0x947   :  { %3858 = vrot.lane.b32.xlu0 %v8309_v24, %s8976_s16 }
 0x948   :  { %3852 = vrot.lane.b32.xlu1 %v8311_v61, %s8976_s16 }
 0x94b   :  { %3975 = vrot.lane.b32.xlu0 %v8227_v39, %s8978_s2 }
 0x94c   :  { %3856 = vrot.lane.b32.xlu1 %v8317_v17, %s8976_s16 }
 0x94f   :  { %3979 = vrot.lane.b32.xlu0 %v8245_v36, %s8978_s2 }
 0x950   :  { %3860 = vrot.lane.b32.xlu1 %v8323_v58, %s8976_s16 }
 0x953   :  { %3983 = vrot.lane.b32.xlu0 %v8243_v6, %s8978_s2 }
 0x954   :  { %3977 = vrot.lane.b32.xlu1 %v8225_v63, %s8978_s2 }
 0x957   :  { %3987 = vrot.lane.b32.xlu0 %v8309_v24, %s8978_s2 }
 0x958   :  { %3981 = vrot.lane.b32.xlu1 %v8311_v61, %s8978_s2 }
 0x95b   :  { %4082 = vperm.xlu0 %6123, %v4072_v21  }
 0x95c   :  { %3985 = vrot.lane.b32.xlu1 %v8317_v17, %s8978_s2 }
 0x95f   :  { %4092 = vperm.xlu0 %6123, %v4074_v22  }
 0x960   :  { %3989 = vrot.lane.b32.xlu1 %v8323_v58, %s8978_s2 }
 0x963   :  { %4102 = vperm.xlu0 %6123, %v4076_v38  }
 0x964   :  { %4087 = vperm.xlu1 %6124, %v4073_v20  }
 0x967   :  { %4112 = vperm.xlu0 %6123, %v4078_v40  }
 0x968   :  { %4097 = vperm.xlu1 %6124, %v4075_v12  }
 0x96c   :  { %4107 = vperm.xlu1 %6124, %v4077_v41  }
 0x970   :  { %4117 = vperm.xlu1 %6124, %v4079_v57  }
 0x9a1   :  { %v3637_v60 = vpop.permute.xlu1 %3636  ;;  %v3639_v42 = vpop.permute.xlu0 %3638 }
 0x9a2   :  { %5936 = vmatprep.subr.bf16.mxu0 %v3637_v60 }
 0x9a3   :  { %5937 = vmatpush3.bf16.msra.mxu0 %v3637_v60 }
 0x9a4   :  { %5938 = vmatprep.subr.bf16.mxu0 %v3639_v42 }
 0x9a5   :  { %v3641_v0 = vpop.permute.xlu1 %3640  ;;  %v3645_v31 = vpop.permute.xlu0 %3644 }
 0x9a7   :  { %5939 = vmatpush3.bf16.msra.mxu0 %v3639_v42 }
 0x9a8   :  { %5940 = vmatprep.subr.bf16.mxu0 %v3641_v0 }
 0x9a9   :  { %v3649_v47 = vpop.permute.xlu0 %3648 }
 0x9aa   :  { %v3643_v23 = vpop.permute.xlu1 %3642 }
 0x9ab   :  { %5941 = vmatpush3.bf16.msra.mxu0 %v3641_v0 }
 0x9ac   :  { %5942 = vmatprep.subr.bf16.mxu0 %v3643_v23 }
 0x9ae   :  { %v3647_v33 = vpop.permute.xlu1 %3646 }
 0x9af   :  { %5943 = vmatpush3.bf16.msra.mxu0 %v3643_v23 }
 0x9b0   :  { %5944 = vmatprep.subr.bf16.mxu0 %v3645_v31 }
 0x9b2   :  { %v3651_v52 = vpop.permute.xlu1 %3650 }
 0x9b3   :  { %5945 = vmatpush3.bf16.msra.mxu0 %v3645_v31 }
 0x9b4   :  { %5946 = vmatprep.subr.bf16.mxu0 %v3647_v33 }
 0x9b7   :  { %5947 = vmatpush3.bf16.msra.mxu0 %v3647_v33 }
 0x9b8   :  { %5948 = vmatprep.subr.bf16.mxu0 %v3649_v47 }
 0x9bb   :  { %5949 = vmatpush3.bf16.msra.mxu0 %v3649_v47 }
 0x9bc   :  { %5950 = vmatprep.subr.bf16.mxu0 %v3651_v52 }
 0x9bf   :  { %5951 = vmatpush3.bf16.msra.mxu0 %v3651_v52 }
 0x9c0   :  { %5960 = vmatprep.subr.bf16.mxu0 %v8227_v39 }
 0x9c2   :  { %5953 = vmatmul.mubr.bf16.vlgmr.msra.gmra.mrb[48].mxu0 %v6318_v44 }
 0x9c3   :  { %5961 = vmatpush3.bf16.msra.mxu0 %v8227_v39  ;;  %5956 = vmatprep.mubr.bf16.mxu0 %v6319_v28  ;;  %v3847_v39 = vpop.permute.xlu0 %3846 }
 0x9c4   :  { %5962 = vmatprep.subr.bf16.mxu0 %v8225_v63 }
 0x9c7   :  { %5963 = vmatpush3.bf16.msra.mxu0 %v8225_v63  ;;  %v6322_v63 = vld [vmem:[%s8957_s5 + $0x8] sm:$0xff]   ;;  %v3851_v7 = vpop.permute.xlu0 %3850 }
 0x9c8   :  { %5964 = vmatprep.subr.bf16.mxu0 %v8245_v36 }
 0x9ca   :  { %5957 = vmatmul.mubr.bf16.gmra.mrb[52].mxu0 %v6320_v15 }
 0x9cb   :  { %5965 = vmatpush3.bf16.msra.mxu0 %v8245_v36  ;;  %5976 = vmatprep.mubr.bf16.mxu0 %v6321_v49  ;;  %v3849_v36 = vpop.permute.xlu1 %3848  ;;  %v3855_v59 = vpop.permute.xlu0 %3854 }
 0x9cc   :  { %5966 = vmatprep.subr.bf16.mxu0 %v8311_v61 }
 0x9cf   :  { %5967 = vmatpush3.bf16.msra.mxu0 %v8311_v61  ;;  %v3853_v34 = vpop.permute.xlu1 %3852  ;;  %v3859_v50 = vpop.permute.xlu0 %3858 }
 0x9d0   :  { %5968 = vmatprep.subr.bf16.mxu0 %v8243_v6 }
 0x9d3   :  { %5969 = vmatpush3.bf16.msra.mxu0 %v8243_v6  ;;  %v6323_v6 = vld [vmem:[%s8957_s5 + $0x10] sm:$0xff]   ;;  %v3857_v25 = vpop.permute.xlu1 %3856  ;;  %v3976_v27 = vpop.permute.xlu0 %3975 }
 0x9d4   :  { %5970 = vmatprep.subr.bf16.mxu0 %v8317_v17 }
 0x9d7   :  { %5971 = vmatpush3.bf16.msra.mxu0 %v8317_v17  ;;  %v3861_v54 = vpop.permute.xlu1 %3860  ;;  %v3980_v46 = vpop.permute.xlu0 %3979 }
 0x9d8   :  { %5972 = vmatprep.subr.bf16.mxu0 %v8309_v24 }
 0x9db   :  { %5973 = vmatpush3.bf16.msra.mxu0 %v8309_v24  ;;  %v3978_v10 = vpop.permute.xlu1 %3977  ;;  %v3984_v11 = vpop.permute.xlu0 %3983  ;;  %v5458_v24 = vld [vmem:[%s8959_s9] ss:$0 sm:$0xff] }
 0x9dc   :  { %5974 = vmatprep.subr.bf16.mxu0 %v8323_v58 }
 0x9df   :  { %5975 = vmatpush3.bf16.msra.mxu0 %v8323_v58  ;;  %v3982_v2 = vpop.permute.xlu1 %3981  ;;  %v3988_v19 = vpop.permute.xlu0 %3987 }
 0x9e0   :  { %5984 = vmatprep.subr.bf16.mxu0 %v3847_v39 }
 0x9e2   :  { %5977 = vmatmul.mubr.bf16.vlgmr.msra.gmra.mrb[48].mxu0 %v6322_v63 }
 0x9e3   :  { %5985 = vmatpush3.bf16.msra.mxu0 %v3847_v39  ;;  %5980 = vmatprep.mubr.bf16.mxu0 %v6323_v6  ;;  %v3986_v37 = vpop.permute.xlu1 %3985  ;;  %v4083_v45 = vpop.permute.xlu0 %4082 }
 0x9e4   :  { %5986 = vmatprep.subr.bf16.mxu0 %v3849_v36 }
 0x9e7   :  { %5987 = vmatpush3.bf16.msra.mxu0 %v3849_v36  ;;  %v3990_v26 = vpop.permute.xlu1 %3989  ;;  %v4093_v35 = vpop.permute.xlu0 %4092 }
 0x9e8   :  { %5988 = vmatprep.subr.bf16.mxu0 %v3851_v7 }
 0x9ea   :  { %5981 = vmatmul.mubr.bf16.gmra.mrb[52].mxu0 %v6324_v4 }
 0x9eb   :  { %5989 = vmatpush3.bf16.msra.mxu0 %v3851_v7  ;;  %6000 = vmatprep.mubr.bf16.mxu0 %v6325_v53  ;;  %v4088_v56 = vpop.permute.xlu1 %4087  ;;  %v4103_v55 = vpop.permute.xlu0 %4102 }
 0x9ec   :  { %5990 = vmatprep.subr.bf16.mxu0 %v3853_v34 }
 0x9ef   :  { %5991 = vmatpush3.bf16.msra.mxu0 %v3853_v34  ;;  %v4098_v8 = vpop.permute.xlu1 %4097  ;;  %v4113_v12 = vpop.permute.xlu0 %4112 }
 0x9f0   :  { %5992 = vmatprep.subr.bf16.mxu0 %v3855_v59 }
 0x9f3   :  { %5993 = vmatpush3.bf16.msra.mxu0 %v3855_v59  ;;  %v4108_v58 = vpop.permute.xlu1 %4107 }
 0x9f4   :  { %5994 = vmatprep.subr.bf16.mxu0 %v3857_v25 }
 0x9f7   :  { %5995 = vmatpush3.bf16.msra.mxu0 %v3857_v25  ;;  %v4118_v47 = vpop.permute.xlu1 %4117 }
 0x9f8   :  { %5996 = vmatprep.subr.bf16.mxu0 %v3859_v50 }
 0x9fb   :  { %5997 = vmatpush3.bf16.msra.mxu0 %v3859_v50 }
 0x9fc   :  { %5998 = vmatprep.subr.bf16.mxu0 %v3861_v54 }
 0x9ff   :  { %5999 = vmatpush3.bf16.msra.mxu0 %v3861_v54 }
 0xa00   :  { %6008 = vmatprep.subr.bf16.mxu0 %v3976_v27 }
 0xa02   :  { %6001 = vmatmul.mubr.bf16.vlgmr.msra.gmra.mrb[48].mxu0 %v6326_v30 }
 0xa03   :  { %6009 = vmatpush3.bf16.msra.mxu0 %v3976_v27  ;;  %6004 = vmatprep.mubr.bf16.mxu0 %v6327_v5 }
 0xa04   :  { %6010 = vmatprep.subr.bf16.mxu0 %v3978_v10 }
 0xa07   :  { %6011 = vmatpush3.bf16.msra.mxu0 %v3978_v10 }
 0xa08   :  { %6012 = vmatprep.subr.bf16.mxu0 %v3980_v46 }
 0xa0a   :  { %6005 = vmatmul.mubr.bf16.gmra.mrb[52].mxu0 %v6328_v43 }
 0xa0b   :  { %6013 = vmatpush3.bf16.msra.mxu0 %v3980_v46  ;;  %6024 = vmatprep.mubr.bf16.mxu0 %v6329_v3 }
 0xa0c   :  { %6014 = vmatprep.subr.bf16.mxu0 %v3982_v2 }
 0xa0f   :  { %6015 = vmatpush3.bf16.msra.mxu0 %v3982_v2 }
 0xa10   :  { %6016 = vmatprep.subr.bf16.mxu0 %v3984_v11 }
 0xa13   :  { %6017 = vmatpush3.bf16.msra.mxu0 %v3984_v11 }
 0xa14   :  { %6018 = vmatprep.subr.bf16.mxu0 %v3986_v37 }
 0xa17   :  { %6019 = vmatpush3.bf16.msra.mxu0 %v3986_v37 }
 0xa18   :  { %6020 = vmatprep.subr.bf16.mxu0 %v3988_v19 }
 0xa1b   :  { %6021 = vmatpush3.bf16.msra.mxu0 %v3988_v19 }
 0xa1c   :  { %6022 = vmatprep.subr.bf16.mxu0 %v3990_v26 }
 0xa1f   :  { %6023 = vmatpush3.bf16.msra.mxu0 %v3990_v26 }
 0xa22   :  { %6025 = vmatmul.mubr.bf16.vlgmr.msra.gmra.mrb[48].mxu0 %v6330_v51 }
 0xa23   :  { %6028 = vmatprep.mubr.bf16.mxu0 %v6331_v13 }
 0xa2a   :  { %6029 = vmatmul.mubr.bf16.gmra.mrb[52].mxu0 %v6332_v14 }
 0xaf5   :  { %v6026_v29 = vpop.f32.mrb[48].mxu0 }
 0xaf6   :  { %v8448_v9 = vadd.f32 %v6026_v29, %v4093_v35  ;;  %v4033_v61 = vpop.f32.mrb[49].mxu0 }
 0xaf7   :  { %v8450_v48 = vadd.f32 %v4083_v45, %v4033_v61  ;;  %v6027_v16 = vpop.f32.mrb[50].mxu0 }
 0xaf8   :  { %v4153_v17 = vmul.f32 %v5458_v24, %v8448_v9  ;;  %v8453_v18 = vadd.f32 %v6027_v16, %v4098_v8  ;;  %v4036_v62 = vpop.f32.mrb[51].mxu0 }
 0xaf9   :  { %v4151_v32 = vmul.f32 %v5458_v24, %v8450_v48  ;;  %v8456_v21 = vadd.f32 %v4088_v56, %v4036_v62 }
 0xafa   :  { %v4154_v22 = vmul.f32 %v5458_v24, %v8453_v18  ;;  %v4185_v40 = vmul.f32 %v4153_v17, %v8448_v9  ;;  %v4162_v52 = vsel %vm1704_vm1, %v4153_v17, 0.0 }
 0xafb   :  { %v4183_v38 = vmul.f32 %v4151_v32, %v8450_v48  ;;  %v4152_v20 = vmul.f32 %v5458_v24, %v8456_v21  ;;  %v4159_v41 = vsel %vm1704_vm1, %v4151_v32, 0.0 }
 0xafc   :  { %v4186_v0 = vmul.f32 %v4154_v22, %v8453_v18  ;;  %v4194_v63 = vsel %vm1704_vm1, %v4185_v40, 0.0  ;;  %v4164_v7 = vsel %vm1704_vm1, %v4154_v22, 0.0 }
 0xafd   :  { %v4160_v57 = vsel %vm1704_vm1, %v4152_v20, 0.0  ;;  %v4184_v60 = vmul.f32 %v4152_v20, %v8456_v21  ;;  %v6030_v42 = vpop.f32.mrb[52].mxu0  ;;  %v4191_v44 = vsel %vm1704_vm1, %v4183_v38, 0.0 }
 0xafe   :  { %v4161_v23 = vadd.f32 %v4160_v57, %v4159_v41  ;;  %v8466_v31 = vadd.f32 %v6030_v42, %v4113_v12  ;;  %v4049_v33 = vpop.f32.mrb[53].mxu0  ;;  %v4196_v25 = vsel %vm1704_vm1, %v4186_v0, 0.0 }
 0xaff   :  { %v4192_v28 = vsel %vm1704_vm1, %v4184_v60, 0.0  ;;  %v8471_v15 = vadd.f32 %v4103_v55, %v4049_v33  ;;  %v6031_v49 = vpop.f32.mrb[54].mxu0 }
 0xb00   :  { %v4163_v39 = vadd.f32 %v4162_v52, %v4161_v23  ;;  %v4193_v6 = vadd.f32 %v4192_v28, %v4191_v44  ;;  %v8474_v36 = vadd.f32 %v6031_v49, %v4118_v47  ;;  %v4052_v4 = vpop.f32.mrb[55].mxu0  ;;  %v4157_v53 = vmul.f32 %v5458_v24, %v8466_v31 }
 0xb01   :  { %v4155_v34 = vmul.f32 %v5458_v24, %v8471_v15  ;;  %v8479_v59 = vadd.f32 %v4108_v58, %v4052_v4 }
 0xb02   :  { %v4195_v50 = vadd.f32 %v4194_v63, %v4193_v6  ;;  %v4165_v54 = vadd.f32 %v4164_v7, %v4163_v39  ;;  %v4158_v5 = vmul.f32 %v5458_v24, %v8474_v36  ;;  %v4189_v3 = vmul.f32 %v4157_v53, %v8466_v31  ;;  %v4130_v63 = vld [vmem:[%s8960_s7 + $0x10] sm:$0xff]  ;;  %v4131_v39 = vld [vmem:[%s8960_s7 + $0x18] sm:$0xff]  ;;  %v4129_v7 = vld [vmem:[%s8960_s7 + $0x8] sm:$0xff] }
 0xb03   :  { %v4166_v30 = vsel %vm1704_vm1, %v4155_v34, 0.0  ;;  %v4187_v27 = vmul.f32 %v4155_v34, %v8471_v15  ;;  %v4156_v10 = vmul.f32 %v5458_v24, %v8479_v59  ;;  %v4170_v14 = vsel %vm1704_vm1, %v4157_v53, 0.0 }
 0xb04   :  { %v4167_v43 = vadd.f32 %v4166_v30, %v4165_v54  ;;  %v4197_v46 = vadd.f32 %v4196_v25, %v4195_v50  ;;  %v4190_v51 = vmul.f32 %v4158_v5, %v8474_v36  ;;  %v4172_v35 = vsel %vm1704_vm1, %v4158_v5, 0.0  ;;  %v4135_v25 = vld [vmem:[%s8960_s7 + $0x38] sm:$0xff]  ;;  %v4132_v50 = vld [vmem:[%s8960_s7 + $0x20] sm:$0xff]  ;;  %v4133_v54 = vld [vmem:[%s8960_s7 + $0x28] sm:$0xff] }
 0xb05   :  { %v4198_v2 = vsel %vm1704_vm1, %v4187_v27, 0.0  ;;  %v4168_v11 = vsel %vm1704_vm1, %v4156_v10, 0.0  ;;  %v4188_v37 = vmul.f32 %v4156_v10, %v8479_v59  ;;  %v4202_v8 = vsel %vm1704_vm1, %v4189_v3, 0.0  ;;  %v4142_v3 = vld [vmem:[%s8961_s8 + $0x30] sm:$0xff] }
 0xb06   :  { %v4199_v19 = vadd.f32 %v4198_v2, %v4197_v46  ;;  %v4169_v26 = vadd.f32 %v4168_v11, %v4167_v43  ;;  %v4204_v61 = vsel %vm1704_vm1, %v4190_v51, 0.0  ;;  %v4136_v43 = vld [vmem:[%s8961_s8] sm:$0xff]  ;;  %v4137_v46 = vld [vmem:[%s8961_s8 + $0x8] sm:$0xff] }
 0xb07   :  { %v4200_v13 = vsel %vm1704_vm1, %v4188_v37, 0.0  ;;  %v4140_v51 = vld [vmem:[%s8961_s8 + $0x20] sm:$0xff] }
 0xb08   :  { %v4171_v45 = vadd.f32 %v4170_v14, %v4169_v26  ;;  %v4201_v56 = vadd.f32 %v4200_v13, %v4199_v19  ;;  %v4143_v26 = vld [vmem:[%s8961_s8 + $0x38] sm:$0xff]  ;;  %v4141_v13 = vld [vmem:[%s8961_s8 + $0x28] sm:$0xff] }
 0xb0a   :  { %v4173_v29 = vadd.f32 %v4172_v35, %v4171_v45  ;;  %v4203_v24 = vadd.f32 %v4202_v8, %v4201_v56 }
 0xb0c   :  { %4174 = vadd.xlane.f32.xlu0 %v4173_v29  ;;  %v4205_v55 = vadd.f32 %v4204_v61, %v4203_v24 }
 0xb0e   :  { %4206 = vadd.xlane.f32.xlu1 %v4205_v55 }
 0xb99   :  { %v4175_v16 = vpop.xlane.xlu0 %4174 }
 0xb9a   :  { %v4176_v17 = vrot.slane %v4175_v16, 4 }
 0xb9b   :  { %v4207_v62 = vpop.xlane.xlu1 %4206 }
 0xb9c   :  { %v4177_v58 = vadd.f32 %v4176_v17, %v4175_v16  ;;  %v4208_v32 = vrot.slane %v4207_v62, 4 }
 0xb9e   :  { %v4178_v22 = vrot.slane %v4177_v58, 2  ;;  %v4209_v38 = vadd.f32 %v4208_v32, %v4207_v62 }
 0xba0   :  { %v4210_v20 = vrot.slane %v4209_v38, 2  ;;  %v4179_v40 = vadd.f32 %v4178_v22, %v4177_v58 }
 0xba2   :  { %v4180_v12 = vrot.slane %v4179_v40, 1  ;;  %v4211_v41 = vadd.f32 %v4210_v20, %v4209_v38 }
 0xba4   :  { %v4181_v57 = vadd.f32 %v4180_v12, %v4179_v40  ;;  %v4212_v60 = vrot.slane %v4211_v41, 1 }
 0xba6   :  { %6104 = vpush %v4181_v57  ;;  %v4213_v42 = vadd.f32 %v4212_v60, %v4211_v41 }
 0xba8   :  { %6106 = vpush %v4213_v42 }
 0xbd7   :  { %s6105_s5 = spop %6104 }
 0xbd8   :  { %s4217_s9 = smul.f32 0.00019290124, %s6105_s5 }
 0xbd9   :  { %s6107_s17 = spop %6106 }
 0xbda   :  { %s4221_s2 = smul.f32 %s4217_s9, %s4217_s9  ;;  %v4228_v33 = vstv %s4217_s9 }
 0xbdb   :  { %s4220_s6 = smul.f32 0.00019290124, %s6107_s17  ;;  %v4229_v47 = vsub.f32 %v8450_v48, %v4228_v33  ;;  %v4230_v52 = vsub.f32 %v8456_v21, %v4228_v33  ;;  %v4231_v44 = vsub.f32 %v8448_v9, %v4228_v33  ;;  %v4232_v28 = vsub.f32 %v8453_v18, %v4228_v33  ;;  %v4138_v9 = vld [vmem:[%s8961_s8 + $0x10] sm:$0xff]  ;;  %v4139_v18 = vld [vmem:[%s8961_s8 + $0x18] sm:$0xff] }
 0xbdc   :  { %v4233_v49 = vsub.f32 %v8471_v15, %v4228_v33  ;;  %v4234_v6 = vsub.f32 %v8479_v59, %v4228_v33  ;;  %v4235_v48 = vsub.f32 %v8466_v31, %v4228_v33  ;;  %v4236_v21 = vsub.f32 %v8474_v36, %v4228_v33  ;;  %v4128_v15 = vld [vmem:[%s8960_s7] sm:$0xff]  ;;  %v4134_v31 = vld [vmem:[%s8960_s7 + $0x30] sm:$0xff] }
 0xbdd   :  { %s4222_s28 = ssub.f32 %s4220_s6, %s4221_s2 }
 0xbdf   :  { %s4223_s1 = smax.f32 %s6382_s27, %s4222_s28 }
 0xbe0   :  { %s4224_s29 = sadd.f32 1e-05, %s4223_s1 }
 0xbe2   :  { %v4225_v0 = vstv %s4224_s29 }
 0xbe3   :  { %6377 = vrsqrt.f32 %v4225_v0 }
 0xbed   :  { %v6378_v23 = vpop.eup %6377 }
 0xbee   :  { %6108 = vpush %v6378_v23 }
 0xc1f   :  { %s6109_s26 = spop %6108 }
 0xc20   :  { %v4237_v4 = vstv %s6109_s26 }
 0xc21   :  { %v4238_v36 = vmul.f32 %v4237_v4, %v4229_v47  ;;  %v4239_v53 = vmul.f32 %v4237_v4, %v4230_v52  ;;  %v4240_v34 = vmul.f32 %v4237_v4, %v4231_v44  ;;  %v4241_v59 = vmul.f32 %v4237_v4, %v4232_v28 }
 0xc22   :  { %v4242_v30 = vmul.f32 %v4237_v4, %v4233_v49  ;;  %v4243_v27 = vmul.f32 %v4237_v4, %v4234_v6  ;;  %v4244_v5 = vmul.f32 %v4237_v4, %v4235_v48  ;;  %v4245_v10 = vmul.f32 %v4237_v4, %v4236_v21  ;;  %v6335_v6 = vld [vmem:[%s8962_s10 + $0x44] ss:$8 sps:$4 sm:$0xff]  }
 0xc23   :  { %v4248_v2 = vmul.f32 %v4240_v34, %v4130_v63  ;;  %v4249_v11 = vmul.f32 %v4241_v59, %v4131_v39  ;;  %v4246_v37 = vmul.f32 %v4238_v36, %v4128_v15  ;;  %v4247_v19 = vmul.f32 %v4239_v53, %v4129_v7  ;;  %5475 = vmatprep.mubr.msk.bf16.mxu1 %vm1937_vm2, %v6335_v6  ;;  %v4748_v15 = vld [vmem:[%s8963_s11 + $0x18] sm:$0xff]  ;;  %v4747_v7 = vld [vmem:[%s8963_s11 + $0x10] sm:$0xff]  ;;  %v4749_v36 = vld [vmem:[%s8963_s11 + $0x20] sm:$0xff] }
 0xc24   :  { %v4252_v14 = vmul.f32 %v4244_v5, %v4134_v31  ;;  %v4253_v45 = vmul.f32 %v4245_v10, %v4135_v25  ;;  %v4250_v56 = vmul.f32 %v4242_v30, %v4132_v50  ;;  %v4251_v35 = vmul.f32 %v4243_v27, %v4133_v54  ;;  %v4750_v31 = vld [vmem:[%s8963_s11 + $0x28] sm:$0xff]  ;;  %v4752_v53 = vld [vmem:[%s8963_s11 + $0x38] sm:$0xff]  ;;  %v4751_v34 = vld [vmem:[%s8963_s11 + $0x30] sm:$0xff] }
 0xc25   :  { %v4256_v8 = vadd.f32 %v4248_v2, %v4138_v9  ;;  %v4257_v29 = vadd.f32 %v4249_v11, %v4139_v18  ;;  %v4254_v24 = vadd.f32 %v4246_v37, %v4136_v43  ;;  %v4255_v61 = vadd.f32 %v4247_v19, %v4137_v46  ;;  %v4746_v9 = vld [vmem:[%s8963_s11 + $0x8] sm:$0xff]  ;;  %v4745_v18 = vld [vmem:[%s8963_s11] sm:$0xff]  ;;  %v6336_v46 = vld [vmem:[%s8962_s10 + $0x54] ss:$8 sps:$4 sm:$0xff]  }
 0xc26   :  { %v4260_v55 = vadd.f32 %v4252_v14, %v4142_v3  ;;  %v4261_v16 = vadd.f32 %v4253_v45, %v4143_v26  ;;  %v4258_v17 = vadd.f32 %v4250_v56, %v4140_v51  ;;  %v4259_v62 = vadd.f32 %v4251_v35, %v4141_v13  ;;  %v6333_v43 = vld [vmem:[%s8962_s10 + $0x40] ss:$8 sps:$4 sm:$0xff]   ;;  %v6338_v3 = vld [vmem:[%s8962_s10 + $0x50] ss:$8 sps:$4 sm:$0xff]   ;;  %v6339_v2 = vld [vmem:[%s8962_s10 + $0x64] ss:$8 sps:$4 sm:$0xff]  }
 0xc27   :  { %v4264_v58 = vmax.f32 %v4256_v8, 0.0  ;;  %v4265_v32 = vmax.f32 %v4257_v29, 0.0  ;;  %v4262_v22 = vmax.f32 %v4254_v24, 0.0  ;;  %v4263_v38 = vmax.f32 %v4255_v61, 0.0  ;;  %v6341_v11 = vld [vmem:[%s8962_s10 + $0x60] ss:$8 sps:$4 sm:$0xff]  }
 0xc28   :  { %v4268_v20 = vmax.f32 %v4260_v55, 0.0  ;;  %v4269_v40 = vmax.f32 %v4261_v16, 0.0  ;;  %v4266_v57 = vmax.f32 %v4258_v17, 0.0  ;;  %v4267_v60 = vmax.f32 %v4259_v62, 0.0  ;;  %v6342_v37 = vld [vmem:[%s8962_s10 + $0x74] ss:$8 sps:$4 sm:$0xff]  }
 0xc29   :  { %v8553_v12 = vpack.c.bf16 %v4265_v32, %v4264_v58  ;;  %v8555_v41 = vpack.c.bf16 %v4263_v38, %v4262_v22  ;;  %v6344_v19 = vld [vmem:[%s8962_s10 + $0x70] ss:$8 sps:$4 sm:$0xff]   ;;  %v6347_v26 = vld [vmem:[%s8962_s10 + $0x4] ss:$8 sps:$4 sm:$0xff]   ;;  %v6345_v51 = vld [vmem:[%s8962_s10] ss:$8 sps:$4 sm:$0xff]  }
 0xc2a   :  { %v8561_v42 = vpack.c.bf16 %v4269_v40, %v4268_v20  ;;  %v8563_v0 = vpack.c.bf16 %v4267_v60, %v4266_v57  ;;  %v6348_v13 = vld [vmem:[%s8962_s10 + $0x14] ss:$8 sps:$4 sm:$0xff]   ;;  %v6350_v56 = vld [vmem:[%s8962_s10 + $0x10] ss:$8 sps:$4 sm:$0xff]   ;;  %v6351_v35 = vld [vmem:[%s8962_s10 + $0x24] ss:$8 sps:$4 sm:$0xff]  }
 0xc2b   :  { %4280 = vrot.lane.b32.xlu1 %v8553_v12, %s8976_s16  ;;  %4278 = vrot.lane.b32.xlu0 %v8555_v41, %s8976_s16  ;;  %v6353_v24 = vld [vmem:[%s8962_s10 + $0x20] ss:$8 sps:$4 sm:$0xff]   ;;  %v6354_v61 = vld [vmem:[%s8962_s10 + $0x34] ss:$8 sps:$4 sm:$0xff]  }
 0xc2c   :  { %v6356_v17 = vld [vmem:[%s8962_s10 + $0x30] ss:$8 sps:$4 sm:$0xff]   ;;  %v6359_v62 = vld [vmem:[%s8962_s10 + $0x84] ss:$8 sps:$4 sm:$0xff]   ;;  %v6365_v60 = vld [vmem:[%s8962_s10 + $0xa0] ss:$8 sps:$4 sm:$0xff]  }
 0xc2d   :  { %v6362_v57 = vld [vmem:[%s8962_s10 + $0x90] ss:$8 sps:$4 sm:$0xff]  }
 0xc2f   :  { %4284 = vrot.lane.b32.xlu1 %v8561_v42, %s8976_s16  ;;  %4282 = vrot.lane.b32.xlu0 %v8563_v0, %s8976_s16 }
 0xc33   :  { %4292 = vrot.lane.b32.xlu1 %v8553_v12, %s6386_s30  ;;  %4290 = vrot.lane.b32.xlu0 %v8555_v41, %s6386_s30 }
 0xc37   :  { %4296 = vrot.lane.b32.xlu1 %v8561_v42, %s6386_s30  ;;  %4294 = vrot.lane.b32.xlu0 %v8563_v0, %s6386_s30  ;;  %s8979_s30 = smov 126  }
 0xc3b   :  { %4356 = vrot.lane.b32.xlu1 %v8553_v12, %s8977_s20  ;;  %4354 = vrot.lane.b32.xlu0 %v8555_v41, %s8977_s20 }
 0xc3f   :  { %4360 = vrot.lane.b32.xlu1 %v8561_v42, %s8977_s20  ;;  %4358 = vrot.lane.b32.xlu0 %v8563_v0, %s8977_s20 }
 0xc9d   :  { %v8585_v23 = vpop.permute.xlu1 %4280  ;;  %v8587_v33 = vpop.permute.xlu0 %4278 }
 0xc9e   :  { %4364 = vrot.lane.b32.xlu1 %v8585_v23, %s8977_s20  ;;  %4362 = vrot.lane.b32.xlu0 %v8587_v33, %s8977_s20 }
 0xca1   :  { %v8593_v47 = vpop.permute.xlu1 %4284  ;;  %v8595_v52 = vpop.permute.xlu0 %4282 }
 0xca2   :  { %4368 = vrot.lane.b32.xlu1 %v8593_v47, %s8977_s20  ;;  %4366 = vrot.lane.b32.xlu0 %v8595_v52, %s8977_s20 }
 0xca5   :  { %v8601_v44 = vpop.permute.xlu1 %4292  ;;  %v8603_v28 = vpop.permute.xlu0 %4290 }
 0xca6   :  { %4372 = vrot.lane.b32.xlu1 %v8601_v44, %s8977_s20  ;;  %4370 = vrot.lane.b32.xlu0 %v8603_v28, %s8977_s20 }
 0xca9   :  { %v8609_v49 = vpop.permute.xlu1 %4296  ;;  %v8611_v63 = vpop.permute.xlu0 %4294 }
 0xcaa   :  { %4376 = vrot.lane.b32.xlu1 %v8609_v49, %s8977_s20  ;;  %4374 = vrot.lane.b32.xlu0 %v8611_v63, %s8977_s20 }
 0xcad   :  { %v4355_v39 = vpop.permute.xlu0 %4354  ;;  %v4357_v48 = vpop.permute.xlu1 %4356 }
 0xcae   :  { %4626 = vrot.lane.b32.xlu1 %v8553_v12, %s8979_s30  ;;  %4624 = vrot.lane.b32.xlu0 %v8555_v41, %s8979_s30 }
 0xcaf   :  { %4403 = vmatpush1.bf16.msra.mxu1 %v4355_v39 }
 0xcb0   :  { %4404 = vmatprep.subr.bf16.mxu1 %v6381_v1 }
 0xcb1   :  { %v4359_v21 = vpop.permute.xlu0 %4358  ;;  %v4361_v4 = vpop.permute.xlu1 %4360 }
 0xcb2   :  { %4630 = vrot.lane.b32.xlu1 %v8561_v42, %s8979_s30  ;;  %4628 = vrot.lane.b32.xlu0 %v8563_v0, %s8979_s30 }
 0xcb3   :  { %4405 = vmatpush1.bf16.msra.mxu1 %v4357_v48 }
 0xcb4   :  { %4406 = vmatprep.subr.bf16.mxu1 %v6381_v1 }
 0xcb6   :  { %4634 = vrot.lane.b32.xlu1 %v8585_v23, %s8979_s30  ;;  %4632 = vrot.lane.b32.xlu0 %v8587_v33, %s8979_s30 }
 0xcb7   :  { %4407 = vmatpush1.bf16.msra.mxu1 %v4359_v21 }
 0xcb8   :  { %4408 = vmatprep.subr.bf16.mxu1 %v6381_v1 }
 0xcba   :  { %4638 = vrot.lane.b32.xlu1 %v8593_v47, %s8979_s30  ;;  %4636 = vrot.lane.b32.xlu0 %v8595_v52, %s8979_s30 }
 0xcbb   :  { %4409 = vmatpush1.bf16.msra.mxu1 %v4361_v4 }
 0xcbc   :  { %4410 = vmatprep.subr.bf16.mxu1 %v6381_v1 }
 0xcbe   :  { %4642 = vrot.lane.b32.xlu1 %v8601_v44, %s8979_s30  ;;  %4640 = vrot.lane.b32.xlu0 %v8603_v28, %s8979_s30 }
 0xcc2   :  { %4646 = vrot.lane.b32.xlu1 %v8609_v49, %s8979_s30  ;;  %4644 = vrot.lane.b32.xlu0 %v8611_v63, %s8979_s30 }
 0xcc6   :  { %4760 = vperm.xlu1 %6124, %v4746_v9   ;;  %4755 = vperm.xlu0 %6123, %v4745_v18  }
 0xcca   :  { %4770 = vperm.xlu1 %6124, %v4748_v15   ;;  %4765 = vperm.xlu0 %6123, %v4747_v7  }
 0xcce   :  { %4780 = vperm.xlu1 %6124, %v4750_v31   ;;  %4775 = vperm.xlu0 %6123, %v4749_v36  }
 0xcd2   :  { %4790 = vperm.xlu1 %6124, %v4752_v53   ;;  %4785 = vperm.xlu0 %6123, %v4751_v34  }
 0xd10   :  { %v4363_v59 = vpop.permute.xlu0 %4362  ;;  %v4365_v25 = vpop.permute.xlu1 %4364 }
 0xd11   :  { %4411 = vmatpush1.bf16.msra.mxu1 %v4363_v59 }
 0xd12   :  { %4412 = vmatprep.subr.bf16.mxu1 %v6381_v1 }
 0xd14   :  { %v4367_v50 = vpop.permute.xlu0 %4366  ;;  %v4369_v54 = vpop.permute.xlu1 %4368 }
 0xd15   :  { %4413 = vmatpush1.bf16.msra.mxu1 %v4365_v25 }
 0xd16   :  { %4414 = vmatprep.subr.bf16.mxu1 %v6381_v1 }
 0xd18   :  { %v4371_v30 = vpop.permute.xlu0 %4370  ;;  %v4373_v27 = vpop.permute.xlu1 %4372 }
 0xd19   :  { %4415 = vmatpush1.bf16.msra.mxu1 %v4367_v50 }
 0xd1a   :  { %4416 = vmatprep.subr.bf16.mxu1 %v6381_v1 }
 0xd1c   :  { %v4375_v5 = vpop.permute.xlu0 %4374  ;;  %v4377_v10 = vpop.permute.xlu1 %4376 }
 0xd1d   :  { %4417 = vmatpush1.bf16.msra.mxu1 %v4369_v54 }
 0xd1e   :  { %4418 = vmatprep.subr.bf16.mxu1 %v6381_v1 }
 0xd20   :  { %v4625_v14 = vpop.permute.xlu0 %4624  ;;  %v4627_v45 = vpop.permute.xlu1 %4626 }
 0xd21   :  { %4419 = vmatpush1.bf16.msra.mxu1 %v4371_v30 }
 0xd22   :  { %4420 = vmatprep.subr.bf16.mxu1 %v6381_v1 }
 0xd24   :  { %v4629_v8 = vpop.permute.xlu0 %4628  ;;  %v4631_v29 = vpop.permute.xlu1 %4630 }
 0xd25   :  { %4421 = vmatpush1.bf16.msra.mxu1 %v4373_v27 }
 0xd26   :  { %4422 = vmatprep.subr.bf16.mxu1 %v6381_v1 }
 0xd28   :  { %v4633_v55 = vpop.permute.xlu0 %4632  ;;  %v4635_v16 = vpop.permute.xlu1 %4634 }
 0xd29   :  { %4423 = vmatpush1.bf16.msra.mxu1 %v4375_v5 }
 0xd2a   :  { %4424 = vmatprep.subr.bf16.mxu1 %v6381_v1 }
 0xd2c   :  { %v4637_v58 = vpop.permute.xlu0 %4636  ;;  %v4639_v32 = vpop.permute.xlu1 %4638 }
 0xd2d   :  { %4425 = vmatpush1.bf16.msra.mxu1 %v4377_v10 }
 0xd2e   :  { %4515 = vmatprep.subr.bf16.mxu1 %v6381_v1 }
 0xd30   :  { %4435 = vmatmul.mubr.bf16.vlgmr.msra.gmra.mrb[72].mxu1 %v6333_v43  ;;  %v4641_v22 = vpop.permute.xlu0 %4640  ;;  %v4643_v38 = vpop.permute.xlu1 %4642 }
 0xd31   :  { %4516 = vmatpush1.bf16.msra.mxu1 %v8555_v41  ;;  %5476 = vmatprep.mubr.msk.bf16.mxu1 %vm1937_vm2, %v6336_v46  ;;  %v6360_v41 = vld [vmem:[%s8962_s10 + $0x94] ss:$8 sps:$4 sm:$0xff]  }
 0xd32   :  { %4517 = vmatprep.subr.bf16.mxu1 %v6381_v1 }
 0xd34   :  { %v4645_v20 = vpop.permute.xlu0 %4644  ;;  %v4647_v40 = vpop.permute.xlu1 %4646 }
 0xd35   :  { %4518 = vmatpush1.bf16.msra.mxu1 %v8553_v12  ;;  %v6357_v12 = vld [vmem:[%s8962_s10 + $0x80] ss:$8 sps:$4 sm:$0xff]  }
 0xd36   :  { %4519 = vmatprep.subr.bf16.mxu1 %v6381_v1 }
 0xd38   :  { %4443 = vmatmul.mubr.bf16.gmra.mrb[76].mxu1 %v6338_v3 }
 0xd39   :  { %4520 = vmatpush1.bf16.msra.mxu1 %v8563_v0  ;;  %5477 = vmatprep.mubr.msk.bf16.mxu1 %vm1937_vm2, %v6339_v2  ;;  %v6368_v0 = vld [vmem:[%s8962_s10 + $0xb0] ss:$8 sps:$4 sm:$0xff]  }
 0xd3a   :  { %4521 = vmatprep.subr.bf16.mxu1 %v6381_v1 }
 0xd3d   :  { %4522 = vmatpush1.bf16.msra.mxu1 %v8561_v42  ;;  %v6366_v42 = vld [vmem:[%s8962_s10 + $0xb4] ss:$8 sps:$4 sm:$0xff]  }
 0xd3e   :  { %4523 = vmatprep.subr.bf16.mxu1 %v6381_v1 }
 0xd40   :  { %4451 = vmatmul.mubr.bf16.gmra.mrb[80].mxu1 %v6341_v11 }
 0xd41   :  { %4524 = vmatpush1.bf16.msra.mxu1 %v8587_v33  ;;  %5478 = vmatprep.mubr.msk.bf16.mxu1 %vm1937_vm2, %v6342_v37 }
 0xd42   :  { %4525 = vmatprep.subr.bf16.mxu1 %v6381_v1 }
 0xd45   :  { %4526 = vmatpush1.bf16.msra.mxu1 %v8585_v23 }
 0xd46   :  { %4527 = vmatprep.subr.bf16.mxu1 %v6381_v1 }
 0xd48   :  { %4459 = vmatmul.mubr.bf16.gmra.mrb[84].mxu1 %v6344_v19 }
 0xd49   :  { %4528 = vmatpush1.bf16.msra.mxu1 %v8595_v52  ;;  %5487 = vmatprep.mubr.msk.bf16.mxu1 %vm1937_vm2, %v6347_v26 }
 0xd4a   :  { %4529 = vmatprep.subr.bf16.mxu1 %v6381_v1 }
 0xd4d   :  { %4530 = vmatpush1.bf16.msra.mxu1 %v8593_v47 }
 0xd4e   :  { %4531 = vmatprep.subr.bf16.mxu1 %v6381_v1 }
 0xd51   :  { %4532 = vmatpush1.bf16.msra.mxu1 %v8603_v28 }
 0xd52   :  { %4533 = vmatprep.subr.bf16.mxu1 %v6381_v1 }
 0xd55   :  { %4534 = vmatpush1.bf16.msra.mxu1 %v8601_v44 }
 0xd56   :  { %4535 = vmatprep.subr.bf16.mxu1 %v6381_v1 }
 0xd59   :  { %4536 = vmatpush1.bf16.msra.mxu1 %v8611_v63 }
 0xd5a   :  { %4537 = vmatprep.subr.bf16.mxu1 %v6381_v1 }
 0xd5d   :  { %4538 = vmatpush1.bf16.msra.mxu1 %v8609_v49 }
 0xd5e   :  { %4672 = vmatprep.subr.bf16.mxu1 %v6381_v1 }
 0xd60   :  { %4548 = vmatmul.mubr.bf16.vlgmr.msra.gmra.mrb[88].mxu1 %v6345_v51 }
 0xd61   :  { %4673 = vmatpush1.bf16.msra.mxu1 %v4625_v14  ;;  %5488 = vmatprep.mubr.msk.bf16.mxu1 %vm1937_vm2, %v6348_v13 }
 0xd62   :  { %4674 = vmatprep.subr.bf16.mxu1 %v6381_v1 }
 0xd65   :  { %4675 = vmatpush1.bf16.msra.mxu1 %v4627_v45 }
 0xd66   :  { %4676 = vmatprep.subr.bf16.mxu1 %v6381_v1 }
 0xd68   :  { %4556 = vmatmul.mubr.bf16.gmra.mrb[92].mxu1 %v6350_v56 }
 0xd69   :  { %4677 = vmatpush1.bf16.msra.mxu1 %v4629_v8  ;;  %5489 = vmatprep.mubr.msk.bf16.mxu1 %vm1937_vm2, %v6351_v35 }
 0xd6a   :  { %4678 = vmatprep.subr.bf16.mxu1 %v6381_v1 }
 0xd6d   :  { %4679 = vmatpush1.bf16.msra.mxu1 %v4631_v29 }
 0xd6e   :  { %4680 = vmatprep.subr.bf16.mxu1 %v6381_v1 }
 0xd70   :  { %4564 = vmatmul.mubr.bf16.gmra.mrb[96].mxu1 %v6353_v24 }
 0xd71   :  { %4681 = vmatpush1.bf16.msra.mxu1 %v4633_v55  ;;  %5490 = vmatprep.mubr.msk.bf16.mxu1 %vm1937_vm2, %v6354_v61  ;;  %v4761_v61 = vpop.permute.xlu1 %4760  ;;  %v4756_v55 = vpop.permute.xlu0 %4755 }
 0xd72   :  { %4682 = vmatprep.subr.bf16.mxu1 %v6381_v1 }
 0xd75   :  { %4683 = vmatpush1.bf16.msra.mxu1 %v4635_v16 }
 0xd76   :  { %4684 = vmatprep.subr.bf16.mxu1 %v6381_v1 }
 0xd78   :  { %4572 = vmatmul.mubr.bf16.gmra.mrb[100].mxu1 %v6356_v17 }
 0xd79   :  { %4685 = vmatpush1.bf16.msra.mxu1 %v4637_v58  ;;  %5507 = vmatprep.mubr.msk.bf16.mxu1 %vm1937_vm2, %v6359_v62  ;;  %v8807_v62 = vld [vmem:[%s8964_s14] ss:$0 sm:$0xff] }
 0xd7a   :  { %4686 = vmatprep.subr.bf16.mxu1 %v6381_v1 }
 0xd7d   :  { %4687 = vmatpush1.bf16.msra.mxu1 %v4639_v32 }
 0xd7e   :  { %4688 = vmatprep.subr.bf16.mxu1 %v6381_v1 }
 0xd81   :  { %4689 = vmatpush1.bf16.msra.mxu1 %v4641_v22 }
 0xd82   :  { %4690 = vmatprep.subr.bf16.mxu1 %v6381_v1 }
 0xd85   :  { %4691 = vmatpush1.bf16.msra.mxu1 %v4643_v38 }
 0xd86   :  { %4692 = vmatprep.subr.bf16.mxu1 %v6381_v1 }
 0xd89   :  { %4693 = vmatpush1.bf16.msra.mxu1 %v4645_v20  ;;  %v4766_v20 = vpop.permute.xlu0 %4765 }
 0xd8a   :  { %4694 = vmatprep.subr.bf16.mxu1 %v6381_v1  ;;  %v6363_v1 = vld [vmem:[%s8962_s10 + $0xa4] ss:$8 sps:$4 sm:$0xff]  }
 0xd8d   :  { %4695 = vmatpush1.bf16.msra.mxu1 %v4647_v40 }
 0xd90   :  { %4705 = vmatmul.mubr.bf16.vlgmr.msra.gmra.mrb[104].mxu1 %v6357_v12 }
 0xd91   :  { %5508 = vmatprep.mubr.msk.bf16.mxu1 %vm1937_vm2, %v6360_v41 }
 0xd98   :  { %4713 = vmatmul.mubr.bf16.gmra.mrb[108].mxu1 %v6362_v57 }
 0xd99   :  { %5509 = vmatprep.mubr.msk.bf16.mxu1 %vm1937_vm2, %v6363_v1 }
 0xda0   :  { %4721 = vmatmul.mubr.bf16.gmra.mrb[112].mxu1 %v6365_v60  ;;  %v4771_v60 = vpop.permute.xlu1 %4770 }
 0xda1   :  { %5510 = vmatprep.mubr.msk.bf16.mxu1 %vm1937_vm2, %v6366_v42 }
 0xda8   :  { %4729 = vmatmul.mubr.bf16.gmra.mrb[116].mxu1 %v6368_v0 }
 0xe03   :  { %v4436_v23 = vpop.f32.mrb[72].mxu1 }
 0xe04   :  { %v4438_v33 = vpop.f32.mrb[73].mxu1 }
 0xe05   :  { %v4439_v47 = vpop.f32.mrb[74].mxu1 }
 0xe06   :  { %v4441_v52 = vpop.f32.mrb[75].mxu1 }
 0xe0b   :  { %v4444_v44 = vpop.f32.mrb[76].mxu1 }
 0xe0c   :  { %v4446_v28 = vpop.f32.mrb[77].mxu1 }
 0xe0d   :  { %v4447_v49 = vpop.f32.mrb[78].mxu1 }
 0xe0e   :  { %v4449_v63 = vpop.f32.mrb[79].mxu1 }
 0xe13   :  { %v4452_v39 = vpop.f32.mrb[80].mxu1 }
 0xe14   :  { %v4454_v6 = vpop.f32.mrb[81].mxu1 }
 0xe15   :  { %v4455_v48 = vpop.f32.mrb[82].mxu1 }
 0xe16   :  { %v4457_v21 = vpop.f32.mrb[83].mxu1 }
 0xe17   :  { %v4776_v21 = vpop.permute.xlu0 %4775 }
 0xe1b   :  { %v4460_v4 = vpop.f32.mrb[84].mxu1 }
 0xe1c   :  { %v4462_v9 = vpop.f32.mrb[85].mxu1 }
 0xe1d   :  { %v4463_v18 = vpop.f32.mrb[86].mxu1 }
 0xe1e   :  { %v4465_v15 = vpop.f32.mrb[87].mxu1 }
 0xe33   :  { %v4549_v7 = vpop.f32.mrb[88].mxu1 }
 0xe34   :  { %v4550_v31 = vadd.f32 %v4549_v7, %v4436_v23  ;;  %v4551_v36 = vpop.f32.mrb[89].mxu1 }
 0xe35   :  { %v4552_v53 = vpop.f32.mrb[90].mxu1 }
 0xe36   :  { %v4553_v34 = vadd.f32 %v4552_v53, %v4439_v47  ;;  %v4554_v59 = vpop.f32.mrb[91].mxu1 }
 0xe3b   :  { %v4557_v25 = vpop.f32.mrb[92].mxu1 }
 0xe3c   :  { %v4558_v50 = vadd.f32 %v4557_v25, %v4444_v44  ;;  %v4559_v54 = vpop.f32.mrb[93].mxu1 }
 0xe3d   :  { %v4560_v30 = vpop.f32.mrb[94].mxu1 }
 0xe3e   :  { %v4561_v27 = vadd.f32 %v4560_v30, %v4447_v49  ;;  %v4562_v5 = vpop.f32.mrb[95].mxu1 }
 0xe43   :  { %v4565_v10 = vpop.f32.mrb[96].mxu1 }
 0xe44   :  { %v4566_v43 = vadd.f32 %v4565_v10, %v4452_v39  ;;  %v4567_v46 = vpop.f32.mrb[97].mxu1 }
 0xe45   :  { %v4568_v3 = vpop.f32.mrb[98].mxu1 }
 0xe46   :  { %v4569_v2 = vadd.f32 %v4568_v3, %v4455_v48  ;;  %v4570_v11 = vpop.f32.mrb[99].mxu1 }
 0xe4b   :  { %v4573_v37 = vpop.f32.mrb[100].mxu1 }
 0xe4c   :  { %v8796_v19 = vadd.f32 %v4573_v37, %v4460_v4  ;;  %v4575_v26 = vpop.f32.mrb[101].mxu1 }
 0xe4d   :  { %v4576_v51 = vpop.f32.mrb[102].mxu1 }
 0xe4e   :  { %v8798_v13 = vadd.f32 %v4576_v51, %v4463_v18  ;;  %v4578_v14 = vpop.f32.mrb[103].mxu1 }
 0xe4f   :  { %v4786_v14 = vpop.permute.xlu0 %4785 }
 0xe63   :  { %v4706_v45 = vpop.f32.mrb[104].mxu1 }
 0xe64   :  { %v4737_v56 = vadd.f32 %v4706_v45, %v4550_v31  ;;  %v4708_v35 = vpop.f32.mrb[105].mxu1 }
 0xe65   :  { %v4709_v8 = vpop.f32.mrb[106].mxu1 }
 0xe66   :  { %v4738_v29 = vadd.f32 %v4709_v8, %v4553_v34  ;;  %v4711_v24 = vpop.f32.mrb[107].mxu1  ;;  %v8802_v17 = vadd.f32 %v4756_v55, %v4737_v56  ;;  %v4781_v34 = vpop.permute.xlu1 %4780 }
 0xe68   :  { %v8800_v16 = vadd.f32 %v4761_v61, %v4738_v29  ;;  %v4824_v40 = vmul.f32 %v8807_v62, %v8802_v17 }
 0xe6a   :  { %v4825_v32 = vmul.f32 %v8807_v62, %v8800_v16  ;;  %v4856_v33 = vmul.f32 %v4824_v40, %v8802_v17  ;;  %v4832_v49 = vsel %vm2381_vm3, %v4824_v40, 0.0  ;;  %v4791_v55 = vpop.permute.xlu1 %4790 }
 0xe6b   :  { %v4714_v58 = vpop.f32.mrb[108].mxu1 }
 0xe6c   :  { %v4739_v22 = vadd.f32 %v4714_v58, %v4558_v50  ;;  %v4716_v38 = vpop.f32.mrb[109].mxu1  ;;  %v4857_v42 = vmul.f32 %v4825_v32, %v8800_v16  ;;  %v4833_v47 = vsel %vm2381_vm3, %v4825_v32, 0.0  ;;  %v4864_v4 = vsel %vm2381_vm3, %v4856_v33, 0.0 }
 0xe6d   :  { %v4717_v12 = vpop.f32.mrb[110].mxu1  ;;  %v4834_v9 = vadd.f32 %v4833_v47, %v4832_v49 }
 0xe6e   :  { %v8813_v41 = vadd.f32 %v4766_v20, %v4739_v22  ;;  %v4740_v57 = vadd.f32 %v4717_v12, %v4561_v27  ;;  %v4719_v1 = vpop.f32.mrb[111].mxu1  ;;  %v4865_v63 = vsel %vm2381_vm3, %v4857_v42, 0.0 }
 0xe6f   :  { %v4866_v59 = vadd.f32 %v4865_v63, %v4864_v4 }
 0xe70   :  { %v4826_v0 = vmul.f32 %v8807_v62, %v8813_v41  ;;  %v8818_v23 = vadd.f32 %v4771_v60, %v4740_v57 }
 0xe72   :  { %v4858_v52 = vmul.f32 %v4826_v0, %v8813_v41  ;;  %v4827_v44 = vmul.f32 %v8807_v62, %v8818_v23  ;;  %v4835_v39 = vsel %vm2381_vm3, %v4826_v0, 0.0 }
 0xe73   :  { %v4722_v28 = vpop.f32.mrb[112].mxu1  ;;  %v4836_v25 = vadd.f32 %v4835_v39, %v4834_v9 }
 0xe74   :  { %v4741_v6 = vadd.f32 %v4722_v28, %v4566_v43  ;;  %v4724_v48 = vpop.f32.mrb[113].mxu1  ;;  %v4867_v15 = vsel %vm2381_vm3, %v4858_v52, 0.0  ;;  %v4859_v7 = vmul.f32 %v4827_v44, %v8818_v23  ;;  %v4837_v50 = vsel %vm2381_vm3, %v4827_v44, 0.0 }
 0xe75   :  { %v4725_v18 = vpop.f32.mrb[114].mxu1  ;;  %v4868_v27 = vadd.f32 %v4867_v15, %v4866_v59  ;;  %v4838_v3 = vadd.f32 %v4837_v50, %v4836_v25  ;;  %v4801_v59 = vld [vmem:[%s8965_s12] sm:$0xff]  ;;  %v4802_v50 = vld [vmem:[%s8965_s12 + $0x8] sm:$0xff] }
 0xe76   :  { %v8831_v31 = vadd.f32 %v4776_v21, %v4741_v6  ;;  %v4742_v36 = vadd.f32 %v4725_v18, %v4569_v2  ;;  %v4727_v53 = vpop.f32.mrb[115].mxu1  ;;  %v4869_v5 = vsel %vm2381_vm3, %v4859_v7, 0.0 }
 0xe77   :  { %v4870_v45 = vadd.f32 %v4869_v5, %v4868_v27  ;;  %v4804_v27 = vld [vmem:[%s8965_s12 + $0x18] sm:$0xff] }
 0xe78   :  { %v4828_v54 = vmul.f32 %v8807_v62, %v8831_v31  ;;  %v8836_v30 = vadd.f32 %v4781_v34, %v4742_v36 }
 0xe7a   :  { %v4839_v10 = vsel %vm2381_vm3, %v4828_v54, 0.0  ;;  %v4860_v43 = vmul.f32 %v4828_v54, %v8831_v31  ;;  %v4829_v46 = vmul.f32 %v8807_v62, %v8836_v30  ;;  %v4803_v54 = vld [vmem:[%s8965_s12 + $0x10] sm:$0xff] }
 0xe7b   :  { %v4730_v2 = vpop.f32.mrb[116].mxu1  ;;  %v4840_v35 = vadd.f32 %v4839_v10, %v4838_v3  ;;  %v4806_v3 = vld [vmem:[%s8965_s12 + $0x28] sm:$0xff] }
 0xe7c   :  { %v4871_v11 = vsel %vm2381_vm3, %v4860_v43, 0.0  ;;  %v4861_v37 = vmul.f32 %v4829_v46, %v8836_v30  ;;  %v4743_v26 = vadd.f32 %v4730_v2, %v8796_v19  ;;  %v4732_v51 = vpop.f32.mrb[117].mxu1  ;;  %v4841_v61 = vsel %vm2381_vm3, %v4829_v46, 0.0  ;;  %v4805_v46 = vld [vmem:[%s8965_s12 + $0x20] sm:$0xff]  ;;  %v4807_v2 = vld [vmem:[%s8965_s12 + $0x30] sm:$0xff] }
 0xe7d   :  { %v4733_v56 = vpop.f32.mrb[118].mxu1  ;;  %v4872_v58 = vadd.f32 %v4871_v11, %v4870_v45  ;;  %v4842_v38 = vadd.f32 %v4841_v61, %v4840_v35  ;;  %v4812_v35 = vld [vmem:[%s8966_s13 + $0x18] sm:$0xff] }
 0xe7e   :  { %v8846_v8 = vadd.f32 %v4786_v14, %v4743_v26  ;;  %v4744_v29 = vadd.f32 %v4733_v56, %v8798_v13  ;;  %v4735_v24 = vpop.f32.mrb[119].mxu1  ;;  %v4873_v19 = vsel %vm2381_vm3, %v4861_v37, 0.0  ;;  %v4809_v37 = vld [vmem:[%s8966_s13] sm:$0xff]  ;;  %v4810_v26 = vld [vmem:[%s8966_s13 + $0x8] sm:$0xff]  ;;  %v4811_v56 = vld [vmem:[%s8966_s13 + $0x10] sm:$0xff] }
 0xe7f   :  { %v4874_v57 = vadd.f32 %v4873_v19, %v4872_v58  ;;  %v4814_v58 = vld [vmem:[%s8966_s13 + $0x28] sm:$0xff] }
 0xe80   :  { %v4830_v32 = vmul.f32 %v8807_v62, %v8846_v8  ;;  %v8852_v22 = vadd.f32 %v4791_v55, %v4744_v29 }
 0xe82   :  { %v4862_v20 = vmul.f32 %v4830_v32, %v8846_v8  ;;  %v4831_v40 = vmul.f32 %v8807_v62, %v8852_v22  ;;  %v4843_v13 = vsel %vm2381_vm3, %v4830_v32, 0.0  ;;  %v4815_v32 = vld [vmem:[%s8966_s13 + $0x30] sm:$0xff] }
 0xe83   :  { %v4844_v12 = vadd.f32 %v4843_v13, %v4842_v38 }
 0xe84   :  { %v4845_v1 = vsel %vm2381_vm3, %v4831_v40, 0.0  ;;  %v4863_v60 = vmul.f32 %v4831_v40, %v8852_v22  ;;  %v4875_v42 = vsel %vm2381_vm3, %v4862_v20, 0.0 }
 0xe85   :  { %v4846_v0 = vadd.f32 %v4845_v1, %v4844_v12  ;;  %v4876_v33 = vadd.f32 %v4875_v42, %v4874_v57 }
 0xe86   :  { %v4877_v47 = vsel %vm2381_vm3, %v4863_v60, 0.0 }
 0xe87   :  { %4847 = vadd.xlane.f32.xlu0 %v4846_v0  ;;  %v4878_v52 = vadd.f32 %v4877_v47, %v4876_v33 }
 0xe89   :  { %4879 = vadd.xlane.f32.xlu1 %v4878_v52 }
 0xf14   :  { %v4848_v44 = vpop.xlane.xlu0 %4847 }
 0xf15   :  { %v4849_v28 = vrot.slane %v4848_v44, 4 }
 0xf16   :  { %v4880_v62 = vpop.xlane.xlu1 %4879 }
 0xf17   :  { %v4850_v49 = vadd.f32 %v4849_v28, %v4848_v44  ;;  %v4881_v63 = vrot.slane %v4880_v62, 4 }
 0xf19   :  { %v4851_v39 = vrot.slane %v4850_v49, 2  ;;  %v4882_v6 = vadd.f32 %v4881_v63, %v4880_v62 }
 0xf1b   :  { %v4852_v48 = vadd.f32 %v4851_v39, %v4850_v49  ;;  %v4883_v21 = vrot.slane %v4882_v6, 2 }
 0xf1d   :  { %v4884_v4 = vadd.f32 %v4883_v21, %v4882_v6  ;;  %v4853_v9 = vrot.slane %v4852_v48, 1 }
 0xf1f   :  { %v4854_v18 = vadd.f32 %v4853_v9, %v4852_v48  ;;  %v4885_v15 = vrot.slane %v4884_v4, 1 }
 0xf21   :  { %6110 = vpush %v4854_v18  ;;  %v4886_v7 = vadd.f32 %v4885_v15, %v4884_v4 }
 0xf23   :  { %6112 = vpush %v4886_v7 }
 0xf52   :  { %s6111_s14 = spop %6110 }
 0xf53   :  { %s4890_s3 = smul.f32 0.00031887754, %s6111_s14 }
 0xf54   :  { %s6113_s21 = spop %6112 }
 0xf55   :  { %s4894_s7 = smul.f32 %s4890_s3, %s4890_s3  ;;  %v4901_v34 = vstv %s4890_s3 }
 0xf56   :  { %s4893_s11 = smul.f32 0.00031887754, %s6113_s21  ;;  %v4902_v25 = vsub.f32 %v8802_v17, %v4901_v34  ;;  %v4903_v5 = vsub.f32 %v8800_v16, %v4901_v34  ;;  %v4904_v10 = vsub.f32 %v8813_v41, %v4901_v34  ;;  %v4905_v43 = vsub.f32 %v8818_v23, %v4901_v34 }
 0xf57   :  { %v4906_v17 = vsub.f32 %v8831_v31, %v4901_v34  ;;  %v4907_v16 = vsub.f32 %v8836_v30, %v4901_v34  ;;  %v4908_v41 = vsub.f32 %v8846_v8, %v4901_v34  ;;  %v4909_v23 = vsub.f32 %v8852_v22, %v4901_v34  ;;  %v4808_v31 = vld [vmem:[%s8965_s12 + $0x38] sm:$0xff]  ;;  %v4813_v8 = vld [vmem:[%s8966_s13 + $0x20] sm:$0xff] }
 0xf58   :  { %s4895_s25 = ssub.f32 %s4893_s11, %s4894_s7  ;;  %v4816_v22 = vld [vmem:[%s8966_s13 + $0x38] sm:$0xff] }
 0xf5a   :  { %s4896_s22 = smax.f32 %s6382_s27, %s4895_s25 }
 0xf5b   :  { %s4897_s4 = sadd.f32 1e-05, %s4896_s22 }
 0xf5d   :  { %v4898_v36 = vstv %s4897_s4 }
 0xf5e   :  { %6379 = vrsqrt.f32 %v4898_v36 }
 0xf68   :  { %v6380_v53 = vpop.eup %6379 }
 0xf69   :  { %6114 = vpush %v6380_v53 }
 0xf9a   :  { %s6115_s2 = spop %6114 }
 0xf9b   :  { %v4910_v11 = vstv %s6115_s2 }
 0xf9c   :  { %v4911_v51 = vmul.f32 %v4910_v11, %v4902_v25  ;;  %v4912_v14 = vmul.f32 %v4910_v11, %v4903_v5  ;;  %v4913_v30 = vmul.f32 %v4910_v11, %v4904_v10  ;;  %v4914_v45 = vmul.f32 %v4910_v11, %v4905_v43 }
 0xf9d   :  { %v4915_v29 = vmul.f32 %v4910_v11, %v4906_v17  ;;  %v4916_v24 = vmul.f32 %v4910_v11, %v4907_v16  ;;  %v4917_v61 = vmul.f32 %v4910_v11, %v4908_v41  ;;  %v4918_v55 = vmul.f32 %v4910_v11, %v4909_v23 }
 0xf9e   :  { %v4919_v19 = vmul.f32 %v4911_v51, %v4801_v59  ;;  %v4920_v38 = vmul.f32 %v4912_v14, %v4802_v50  ;;  %v4921_v20 = vmul.f32 %v4913_v30, %v4803_v54  ;;  %v4922_v40 = vmul.f32 %v4914_v45, %v4804_v27 }
 0xf9f   :  { %v4923_v13 = vmul.f32 %v4915_v29, %v4805_v46  ;;  %v4924_v12 = vmul.f32 %v4916_v24, %v4806_v3  ;;  %v4925_v57 = vmul.f32 %v4917_v61, %v4807_v2  ;;  %v4926_v1 = vmul.f32 %v4918_v55, %v4808_v31 }
 0xfa0   :  { %v4927_v60 = vadd.f32 %v4919_v19, %v4809_v37  ;;  %v4928_v42 = vadd.f32 %v4920_v38, %v4810_v26  ;;  %v4929_v0 = vadd.f32 %v4921_v20, %v4811_v56  ;;  %v4930_v33 = vadd.f32 %v4922_v40, %v4812_v35 }
 0xfa1   :  { %v4931_v47 = vadd.f32 %v4923_v13, %v4813_v8  ;;  %v4932_v52 = vadd.f32 %v4924_v12, %v4814_v58  ;;  %v4933_v44 = vadd.f32 %v4925_v57, %v4815_v32  ;;  %v4934_v28 = vadd.f32 %v4926_v1, %v4816_v22 }
 0xfa2   :  { %v4935_v62 = vmax.f32 %v4927_v60, 0.0  ;;  %v4936_v49 = vmax.f32 %v4928_v42, 0.0  ;;  %v4937_v63 = vmax.f32 %v4929_v0, 0.0  ;;  %v4938_v39 = vmax.f32 %v4930_v33, 0.0 }
 0xfa3   :  { %v4939_v6 = vmax.f32 %v4931_v47, 0.0  ;;  %v4940_v48 = vmax.f32 %v4932_v52, 0.0  ;;  %v4941_v21 = vmax.f32 %v4933_v44, 0.0  ;;  %v4942_v4 = vmax.f32 %v4934_v28, 0.0 }
 0xfa4   :  { %v4943_v9 = vsel %vm2381_vm3, %v4935_v62, 0.0  ;;  %v4944_v18 = vsel %vm2381_vm3, %v4936_v49, 0.0  ;;  %v4945_v15 = vsel %vm2381_vm3, %v4937_v63, 0.0  ;;  %v4946_v7 = vsel %vm2381_vm3, %v4938_v39, 0.0 }
 0xfa5   :  { %v4947_v36 = vsel %vm2381_vm3, %v4939_v6, 0.0  ;;  %v4948_v53 = vsel %vm2381_vm3, %v4940_v48, 0.0  ;;  %v4949_v34 = vsel %vm2381_vm3, %v4941_v21, 0.0  ;;  %v4950_v59 = vsel %vm2381_vm3, %v4942_v4, 0.0  ;;  %5512 = vst [vmem:[%s8967_s15 + $0x40] sm:$0xff] %v4943_v9  ;;  %5513 = vst [vmem:[%s8967_s15 + $0x48] sm:$0xff] %v4944_v18 }
 0xfa6   :  { %5514 = vst [vmem:[%s8967_s15 + $0x50] sm:$0xff] %v4945_v15  ;;  %5515 = vst [vmem:[%s8967_s15 + $0x58] sm:$0xff] %v4946_v7 }
 0xfa7   :  { %5516 = vst [vmem:[%s8967_s15 + $0x60] sm:$0xff] %v4947_v36  ;;  %5517 = vst [vmem:[%s8967_s15 + $0x68] sm:$0xff] %v4948_v53 }
 0xfa8   :  { %5518 = vst [vmem:[%s8967_s15 + $0x70] sm:$0xff] %v4949_v34  ;;  %5519 = vst [vmem:[%s8967_s15 + $0x78] sm:$0xff] %v4950_v59 }

</bundles_post_ra>
